<compile_context>
chip_gen: v5e
topology: v5e:2x2
jax: 0.10.0
libtpu: 0.0.40
codegen_flags: <defaults>
</compile_context>

<pallas_src>
import jax
import jax.numpy as jnp
from jax.experimental import pallas as pl


# ------------------------------- Pallas kernel -------------------------------

def pointnetfeat_kernel(x_ref, w1_ref, w2_ref, w3_ref, bn_ref, o_ref):
    """Fused PointNetfeat forward.

    x_ref  : (M, 3)      f32   points as rows (M = B*N), channels on lanes
    w1_ref : (3, 64)     f32   conv1 weight stored (C_in, C_out)
    w2_ref : (64, 128)   bf16  conv2 weight
    w3_ref : (128, 1024) bf16  conv3 weight
    bn_ref : (8, 1024)   f32   rows [g1, b1, g2, b2, g3, b3, pad, pad]
    o_ref  : (B, 1024)   f32   global max-pooled point feature
    """
    eps = 1e-5

    def batchnorm(h, gamma, beta):
        # BatchNorm1d in training mode: biased batch stats over all B*N rows.
        mu = jnp.mean(h, axis=0, keepdims=True)
        var = jnp.mean(jnp.square(h - mu), axis=0, keepdims=True)
        return (h - mu) * jax.lax.rsqrt(var + eps) * gamma + beta

    x = x_ref[...]                                      # (M, 3) f32
    w1 = w1_ref[...]                                    # (3, 64) f32

    # conv1: K=3 contraction on the VPU (3 broadcast multiply-adds).
    # Conv bias omitted -- cancelled exactly by the BN mean subtraction.
    h = (x[:, 0:1] * w1[0:1, :]
         + x[:, 1:2] * w1[1:2, :]
         + x[:, 2:3] * w1[2:3, :])                      # (M, 64) f32
    h = jnp.maximum(batchnorm(h, bn_ref[0:1, 0:64], bn_ref[1:2, 0:64]), 0.0)

    # conv2: bf16 MXU operands, f32 accumulation; BN/ReLU stay f32.
    h = jnp.dot(h.astype(jnp.bfloat16), w2_ref[...],
                preferred_element_type=jnp.float32)     # (M, 128)
    h = jnp.maximum(batchnorm(h, bn_ref[2:3, 0:128], bn_ref[3:4, 0:128]), 0.0)

    # conv3: bf16 MXU operands, f32 accumulation; BN (no ReLU) in f32.
    h = jnp.dot(h.astype(jnp.bfloat16), w3_ref[...],
                preferred_element_type=jnp.float32)     # (M, 1024)
    h = batchnorm(h, bn_ref[4:5, :], bn_ref[5:6, :])

    # Global max pool over the N points of each batch element.
    B, D = o_ref.shape
    M = x_ref.shape[0]
    N = M // B
    o_ref[...] = jnp.max(h.reshape(B, N, D), axis=1)    # (B, 1024) lane-dense


# --------------------------------- wrapper -----------------------------------

def pointnetfeat_forward(x, w1, w2, w3, bn_params):
    """x: (B, 3, N) f32; weights stored (C_in, C_out); returns (B, 1024) f32."""
    B, c_in, N = x.shape
    assert c_in == 3
    M = B * N
    D = w3.shape[1]
    g1, be1, g2, be2, g3, be3 = bn_params

    # Points-as-rows layout; single tiny relayout outside the kernel.
    x_rows = jnp.transpose(x, (0, 2, 1)).reshape(M, 3).astype(jnp.float32)

    # Pack the 6 BN affine vectors into one lane-padded (8, D) buffer (1 DMA).
    def pad_row(v):
        v = v.astype(jnp.float32)
        return jnp.pad(v, (0, D - v.shape[0]))

    bn_pack = jnp.stack(
        [pad_row(g1), pad_row(be1),
         pad_row(g2), pad_row(be2),
         pad_row(g3), pad_row(be3),
         jnp.zeros((D,), jnp.float32), jnp.zeros((D,), jnp.float32)], axis=0)

    return pl.pallas_call(
        pointnetfeat_kernel,
        out_shape=jax.ShapeDtypeStruct((B, D), jnp.float32),
    )(x_rows,
      w1.astype(jnp.float32),
      w2.astype(jnp.bfloat16),
      w3.astype(jnp.bfloat16),
      bn_pack)


# ----------------------------------- main -------------------------------------

if __name__ == "__main__":
    key = jax.random.PRNGKey(0)
    keys = jax.random.split(key, 8)

    # Small shapes consistent with the module's forward: (B, 3, num_points).
    B, C_in, N = 2, 3, 64
    C1, C2, C3 = 64, 128, 1024     # fixed by the module architecture

    x = jax.random.normal(keys[0], (B, C_in, N), jnp.float32)

    # 1x1 Conv1d weights, stored transposed as (C_in, C_out).
    # Conv biases are not created: they cancel under training-mode BatchNorm.
    w1 = jax.random.normal(keys[1], (C_in, C1), jnp.float32) / jnp.sqrt(3.0)
    w2 = jax.random.normal(keys[2], (C1, C2), jnp.float32) / jnp.sqrt(float(C1))
    w3 = jax.random.normal(keys[3], (C2, C3), jnp.float32) / jnp.sqrt(float(C2))

    # BatchNorm affine params, PyTorch default init (weight=1, bias=0).
    g1, be1 = jnp.ones((C1,), jnp.float32), jnp.zeros((C1,), jnp.float32)
    g2, be2 = jnp.ones((C2,), jnp.float32), jnp.zeros((C2,), jnp.float32)
    g3, be3 = jnp.ones((C3,), jnp.float32), jnp.zeros((C3,), jnp.float32)

    out = pointnetfeat_forward(x, w1, w2, w3, (g1, be1, g2, be2, g3, be3))
    out = jax.block_until_ready(out)

    assert out.shape == (B, C3), out.shape
    assert bool(jnp.all(jnp.isfinite(out)))
    print("KERNEL_OK")
</pallas_src>

<mosaic_0001>
module attributes {stable_mosaic.version = 11 : i64} {
  func.func @pointnetfeat_kernel(%arg0: memref<128x3xf32, #tpu.memory_space<vmem>>, %arg1: memref<3x64xf32, #tpu.memory_space<vmem>>, %arg2: memref<64x128xbf16, #tpu.memory_space<vmem>>, %arg3: memref<128x1024xbf16, #tpu.memory_space<vmem>>, %arg4: memref<8x1024xf32, #tpu.memory_space<vmem>>, %arg5: memref<2x1024xf32, #tpu.memory_space<vmem>>) attributes {dimension_semantics = [], scalar_prefetch = 0 : i64, scratch_operands = 0 : i64, tpu.core_type = #tpu.core_type<tc>} {
    %c0 = arith.constant 0 : index
    %c0_0 = arith.constant 0 : index
    %0 = vector.load %arg0[%c0, %c0_0] : memref<128x3xf32, #tpu.memory_space<vmem>>, vector<128x3xf32>
    %c0_1 = arith.constant 0 : index
    %c0_2 = arith.constant 0 : index
    %1 = vector.load %arg1[%c0_1, %c0_2] : memref<3x64xf32, #tpu.memory_space<vmem>>, vector<3x64xf32>
    %2 = vector.extract_strided_slice %0 {offsets = [0, 0], sizes = [128, 1], strides = [1, 1]} : vector<128x3xf32> to vector<128x1xf32>
    %3 = vector.extract_strided_slice %1 {offsets = [0, 0], sizes = [1, 64], strides = [1, 1]} : vector<3x64xf32> to vector<1x64xf32>
    %4 = vector.broadcast %2 : vector<128x1xf32> to vector<128x64xf32>
    %5 = vector.broadcast %3 : vector<1x64xf32> to vector<128x64xf32>
    %6 = arith.mulf %4, %5 : vector<128x64xf32>
    %7 = vector.extract_strided_slice %0 {offsets = [0, 1], sizes = [128, 1], strides = [1, 1]} : vector<128x3xf32> to vector<128x1xf32>
    %8 = vector.extract_strided_slice %1 {offsets = [1, 0], sizes = [1, 64], strides = [1, 1]} : vector<3x64xf32> to vector<1x64xf32>
    %9 = vector.broadcast %7 : vector<128x1xf32> to vector<128x64xf32>
    %10 = vector.broadcast %8 : vector<1x64xf32> to vector<128x64xf32>
    %11 = arith.mulf %9, %10 : vector<128x64xf32>
    %12 = arith.addf %6, %11 : vector<128x64xf32>
    %13 = vector.extract_strided_slice %0 {offsets = [0, 2], sizes = [128, 1], strides = [1, 1]} : vector<128x3xf32> to vector<128x1xf32>
    %14 = vector.extract_strided_slice %1 {offsets = [2, 0], sizes = [1, 64], strides = [1, 1]} : vector<3x64xf32> to vector<1x64xf32>
    %15 = vector.broadcast %13 : vector<128x1xf32> to vector<128x64xf32>
    %16 = vector.broadcast %14 : vector<1x64xf32> to vector<128x64xf32>
    %17 = arith.mulf %15, %16 : vector<128x64xf32>
    %18 = arith.addf %12, %17 : vector<128x64xf32>
    %c0_3 = arith.constant 0 : index
    %c0_4 = arith.constant 0 : index
    %19 = vector.load %arg4[%c0_3, %c0_4] : memref<8x1024xf32, #tpu.memory_space<vmem>>, vector<1x64xf32>
    %c1 = arith.constant 1 : index
    %c0_5 = arith.constant 0 : index
    %20 = vector.load %arg4[%c1, %c0_5] : memref<8x1024xf32, #tpu.memory_space<vmem>>, vector<1x64xf32>
    %cst = arith.constant dense<0.000000e+00> : vector<64xf32>
    %21 = vector.multi_reduction <add>, %18, %cst [0] : vector<128x64xf32> to vector<64xf32>
    %22 = vector.shape_cast %21 : vector<64xf32> to vector<1x64xf32>
    %cst_6 = arith.constant 1.280000e+02 : f32
    %23 = vector.broadcast %cst_6 : f32 to vector<1x64xf32>
    %24 = arith.divf %22, %23 : vector<1x64xf32>
    %25 = vector.broadcast %24 : vector<1x64xf32> to vector<128x64xf32>
    %26 = arith.subf %18, %25 : vector<128x64xf32>
    %27 = arith.mulf %26, %26 : vector<128x64xf32>
    %cst_7 = arith.constant dense<0.000000e+00> : vector<64xf32>
    %28 = vector.multi_reduction <add>, %27, %cst_7 [0] : vector<128x64xf32> to vector<64xf32>
    %29 = vector.shape_cast %28 : vector<64xf32> to vector<1x64xf32>
    %cst_8 = arith.constant 1.280000e+02 : f32
    %30 = vector.broadcast %cst_8 : f32 to vector<1x64xf32>
    %31 = arith.divf %29, %30 : vector<1x64xf32>
    %32 = vector.broadcast %24 : vector<1x64xf32> to vector<128x64xf32>
    %33 = arith.subf %18, %32 : vector<128x64xf32>
    %cst_9 = arith.constant 9.99999974E-6 : f32
    %34 = vector.broadcast %cst_9 : f32 to vector<1x64xf32>
    %35 = arith.addf %31, %34 : vector<1x64xf32>
    %36 = math.rsqrt %35 : vector<1x64xf32>
    %37 = vector.broadcast %36 : vector<1x64xf32> to vector<128x64xf32>
    %38 = arith.mulf %33, %37 : vector<128x64xf32>
    %39 = vector.broadcast %19 : vector<1x64xf32> to vector<128x64xf32>
    %40 = arith.mulf %38, %39 : vector<128x64xf32>
    %41 = vector.broadcast %20 : vector<1x64xf32> to vector<128x64xf32>
    %42 = arith.addf %40, %41 : vector<128x64xf32>
    %cst_10 = arith.constant 0.000000e+00 : f32
    %43 = vector.broadcast %cst_10 : f32 to vector<128x64xf32>
    %44 = arith.maximumf %42, %43 : vector<128x64xf32>
    %45 = arith.truncf %44 : vector<128x64xf32> to vector<128x64xbf16>
    %c0_11 = arith.constant 0 : index
    %c0_12 = arith.constant 0 : index
    %46 = vector.load %arg2[%c0_11, %c0_12] : memref<64x128xbf16, #tpu.memory_space<vmem>>, vector<64x128xbf16>
    %cst_13 = arith.constant dense<0.000000e+00> : vector<128x128xf32>
    %47 = tpu.matmul %45, %46, %cst_13 {dimension_numbers = #tpu.dot_dimension_numbers<[1], [0], [0], [1], [0, 0, 1, 1], [], []>} : vector<128x64xbf16>, vector<64x128xbf16>, vector<128x128xf32> -> vector<128x128xf32>
    %c2 = arith.constant 2 : index
    %c0_14 = arith.constant 0 : index
    %48 = vector.load %arg4[%c2, %c0_14] : memref<8x1024xf32, #tpu.memory_space<vmem>>, vector<1x128xf32>
    %c3 = arith.constant 3 : index
    %c0_15 = arith.constant 0 : index
    %49 = vector.load %arg4[%c3, %c0_15] : memref<8x1024xf32, #tpu.memory_space<vmem>>, vector<1x128xf32>
    %cst_16 = arith.constant dense<0.000000e+00> : vector<128xf32>
    %50 = vector.multi_reduction <add>, %47, %cst_16 [0] : vector<128x128xf32> to vector<128xf32>
    %51 = vector.shape_cast %50 : vector<128xf32> to vector<1x128xf32>
    %cst_17 = arith.constant 1.280000e+02 : f32
    %52 = vector.broadcast %cst_17 : f32 to vector<1x128xf32>
    %53 = arith.divf %51, %52 : vector<1x128xf32>
    %54 = vector.broadcast %53 : vector<1x128xf32> to vector<128x128xf32>
    %55 = arith.subf %47, %54 : vector<128x128xf32>
    %56 = arith.mulf %55, %55 : vector<128x128xf32>
    %cst_18 = arith.constant dense<0.000000e+00> : vector<128xf32>
    %57 = vector.multi_reduction <add>, %56, %cst_18 [0] : vector<128x128xf32> to vector<128xf32>
    %58 = vector.shape_cast %57 : vector<128xf32> to vector<1x128xf32>
    %cst_19 = arith.constant 1.280000e+02 : f32
    %59 = vector.broadcast %cst_19 : f32 to vector<1x128xf32>
    %60 = arith.divf %58, %59 : vector<1x128xf32>
    %61 = vector.broadcast %53 : vector<1x128xf32> to vector<128x128xf32>
    %62 = arith.subf %47, %61 : vector<128x128xf32>
    %cst_20 = arith.constant 9.99999974E-6 : f32
    %63 = vector.broadcast %cst_20 : f32 to vector<1x128xf32>
    %64 = arith.addf %60, %63 : vector<1x128xf32>
    %65 = math.rsqrt %64 : vector<1x128xf32>
    %66 = vector.broadcast %65 : vector<1x128xf32> to vector<128x128xf32>
    %67 = arith.mulf %62, %66 : vector<128x128xf32>
    %68 = vector.broadcast %48 : vector<1x128xf32> to vector<128x128xf32>
    %69 = arith.mulf %67, %68 : vector<128x128xf32>
    %70 = vector.broadcast %49 : vector<1x128xf32> to vector<128x128xf32>
    %71 = arith.addf %69, %70 : vector<128x128xf32>
    %cst_21 = arith.constant 0.000000e+00 : f32
    %72 = vector.broadcast %cst_21 : f32 to vector<128x128xf32>
    %73 = arith.maximumf %71, %72 : vector<128x128xf32>
    %74 = arith.truncf %73 : vector<128x128xf32> to vector<128x128xbf16>
    %c0_22 = arith.constant 0 : index
    %c0_23 = arith.constant 0 : index
    %75 = vector.load %arg3[%c0_22, %c0_23] : memref<128x1024xbf16, #tpu.memory_space<vmem>>, vector<128x1024xbf16>
    %cst_24 = arith.constant dense<0.000000e+00> : vector<128x1024xf32>
    %76 = tpu.matmul %74, %75, %cst_24 {dimension_numbers = #tpu.dot_dimension_numbers<[1], [0], [0], [1], [0, 0, 1, 1], [], []>} : vector<128x128xbf16>, vector<128x1024xbf16>, vector<128x1024xf32> -> vector<128x1024xf32>
    %c4 = arith.constant 4 : index
    %c0_25 = arith.constant 0 : index
    %77 = vector.load %arg4[%c4, %c0_25] : memref<8x1024xf32, #tpu.memory_space<vmem>>, vector<1x1024xf32>
    %c5 = arith.constant 5 : index
    %c0_26 = arith.constant 0 : index
    %78 = vector.load %arg4[%c5, %c0_26] : memref<8x1024xf32, #tpu.memory_space<vmem>>, vector<1x1024xf32>
    %cst_27 = arith.constant dense<0.000000e+00> : vector<1024xf32>
    %79 = vector.multi_reduction <add>, %76, %cst_27 [0] : vector<128x1024xf32> to vector<1024xf32>
    %80 = vector.shape_cast %79 : vector<1024xf32> to vector<1x1024xf32>
    %cst_28 = arith.constant 1.280000e+02 : f32
    %81 = vector.broadcast %cst_28 : f32 to vector<1x1024xf32>
    %82 = arith.divf %80, %81 : vector<1x1024xf32>
    %83 = vector.broadcast %82 : vector<1x1024xf32> to vector<128x1024xf32>
    %84 = arith.subf %76, %83 : vector<128x1024xf32>
    %85 = arith.mulf %84, %84 : vector<128x1024xf32>
    %cst_29 = arith.constant dense<0.000000e+00> : vector<1024xf32>
    %86 = vector.multi_reduction <add>, %85, %cst_29 [0] : vector<128x1024xf32> to vector<1024xf32>
    %87 = vector.shape_cast %86 : vector<1024xf32> to vector<1x1024xf32>
    %cst_30 = arith.constant 1.280000e+02 : f32
    %88 = vector.broadcast %cst_30 : f32 to vector<1x1024xf32>
    %89 = arith.divf %87, %88 : vector<1x1024xf32>
    %90 = vector.broadcast %82 : vector<1x1024xf32> to vector<128x1024xf32>
    %91 = arith.subf %76, %90 : vector<128x1024xf32>
    %cst_31 = arith.constant 9.99999974E-6 : f32
    %92 = vector.broadcast %cst_31 : f32 to vector<1x1024xf32>
    %93 = arith.addf %89, %92 : vector<1x1024xf32>
    %94 = math.rsqrt %93 : vector<1x1024xf32>
    %95 = vector.broadcast %94 : vector<1x1024xf32> to vector<128x1024xf32>
    %96 = arith.mulf %91, %95 : vector<128x1024xf32>
    %97 = vector.broadcast %77 : vector<1x1024xf32> to vector<128x1024xf32>
    %98 = arith.mulf %96, %97 : vector<128x1024xf32>
    %99 = vector.broadcast %78 : vector<1x1024xf32> to vector<128x1024xf32>
    %100 = arith.addf %98, %99 : vector<128x1024xf32>
    %101 = vector.shape_cast %100 : vector<128x1024xf32> to vector<2x64x1024xf32>
    %cst_32 = arith.constant dense<0xFF800000> : vector<2x1024xf32>
    %102 = vector.multi_reduction <maximumf>, %101, %cst_32 [1] : vector<2x64x1024xf32> to vector<2x1024xf32>
    %c0_33 = arith.constant 0 : index
    %c0_34 = arith.constant 0 : index
    %103 = vector.load %arg5[%c0_33, %c0_34] : memref<2x1024xf32, #tpu.memory_space<vmem>>, vector<2x1024xf32>
    tpu.vector_store %arg5[%c0_33, %c0_34], %102 {strides = array<i32>} : memref<2x1024xf32, #tpu.memory_space<vmem>>, vector<2x1024xf32>,
    return
  }
}

</mosaic_0001>

<bundles_post_ra>
// kernel: tpu_custom_call.1
= control target key start
LH: loop header
LB: loop body
LE: loop exit
PB: predicated region body
PF: predicated region fallthrough
CT: control target
= control target key end

     0   :  { %10 = vsyncpa [#allocation3], 0  ;;  %s6208_s0 = inlined_call_operand.vmem [shape: f32[128,3], index: 0, kind: input, shape index: {}]   ;;  %s6209_s1 = inlined_call_operand.vmem [shape: f32[3,64], index: 1, kind: input, shape index: {}]   ;;  %s6210_s2 = inlined_call_operand.vmem [shape: bf16[64,128], index: 2, kind: input, shape index: {}]   ;;  %s6211_s3 = inlined_call_operand.hbm [shape: bf16[128,1024], index: 3, kind: input, shape index: {}]   ;;  %s6212_s4 = inlined_call_operand.vmem [shape: f32[8,1024], index: 4, kind: input, shape index: {}]   ;;  %s6213_s5 = inlined_call_operand.hbm [shape: f32[2,1024], index: 5, kind: output, shape index: {}]  }
   0x1   :  { %11 = vsyncpa [#allocation4], 0  ;;  %s22_s20 = sshll.u32 %s6211_s3, 4  ;;  %s3475_s21 = smov [#allocation2]   ;;  %s23_s20 = int_to_ptr.hbm [resolvable:$true] %s22_s20 }
   0x2   :  { %s24_s22 = sshll.u32 %s3475_s21, 4  ;;  %s3476_s23 = smov 512   ;;  %s25_s22 = int_to_ptr.vmem [resolvable:$true] %s24_s22 }
   0x3   :  { %s3477_s24 = smov 32  }
   0x4   :  { %30 = dma.hbm_to_vmem [thread:$0]  %s23_s20, 8192, %s25_s22, [#allocation3], %s3476_s23, %s3476_s23, %s3477_s24  }
   0x5   :  { %3471 = dma.done.wait [#allocation3], 8192  }
   0x6   :  { %3472 = vsyncadd [#allocation3], 4294959104  ;;  %v3478_v0 = vmov 2   ;;  %v3479_v1 = vmov 1   ;;  %v3480_v2 = vmov 0   ;;  %v40_v3 = vld [vmem:[%s6208_s0 + $0x10] sm:$0xff] }
   0x7   :  { %3378 = vset.pattern.permute.xlu0 %v3478_v0  ;;  %3375 = vset.pattern.permute.xlu1 %v3479_v1  ;;  %v38_v4 = vld [vmem:[%s6208_s0] sm:$0xff]  ;;  %v39_v6 = vld [vmem:[%s6208_s0 + $0x8] sm:$0xff]  ;;  %v41_v8 = vld [vmem:[%s6208_s0 + $0x18] sm:$0xff]  ;;  %vm348_vm0 = vcmask 523264   ;;  %s2993_s29 = sshll.u32 %s6213_s5, 4  ;;  %s2994_s29 = int_to_ptr.hbm [resolvable:$true] %s2993_s29 }
   0x8   :  { %3376 = vset.pattern.permute.xlu2 %v3480_v2  ;;  %250 = vperm.xlu0 %3378, %v38_v4   ;;  %v42_v5 = vld [vmem:[%s6208_s0 + $0x20] sm:$0xff]  ;;  %v47_v7 = vld [vmem:[%s6208_s0 + $0x48] sm:$0xff]  ;;  %v45_v9 = vld [vmem:[%s6208_s0 + $0x38] sm:$0xff] }
   0x9   :  { %67 = vperm.xlu2 %3376, %v40_v3   ;;  %153 = vperm.xlu1 %3375, %v38_v4   ;;  %v3549_v10 = vld [vmem:[%s6208_s0 + $0x60] sm:$0xff]  ;;  %v43_v11 = vld [vmem:[%s6208_s0 + $0x28] sm:$0xff]  ;;  %v44_v12 = vld [vmem:[%s6208_s0 + $0x30] sm:$0xff] }
   0xa   :  { %v46_v13 = vld [vmem:[%s6208_s0 + $0x40] sm:$0xff]  ;;  %v52_v14 = vld [vmem:[%s6208_s0 + $0x70] sm:$0xff]  ;;  %v49_v22 = vld [vmem:[%s6208_s0 + $0x58] sm:$0xff] }
   0xb   :  { %v48_v16 = vld [vmem:[%s6208_s0 + $0x50] sm:$0xff]  ;;  %v54_v17 = vld [vmem:[%s6209_s1] sm:$0x7]  ;;  %v51_v29 = vld [vmem:[%s6208_s0 + $0x68] sm:$0xff] }
   0xc   :  { %v3580_v18 = vperm.slane %v54_v17, 0  ;;  %v3583_v20 = vperm.slane %v54_v17, 1  ;;  %v3592_v26 = vperm.slane %v54_v17, 2  ;;  %v53_v44 = vld [vmem:[%s6208_s0 + $0x78] sm:$0xff] }
  0x10   :  { %266 = vperm.xlu0 %3378, %v42_v5  }
  0x11   :  { %3377 = vset.pattern.permute.xlu2 %v3479_v1  ;;  %157 = vperm.xlu1 %3375, %v39_v6  }
  0x12   :  { %161 = vperm.xlu2 %3377, %v40_v3  }
  0x18   :  { %286 = vperm.xlu0 %3378, %v47_v7  }
  0x19   :  { %3379 = vset.pattern.permute.xlu1 %v3478_v0 }
  0x1a   :  { %3380 = vset.pattern.permute.xlu2 %v3480_v2  ;;  %254 = vperm.xlu1 %3379, %v39_v6  }
  0x1b   :  { %72 = vperm.xlu2 %3380, %v41_v8  }
  0x20   :  { %3391 = vset.pattern.permute.xlu0 %v3479_v1 }
  0x21   :  { %181 = vperm.xlu0 %3391, %v45_v9  }
  0x22   :  { %3381 = vset.pattern.permute.xlu1 %v3479_v1 }
  0x23   :  { %3382 = vset.pattern.permute.xlu2 %v3478_v0  ;;  %165 = vperm.xlu1 %3381, %v41_v8  }
  0x24   :  { %258 = vperm.xlu2 %3382, %v40_v3  }
  0x29   :  { %201 = vperm.xlu0 %3391, %v3549_v10  }
  0x2b   :  { %169 = vperm.xlu1 %3381, %v42_v5  }
  0x2c   :  { %262 = vperm.xlu2 %3382, %v41_v8  }
  0x31   :  { %3394 = vset.pattern.permute.xlu0 %v3480_v2 }
  0x32   :  { %57 = vperm.xlu0 %3394, %v38_v4  }
  0x33   :  { %3383 = vset.pattern.permute.xlu1 %v3480_v2 }
  0x34   :  { %3384 = vset.pattern.permute.xlu2 %v3479_v1  ;;  %82 = vperm.xlu1 %3383, %v43_v11  }
  0x35   :  { %173 = vperm.xlu2 %3384, %v43_v11  }
  0x3a   :  { %62 = vperm.xlu0 %3394, %v39_v6  }
  0x3c   :  { %87 = vperm.xlu1 %3383, %v44_v12  }
  0x3d   :  { %177 = vperm.xlu2 %3384, %v44_v12  }
  0x42   :  { %77 = vperm.xlu0 %3394, %v42_v5  }
  0x44   :  { %3385 = vset.pattern.permute.xlu1 %v3478_v0 }
  0x45   :  { %3386 = vset.pattern.permute.xlu2 %v3480_v2  ;;  %270 = vperm.xlu1 %3385, %v43_v11  }
  0x46   :  { %92 = vperm.xlu2 %3386, %v45_v9  }
  0x4a   :  { %102 = vperm.xlu0 %3394, %v47_v7  }
  0x4d   :  { %274 = vperm.xlu1 %3385, %v44_v12  }
  0x4e   :  { %97 = vperm.xlu2 %3386, %v46_v13  }
  0x52   :  { %127 = vperm.xlu0 %3394, %v52_v14  }
  0x55   :  { %3387 = vset.pattern.permute.xlu1 %v3479_v1 }
  0x56   :  { %3388 = vset.pattern.permute.xlu2 %v3478_v0  ;;  %185 = vperm.xlu1 %3387, %v46_v13  }
  0x57   :  { %278 = vperm.xlu2 %3388, %v45_v9  }
  0x5a   :  { %3399 = vset.pattern.permute.xlu0 %v3478_v0 }
  0x5b   :  { %306 = vperm.xlu0 %3399, %v52_v14  }
  0x5e   :  { %189 = vperm.xlu1 %3387, %v47_v7  }
  0x5f   :  { %282 = vperm.xlu2 %3388, %v46_v13  }
  0x63   :  { %v68_v15 = vpop.permute.xlu2 %67 }
  0x64   :  { %v138_v19 = vmul.f32 %v3580_v18, %v68_v15 }
  0x66   :  { %3389 = vset.pattern.permute.xlu1 %v3480_v2 }
  0x67   :  { %3390 = vset.pattern.permute.xlu2 %v3479_v1  ;;  %107 = vperm.xlu1 %3389, %v48_v16  }
  0x68   :  { %193 = vperm.xlu2 %3390, %v48_v16  }
  0x6c   :  { %v162_v21 = vpop.permute.xlu2 %161 }
  0x6d   :  { %v219_v23 = vmul.f32 %v3583_v20, %v162_v21 }
  0x6f   :  { %v235_v24 = vadd.f32 %v219_v23, %v138_v19  ;;  %112 = vperm.xlu1 %3389, %v49_v22  }
  0x70   :  { %197 = vperm.xlu2 %3390, %v49_v22  }
  0x75   :  { %v73_v25 = vpop.permute.xlu2 %72 }
  0x76   :  { %v139_v41 = vmul.f32 %v3580_v18, %v73_v25 }
  0x77   :  { %3392 = vset.pattern.permute.xlu1 %v3478_v0 }
  0x78   :  { %3393 = vset.pattern.permute.xlu2 %v3480_v2  ;;  %290 = vperm.xlu1 %3392, %v48_v16  }
  0x79   :  { %117 = vperm.xlu2 %3393, %v3549_v10  }
  0x7a   :  { %v251_v27 = vpop.permute.xlu0 %250 }
  0x7b   :  { %v154_v28 = vpop.permute.xlu1 %153  ;;  %v314_v58 = vmul.f32 %v3592_v26, %v251_v27 }
  0x7c   :  { %v217_v56 = vmul.f32 %v3583_v20, %v154_v28 }
  0x7e   :  { %v259_v30 = vpop.permute.xlu2 %258 }
  0x7f   :  { %v316_v31 = vmul.f32 %v3592_v26, %v259_v30 }
  0x80   :  { %294 = vperm.xlu1 %3392, %v49_v22  }
  0x81   :  { %122 = vperm.xlu2 %3393, %v51_v29   ;;  %v3598_v32 = vadd.f32 %v316_v31, %v235_v24 }
  0x82   :  { %v267_v33 = vpop.permute.xlu0 %266 }
  0x83   :  { %v158_v34 = vpop.permute.xlu1 %157  ;;  %v352_v12 = vsel %vm348_vm0, %v3598_v32, 0.0  ;;  %v318_v13 = vmul.f32 %v3592_v26, %v267_v33 }
  0x84   :  { %v218_v61 = vmul.f32 %v3583_v20, %v158_v34 }
  0x86   :  { %v263_v35 = vpop.permute.xlu2 %262 }
  0x87   :  { %v317_v42 = vmul.f32 %v3592_v26, %v263_v35 }
  0x88   :  { %3395 = vset.pattern.permute.xlu1 %v3479_v1 }
  0x89   :  { %3396 = vset.pattern.permute.xlu2 %v3478_v0  ;;  %205 = vperm.xlu1 %3395, %v51_v29  }
  0x8a   :  { %298 = vperm.xlu2 %3396, %v3549_v10   ;;  %v3603_v36 = vpop.permute.xlu0 %286 }
  0x8c   :  { %v255_v37 = vpop.permute.xlu1 %254 }
  0x8f   :  { %v174_v38 = vpop.permute.xlu2 %173 }
  0x90   :  { %v222_v51 = vmul.f32 %v3583_v20, %v174_v38 }
  0x91   :  { %209 = vperm.xlu1 %3395, %v52_v14  }
  0x92   :  { %302 = vperm.xlu2 %3396, %v51_v29  }
  0x93   :  { %v182_v39 = vpop.permute.xlu0 %181 }
  0x94   :  { %v224_v22 = vmul.f32 %v3583_v20, %v182_v39 }
  0x95   :  { %v166_v40 = vpop.permute.xlu1 %165 }
  0x96   :  { %v220_v43 = vmul.f32 %v3583_v20, %v166_v40 }
  0x97   :  { %v178_v48 = vpop.permute.xlu2 %177 }
  0x98   :  { %v236_v45 = vadd.f32 %v220_v43, %v139_v41  ;;  %v223_v62 = vmul.f32 %v3583_v20, %v178_v48 }
  0x99   :  { %3397 = vset.pattern.permute.xlu1 %v3480_v2 }
  0x9a   :  { %3398 = vset.pattern.permute.xlu2 %v3479_v1  ;;  %v3613_v46 = vadd.f32 %v317_v42, %v236_v45  ;;  %132 = vperm.xlu1 %3397, %v53_v44   ;;  %v315_v1 = vmul.f32 %v3592_v26, %v255_v37 }
  0x9b   :  { %213 = vperm.xlu2 %3398, %v53_v44   ;;  %v3615_v47 = vpop.permute.xlu0 %201 }
  0x9c   :  { %v354_v17 = vsel %vm348_vm0, %v3613_v46, 0.0 }
  0x9d   :  { %v170_v49 = vpop.permute.xlu1 %169 }
  0x9e   :  { %v221_v14 = vmul.f32 %v3583_v20, %v170_v49 }
  0xa0   :  { %v93_v53 = vpop.permute.xlu2 %92 }
  0xa1   :  { %v143_v23 = vmul.f32 %v3580_v18, %v93_v53 }
  0xa2   :  { %3400 = vset.pattern.permute.xlu1 %v3478_v0 }
  0xa3   :  { %310 = vperm.xlu1 %3400, %v53_v44   ;;  %v240_v31 = vadd.f32 %v224_v22, %v143_v23 }
  0xa4   :  { %v58_v50 = vpop.permute.xlu0 %57 }
  0xa5   :  { %v136_v54 = vmul.f32 %v3580_v18, %v58_v50 }
  0xa6   :  { %v83_v52 = vpop.permute.xlu1 %82 }
  0xa7   :  { %v141_v55 = vmul.f32 %v3580_v18, %v83_v52  ;;  %v233_v59 = vadd.f32 %v217_v56, %v136_v54 }
  0xa8   :  { %v98_v5 = vpop.permute.xlu2 %97 }
  0xa9   :  { %v238_v57 = vadd.f32 %v222_v51, %v141_v55  ;;  %v3627_v2 = vadd.f32 %v314_v58, %v233_v59 }
  0xab   :  { %v349_v8 = vsel %vm348_vm0, %v3627_v2, 0.0 }
  0xac   :  { %v63_v60 = vpop.permute.xlu0 %62 }
  0xad   :  { %v137_v63 = vmul.f32 %v3580_v18, %v63_v60 }
  0xae   :  { %v88_v0 = vpop.permute.xlu1 %87 }
  0xaf   :  { %v234_v3 = vadd.f32 %v218_v61, %v137_v63  ;;  %v142_v4 = vmul.f32 %v3580_v18, %v88_v0  ;;  %v144_v0 = vmul.f32 %v3580_v18, %v98_v5 }
  0xb1   :  { %v3630_v6 = vadd.f32 %v315_v1, %v234_v3  ;;  %v239_v7 = vadd.f32 %v223_v62, %v142_v4  ;;  %v279_v29 = vpop.permute.xlu2 %278 }
  0xb2   :  { %v321_v33 = vmul.f32 %v3592_v26, %v279_v29 }
  0xb3   :  { %v350_v9 = vsel %vm348_vm0, %v3630_v6, 0.0 }
  0xb4   :  { %v351_v10 = vadd.f32 %v350_v9, %v349_v8  ;;  %v78_v11 = vpop.permute.xlu0 %77  ;;  %v3655_v39 = vadd.f32 %v321_v33, %v240_v31 }
  0xb5   :  { %v140_v15 = vmul.f32 %v3580_v18, %v78_v11 }
  0xb6   :  { %v353_v16 = vadd.f32 %v352_v12, %v351_v10  ;;  %v362_v42 = vsel %vm348_vm0, %v3655_v39, 0.0  ;;  %v323_v10 = vmul.f32 %v3592_v26, %v3603_v36 }
  0xb7   :  { %v237_v19 = vadd.f32 %v221_v14, %v140_v15  ;;  %v271_v21 = vpop.permute.xlu1 %270 }
  0xb8   :  { %v355_v24 = vadd.f32 %v354_v17, %v353_v16  ;;  %v319_v25 = vmul.f32 %v3592_v26, %v271_v21 }
  0xb9   :  { %v3646_v27 = vadd.f32 %v318_v13, %v237_v19  ;;  %v283_v49 = vpop.permute.xlu2 %282 }
  0xba   :  { %v3648_v28 = vadd.f32 %v319_v25, %v238_v57  ;;  %v322_v3 = vmul.f32 %v3592_v26, %v283_v49  ;;  %v229_v25 = vmul.f32 %v3583_v20, %v3615_v47  ;;  %v3481_v49 = vmov 128.0  }
  0xbb   :  { %v356_v30 = vsel %vm348_vm0, %v3646_v27, 0.0  ;;  %3401 = vrcp.f32 %v3481_v49 }
  0xbc   :  { %v357_v34 = vadd.f32 %v356_v30, %v355_v24  ;;  %v358_v35 = vsel %vm348_vm0, %v3648_v28, 0.0  ;;  %v103_v59 = vpop.permute.xlu0 %102 }
  0xbd   :  { %v145_v62 = vmul.f32 %v3580_v18, %v103_v59 }
  0xbe   :  { %v359_v37 = vadd.f32 %v358_v35, %v357_v34 }
  0xbf   :  { %v275_v38 = vpop.permute.xlu1 %274 }
  0xc0   :  { %v320_v40 = vmul.f32 %v3592_v26, %v275_v38 }
  0xc2   :  { %v3658_v41 = vadd.f32 %v320_v40, %v239_v7  ;;  %v194_v51 = vpop.permute.xlu2 %193 }
  0xc3   :  { %v227_v8 = vmul.f32 %v3583_v20, %v194_v51 }
  0xc4   :  { %v360_v43 = vsel %vm348_vm0, %v3658_v41, 0.0  ;;  %v128_v11 = vpop.permute.xlu0 %127 }
  0xc5   :  { %v361_v44 = vadd.f32 %v360_v43, %v359_v37  ;;  %v150_v37 = vmul.f32 %v3580_v18, %v128_v11 }
  0xc7   :  { %v363_v45 = vadd.f32 %v362_v42, %v361_v44 }
  0xc8   :  { %v186_v48 = vpop.permute.xlu1 %185 }
  0xc9   :  { %v225_v61 = vmul.f32 %v3583_v20, %v186_v48 }
  0xca   :  { %v198_v53 = vpop.permute.xlu2 %197 }
  0xcb   :  { %v241_v4 = vadd.f32 %v225_v61, %v144_v0  ;;  %v228_v14 = vmul.f32 %v3583_v20, %v198_v53  ;;  %v3402_v61 = vpop.eup %3401 }
  0xcc   :  { %vm391_vm1 = vweird.f32 %v3402_v61 }
  0xcd   :  { %v3673_v13 = vadd.f32 %v322_v3, %v241_v4  ;;  %v307_v38 = vpop.permute.xlu0 %306 }
  0xcf   :  { %v364_v22 = vsel %vm348_vm0, %v3673_v13, 0.0 }
  0xd0   :  { %v190_v50 = vpop.permute.xlu1 %189  ;;  %v365_v35 = vadd.f32 %v364_v22, %v363_v45 }
  0xd1   :  { %v226_v63 = vmul.f32 %v3583_v20, %v190_v50 }
  0xd3   :  { %v118_v56 = vpop.permute.xlu2 %117  ;;  %v242_v7 = vadd.f32 %v226_v63, %v145_v62 }
  0xd4   :  { %v148_v30 = vmul.f32 %v3580_v18, %v118_v56 }
  0xd5   :  { %v3678_v16 = vadd.f32 %v323_v10, %v242_v7  ;;  %v387_v7 = vmul.f32 128.0, %v3402_v61 }
  0xd6   :  { %v245_v50 = vadd.f32 %v229_v25, %v148_v30 }
  0xd7   :  { %v366_v29 = vsel %vm348_vm0, %v3678_v16, 0.0  ;;  %v388_v10 = vsub.f32 1.0, %v387_v7 }
  0xd8   :  { %v367_v48 = vadd.f32 %v366_v29, %v365_v35 }
  0xd9   :  { %v108_v52 = vpop.permute.xlu1 %107 }
  0xda   :  { %v146_v9 = vmul.f32 %v3580_v18, %v108_v52  ;;  %v328_v52 = vmul.f32 %v3592_v26, %v307_v38 }
  0xdb   :  { %v123_v58 = vpop.permute.xlu2 %122 }
  0xdc   :  { %v243_v17 = vadd.f32 %v227_v8, %v146_v9  ;;  %v149_v31 = vmul.f32 %v3580_v18, %v123_v58 }
  0xe1   :  { %v113_v54 = vpop.permute.xlu1 %112 }
  0xe2   :  { %v147_v5 = vmul.f32 %v3580_v18, %v113_v54 }
  0xe4   :  { %v299_v1 = vpop.permute.xlu2 %298  ;;  %v244_v36 = vadd.f32 %v228_v14, %v147_v5  ;;  %v389_v5 = vmul.f32 %v3402_v61, %v388_v10 }
  0xe5   :  { %v326_v40 = vmul.f32 %v3592_v26, %v299_v1 }
  0xea   :  { %v291_v55 = vpop.permute.xlu1 %290 }
  0xeb   :  { %v324_v15 = vmul.f32 %v3592_v26, %v291_v55  ;;  %v3703_v55 = vadd.f32 %v326_v40, %v245_v50 }
  0xec   :  { %v303_v21 = vpop.permute.xlu2 %302 }
  0xed   :  { %v3683_v23 = vadd.f32 %v324_v15, %v243_v17  ;;  %v327_v43 = vmul.f32 %v3592_v26, %v303_v21  ;;  %v372_v62 = vsel %vm348_vm0, %v3703_v55, 0.0 }
  0xef   :  { %v368_v47 = vsel %vm348_vm0, %v3683_v23, 0.0 }
  0xf0   :  { %v369_v53 = vadd.f32 %v368_v47, %v367_v48 }
  0xf2   :  { %v295_v57 = vpop.permute.xlu1 %294 }
  0xf3   :  { %v325_v19 = vmul.f32 %v3592_v26, %v295_v57 }
  0xf5   :  { %v3692_v33 = vadd.f32 %v325_v19, %v244_v36  ;;  %v214_v54 = vpop.permute.xlu2 %213  ;;  %v390_v19 = vadd.f32 %v3402_v61, %v389_v5 }
  0xf6   :  { %v232_v59 = vmul.f32 %v3583_v20, %v214_v54 }
  0xf7   :  { %v370_v51 = vsel %vm348_vm0, %v3692_v33, 0.0  ;;  %v3722_v36 = vsel %vm391_vm1, %v3402_v61, %v390_v19 }
  0xf8   :  { %v371_v57 = vadd.f32 %v370_v51, %v369_v53 }
  0xfa   :  { %v373_v0 = vadd.f32 %v372_v62, %v371_v57 }
  0xfb   :  { %v206_v60 = vpop.permute.xlu1 %205 }
  0xfc   :  { %v230_v24 = vmul.f32 %v3583_v20, %v206_v60 }
  0xfe   :  { %v246_v42 = vadd.f32 %v230_v24, %v149_v31 }
 0x100   :  { %v3705_v56 = vadd.f32 %v327_v43, %v246_v42 }
 0x102   :  { %v374_v63 = vsel %vm348_vm0, %v3705_v56, 0.0 }
 0x103   :  { %v210_v12 = vpop.permute.xlu1 %209  ;;  %v375_v9 = vadd.f32 %v374_v63, %v373_v0 }
 0x104   :  { %v231_v34 = vmul.f32 %v3583_v20, %v210_v12 }
 0x106   :  { %v247_v45 = vadd.f32 %v231_v34, %v150_v37 }
 0x108   :  { %v3707_v58 = vadd.f32 %v328_v52, %v247_v45 }
 0x10a   :  { %v376_v3 = vsel %vm348_vm0, %v3707_v58, 0.0 }
 0x10c   :  { %v133_v44 = vpop.permute.xlu1 %132 }
 0x10d   :  { %v151_v60 = vmul.f32 %v3580_v18, %v133_v44  ;;  %v377_v18 = vadd.f32 %v376_v3, %v375_v9 }
 0x10f   :  { %v248_v4 = vadd.f32 %v232_v59, %v151_v60 }
 0x115   :  { %v311_v1 = vpop.permute.xlu1 %310 }
 0x116   :  { %v329_v8 = vmul.f32 %v3592_v26, %v311_v1 }
 0x118   :  { %v3718_v20 = vadd.f32 %v329_v8, %v248_v4 }
 0x11a   :  { %v378_v11 = vsel %vm348_vm0, %v3718_v20, 0.0 }
 0x11b   :  { %v379_v12 = vadd.f32 %v378_v11, %v377_v18 }
 0x11d   :  { %v380_v14 = vrot.slane %v379_v12, 4 }
 0x11f   :  { %v381_v15 = vadd.f32 %v380_v14, %v379_v12 }
 0x121   :  { %v382_v17 = vrot.slane %v381_v15, 2 }
 0x123   :  { %v383_v21 = vadd.f32 %v382_v17, %v381_v15 }
 0x125   :  { %v384_v22 = vrot.slane %v383_v21, 1 }
 0x127   :  { %v385_v26 = vadd.f32 %v384_v22, %v383_v21 }
 0x129   :  { %v393_v24 = vmul.f32 %v3722_v36, %v385_v26 }
 0x12b   :  { %v3726_v25 = vsub.f32 %v3627_v2, %v393_v24  ;;  %v3729_v29 = vsub.f32 %v3630_v6, %v393_v24  ;;  %v3732_v30 = vsub.f32 %v3598_v32, %v393_v24  ;;  %v3735_v31 = vsub.f32 %v3613_v46, %v393_v24 }
 0x12c   :  { %v3738_v34 = vsub.f32 %v3646_v27, %v393_v24  ;;  %v3741_v35 = vsub.f32 %v3648_v28, %v393_v24  ;;  %v3744_v37 = vsub.f32 %v3658_v41, %v393_v24  ;;  %v3747_v2 = vsub.f32 %v3655_v39, %v393_v24 }
 0x12d   :  { %v410_v6 = vmul.f32 %v3726_v25, %v3726_v25  ;;  %v411_v32 = vmul.f32 %v3729_v29, %v3729_v29  ;;  %v412_v46 = vmul.f32 %v3732_v30, %v3732_v30  ;;  %v413_v27 = vmul.f32 %v3735_v31, %v3735_v31 }
 0x12e   :  { %v414_v39 = vmul.f32 %v3738_v34, %v3738_v34  ;;  %v415_v42 = vmul.f32 %v3741_v35, %v3741_v35  ;;  %v3766_v48 = vsub.f32 %v3673_v13, %v393_v24  ;;  %v416_v49 = vmul.f32 %v3744_v37, %v3744_v37 }
 0x12f   :  { %v426_v28 = vsel %vm348_vm0, %v410_v6, 0.0  ;;  %v427_v41 = vsel %vm348_vm0, %v411_v32, 0.0  ;;  %v429_v40 = vsel %vm348_vm0, %v412_v46, 0.0  ;;  %v431_v43 = vsel %vm348_vm0, %v413_v27, 0.0  ;;  %v3290_v6 = vld [vmem:[%s6210_s2 + $0x18] sm:$0xff]  ;;  %v3289_v27 = vld [vmem:[%s6210_s2 + $0x10] sm:$0xff] }
 0x130   :  { %v428_v38 = vadd.f32 %v427_v41, %v426_v28  ;;  %v433_v50 = vsel %vm348_vm0, %v414_v39, 0.0  ;;  %v3772_v45 = vsub.f32 %v3678_v16, %v393_v24  ;;  %v417_v52 = vmul.f32 %v3747_v2, %v3747_v2  ;;  %607 = vmatpush.bf16.msra.mxu0 %v3290_v6  ;;  %3355 = vmatpush.bf16.msra.mxu1 %v3290_v6  ;;  %v3288_v41 = vld [vmem:[%s6210_s2 + $0x8] sm:$0xff] }
 0x131   :  { %v435_v53 = vsel %vm348_vm0, %v415_v42, 0.0  ;;  %v3778_v57 = vsub.f32 %v3683_v23, %v393_v24  ;;  %v418_v13 = vmul.f32 %v3766_v48, %v3766_v48  ;;  %v437_v59 = vsel %vm348_vm0, %v416_v49, 0.0  ;;  %3356 = vmatpush.bf16.msra.mxu2 %v3290_v6  ;;  %3357 = vmatpush.bf16.msra.mxu3 %v3290_v6 }
 0x132   :  { %v430_v47 = vadd.f32 %v429_v40, %v428_v38  ;;  %v3784_v61 = vsub.f32 %v3692_v33, %v393_v24  ;;  %v419_v16 = vmul.f32 %v3772_v45, %v3772_v45  ;;  %v439_v62 = vsel %vm348_vm0, %v417_v52, 0.0  ;;  %v3287_v40 = vld [vmem:[%s6210_s2] sm:$0xff] }
 0x133   :  { %v3790_v0 = vsub.f32 %v3703_v55, %v393_v24  ;;  %v420_v23 = vmul.f32 %v3778_v57, %v3778_v57  ;;  %v441_v1 = vsel %vm348_vm0, %v418_v13, 0.0  ;;  %v3796_v4 = vsub.f32 %v3705_v56, %v393_v24  ;;  %v3835_v13 = vld [vmem:[%s6212_s4] ss:$0 sm:$0xff] }
 0x134   :  { %v432_v44 = vadd.f32 %v431_v43, %v430_v47  ;;  %v421_v33 = vmul.f32 %v3784_v61, %v3784_v61  ;;  %v443_v7 = vsel %vm348_vm0, %v419_v16, 0.0  ;;  %v3802_v9 = vsub.f32 %v3707_v58, %v393_v24  ;;  %608 = vmatpush.bf16.msra.mxu0 %v3289_v27  ;;  %3358 = vmatpush.bf16.msra.mxu1 %v3289_v27 }
 0x135   :  { %v422_v55 = vmul.f32 %v3790_v0, %v3790_v0  ;;  %v445_v18 = vsel %vm348_vm0, %v420_v23, 0.0  ;;  %v409_v11 = vsub.f32 %v3718_v20, %v393_v24  ;;  %v423_v56 = vmul.f32 %v3796_v4, %v3796_v4  ;;  %3359 = vmatpush.bf16.msra.mxu2 %v3289_v27  ;;  %3360 = vmatpush.bf16.msra.mxu3 %v3289_v27 }
 0x136   :  { %v434_v51 = vadd.f32 %v433_v50, %v432_v44  ;;  %v447_v12 = vsel %vm348_vm0, %v421_v33, 0.0  ;;  %v424_v5 = vmul.f32 %v3802_v9, %v3802_v9 }
 0x137   :  { %v449_v58 = vsel %vm348_vm0, %v422_v55, 0.0  ;;  %v425_v17 = vmul.f32 %v409_v11, %v409_v11  ;;  %v451_v19 = vsel %vm348_vm0, %v423_v56, 0.0 }
 0x138   :  { %v436_v54 = vadd.f32 %v435_v53, %v434_v51  ;;  %v453_v22 = vsel %vm348_vm0, %v424_v5, 0.0  ;;  %609 = vmatpush.bf16.msra.mxu0 %v3288_v41  ;;  %3361 = vmatpush.bf16.msra.mxu1 %v3288_v41 }
 0x139   :  { %v455_v20 = vsel %vm348_vm0, %v425_v17, 0.0  ;;  %3362 = vmatpush.bf16.msra.mxu2 %v3288_v41  ;;  %3363 = vmatpush.bf16.msra.mxu3 %v3288_v41 }
 0x13a   :  { %v438_v60 = vadd.f32 %v437_v59, %v436_v54 }
 0x13c   :  { %v440_v63 = vadd.f32 %v439_v62, %v438_v60  ;;  %610 = vmatpush.bf16.msra.mxu0 %v3287_v40  ;;  %3364 = vmatpush.bf16.msra.mxu1 %v3287_v40 }
 0x13d   :  { %3365 = vmatpush.bf16.msra.mxu2 %v3287_v40  ;;  %3366 = vmatpush.bf16.msra.mxu3 %v3287_v40 }
 0x13e   :  { %v442_v3 = vadd.f32 %v441_v1, %v440_v63  ;;  %v3847_v63 = vld [vmem:[%s6212_s4 + $0x1] ss:$0 sm:$0xff] }
 0x140   :  { %v444_v8 = vadd.f32 %v443_v7, %v442_v3 }
 0x142   :  { %v446_v10 = vadd.f32 %v445_v18, %v444_v8 }
 0x144   :  { %v448_v14 = vadd.f32 %v447_v12, %v446_v10 }
 0x146   :  { %v450_v15 = vadd.f32 %v449_v58, %v448_v14 }
 0x148   :  { %v452_v21 = vadd.f32 %v451_v19, %v450_v15 }
 0x14a   :  { %v454_v26 = vadd.f32 %v453_v22, %v452_v21 }
 0x14c   :  { %v456_v24 = vadd.f32 %v455_v20, %v454_v26 }
 0x14e   :  { %v457_v32 = vrot.slane %v456_v24, 4 }
 0x150   :  { %v458_v46 = vadd.f32 %v457_v32, %v456_v24 }
 0x152   :  { %v459_v28 = vrot.slane %v458_v46, 2 }
 0x154   :  { %v460_v38 = vadd.f32 %v459_v28, %v458_v46 }
 0x156   :  { %v461_v39 = vrot.slane %v460_v38, 1 }
 0x158   :  { %v462_v47 = vadd.f32 %v461_v39, %v460_v38 }
 0x15a   :  { %v463_v42 = vmul.f32 %v462_v47, %v3722_v36 }
 0x15c   :  { %v464_v43 = vadd.f32 1e-05, %v463_v42 }
 0x15e   :  { %3403 = vrsqrt.f32 %v464_v43  ;;  %vm471_vm3 = vweird.f32 %v464_v43 }
 0x164   :  { %v3404_v44 = vpop.eup %3403 }
 0x165   :  { %v466_v49 = vmul.f32 %v3404_v44, %v464_v43  ;;  %vm472_vm2 = vweird.f32 %v3404_v44 }
 0x166   :  { %vm473_vm4 = vmor %vm471_vm3, %vm472_vm2 }
 0x167   :  { %v467_v50 = vmul.f32 %v3404_v44, %v466_v49 }
 0x169   :  { %v468_v51 = vmul.f32 0.5, %v467_v50 }
 0x16b   :  { %v469_v52 = vsub.f32 1.5, %v468_v51 }
 0x16d   :  { %v470_v53 = vmul.f32 %v3404_v44, %v469_v52 }
 0x16f   :  { %v3830_v54 = vsel %vm473_vm4, %v3404_v44, %v470_v53 }
 0x170   :  { %v490_v59 = vmul.f32 %v3830_v54, %v409_v11  ;;  %v475_v60 = vmul.f32 %v3830_v54, %v3726_v25  ;;  %v476_v16 = vmul.f32 %v3830_v54, %v3729_v29  ;;  %v479_v62 = vmul.f32 %v3830_v54, %v3738_v34 }
 0x171   :  { %v480_v23 = vmul.f32 %v3830_v54, %v3741_v35  ;;  %v483_v1 = vmul.f32 %v3830_v54, %v3766_v48  ;;  %v484_v25 = vmul.f32 %v3830_v54, %v3772_v45  ;;  %v489_v29 = vmul.f32 %v3830_v54, %v3802_v9 }
 0x172   :  { %v491_v3 = vmul.f32 %v475_v60, %v3835_v13  ;;  %v492_v34 = vmul.f32 %v476_v16, %v3835_v13  ;;  %v495_v33 = vmul.f32 %v479_v62, %v3835_v13  ;;  %v506_v7 = vmul.f32 %v490_v59, %v3835_v13 }
 0x173   :  { %v496_v8 = vmul.f32 %v480_v23, %v3835_v13  ;;  %v499_v35 = vmul.f32 %v483_v1, %v3835_v13  ;;  %v500_v48 = vmul.f32 %v484_v25, %v3835_v13  ;;  %v505_v55 = vmul.f32 %v489_v29, %v3835_v13 }
 0x174   :  { %v507_v45 = vadd.f32 %v491_v3, %v3847_v63  ;;  %v508_v9 = vadd.f32 %v492_v34, %v3847_v63  ;;  %v511_v18 = vadd.f32 %v495_v33, %v3847_v63  ;;  %v522_v10 = vadd.f32 %v506_v7, %v3847_v63 }
 0x175   :  { %v512_v11 = vadd.f32 %v496_v8, %v3847_v63  ;;  %v515_v56 = vadd.f32 %v499_v35, %v3847_v63  ;;  %v516_v12 = vadd.f32 %v500_v48, %v3847_v63  ;;  %v521_v14 = vadd.f32 %v505_v55, %v3847_v63 }
 0x176   :  { %v523_v5 = vmax.f32 %v507_v45, 0.0  ;;  %v524_v58 = vmax.f32 %v508_v9, 0.0  ;;  %v527_v15 = vmax.f32 %v511_v18, 0.0  ;;  %v538_v17 = vmax.f32 %v522_v10, 0.0 }
 0x177   :  { %v528_v19 = vmax.f32 %v512_v11, 0.0  ;;  %v531_v21 = vmax.f32 %v515_v56, 0.0  ;;  %v532_v22 = vmax.f32 %v516_v12, 0.0  ;;  %v537_v26 = vmax.f32 %v521_v14, 0.0 }
 0x178   :  { %v539_v20 = vpack.c.bf16 %v524_v58, %v523_v5  ;;  %v477_v24 = vmul.f32 %v3830_v54, %v3732_v30  ;;  %v478_v6 = vmul.f32 %v3830_v54, %v3735_v31  ;;  %v481_v32 = vmul.f32 %v3830_v54, %v3744_v37 }
 0x179   :  { %v541_v46 = vpack.c.bf16 %v528_v19, %v527_v15  ;;  %v543_v27 = vpack.c.bf16 %v532_v22, %v531_v21  ;;  %v546_v28 = vpack.c.bf16 %v538_v17, %v537_v26  ;;  %v482_v41 = vmul.f32 %v3830_v54, %v3747_v2 }
 0x17a   :  { %3019 = vmatmul.msk.bf16.vlgmr.msra.gmra.mxu0 %vm348_vm0, %v539_v20  ;;  %v485_v38 = vmul.f32 %v3830_v54, %v3778_v57  ;;  %v486_v30 = vmul.f32 %v3830_v54, %v3784_v61  ;;  %v493_v31 = vmul.f32 %v477_v24, %v3835_v13  ;;  %v494_v37 = vmul.f32 %v478_v6, %v3835_v13 }
 0x17b   :  { %3021 = vmatmul.msk.bf16.vlgmr.msra.gmra.mxu1 %vm348_vm0, %v541_v46  ;;  %3023 = vmatmul.msk.bf16.vlgmr.msra.gmra.mxu2 %vm348_vm0, %v543_v27  ;;  %v497_v39 = vmul.f32 %v481_v32, %v3835_v13  ;;  %v498_v40 = vmul.f32 %v482_v41, %v3835_v13  ;;  %v487_v1 = vmul.f32 %v3830_v54, %v3790_v0 }
 0x17c   :  { %3026 = vmatmul.msk.bf16.vlgmr.msra.gmra.mxu3 %vm348_vm0, %v546_v28  ;;  %v501_v2 = vmul.f32 %v485_v38, %v3835_v13  ;;  %v502_v57 = vmul.f32 %v486_v30, %v3835_v13  ;;  %v509_v61 = vadd.f32 %v493_v31, %v3847_v63  ;;  %v510_v43 = vadd.f32 %v494_v37, %v3847_v63 }
 0x17d   :  { %v513_v49 = vadd.f32 %v497_v39, %v3847_v63  ;;  %v514_v50 = vadd.f32 %v498_v40, %v3847_v63  ;;  %v488_v25 = vmul.f32 %v3830_v54, %v3796_v4  ;;  %v503_v29 = vmul.f32 %v487_v1, %v3835_v13 }
 0x17e   :  { %v517_v47 = vadd.f32 %v501_v2, %v3847_v63  ;;  %v518_v42 = vadd.f32 %v502_v57, %v3847_v63  ;;  %v525_v53 = vmax.f32 %v509_v61, 0.0  ;;  %v526_v59 = vmax.f32 %v510_v43, 0.0 }
 0x17f   :  { %v529_v60 = vmax.f32 %v513_v49, 0.0  ;;  %v530_v16 = vmax.f32 %v514_v50, 0.0  ;;  %v504_v3 = vmul.f32 %v488_v25, %v3835_v13  ;;  %v519_v34 = vadd.f32 %v503_v29, %v3847_v63 }
 0x180   :  { %v533_v44 = vmax.f32 %v517_v47, 0.0  ;;  %v534_v51 = vmax.f32 %v518_v42, 0.0  ;;  %v540_v62 = vpack.c.bf16 %v526_v59, %v525_v53 }
 0x181   :  { %v542_v23 = vpack.c.bf16 %v530_v16, %v529_v60  ;;  %v520_v33 = vadd.f32 %v504_v3, %v3847_v63  ;;  %v535_v7 = vmax.f32 %v519_v34, 0.0 }
 0x182   :  { %v544_v52 = vpack.c.bf16 %v534_v51, %v533_v44 }
 0x183   :  { %v536_v8 = vmax.f32 %v520_v33, 0.0 }
 0x185   :  { %v545_v0 = vpack.c.bf16 %v536_v8, %v535_v7 }
 0x18a   :  { %3020 = vmatmul.msk.bf16.gmra.mxu0 %vm348_vm0, %v540_v62 }
 0x18b   :  { %3022 = vmatmul.msk.bf16.gmra.mxu1 %vm348_vm0, %v542_v23  ;;  %3024 = vmatmul.msk.bf16.gmra.mxu2 %vm348_vm0, %v544_v52 }
 0x19b   :  { %3025 = vmatmul.msk.bf16.gmra.mxu2 %vm348_vm0, %v545_v0 }
 0x1f7   :  { %v612_v4 = vpop.f32.mrf.mxu0 }
 0x1f8   :  { %v622_v54 = vpop.f32.mrf.mxu1 }
 0x1fe   :  { %v632_v35 = vpop.f32.mrf.mxu2 }
 0x1ff   :  { %v614_v48 = vpop.f32.mrf.mxu0  ;;  %v3913_v20 = vpop.f32.mrf.mxu3 }
 0x200   :  { %v624_v55 = vpop.f32.mrf.mxu1  ;;  %v654_v18 = vadd.f32 %v614_v48, %v612_v4 }
 0x206   :  { %v634_v45 = vpop.f32.mrf.mxu2 }
 0x207   :  { %v617_v9 = vpop.f32.mrf.mxu0  ;;  %v3916_v28 = vpop.f32.mrf.mxu3 }
 0x208   :  { %v627_v10 = vpop.f32.mrf.mxu1  ;;  %v655_v11 = vadd.f32 %v654_v18, %v617_v9 }
 0x20e   :  { %v637_v13 = vpop.f32.mrf.mxu2 }
 0x20f   :  { %v619_v56 = vpop.f32.mrf.mxu0 }
 0x210   :  { %v656_v12 = vadd.f32 %v655_v11, %v619_v56  ;;  %v629_v15 = vpop.f32.mrf.mxu1  ;;  %v3255_v11 = vld [vmem:[#allocation2 + $0x1e0] sm:$0xf0] }
 0x212   :  { %v657_v14 = vadd.f32 %v656_v12, %v622_v54 }
 0x214   :  { %v658_v63 = vadd.f32 %v657_v14, %v624_v55  ;;  %v3351_v14 = vld [vmem:[#allocation2 + $0x1dc] sm:$0xf0] }
 0x216   :  { %v659_v5 = vadd.f32 %v658_v63, %v627_v10  ;;  %v639_v58 = vpop.f32.mrf.mxu2  ;;  %v3261_v63 = vld [vmem:[#allocation2 + $0x1c8] sm:$0xf] }
 0x218   :  { %v660_v17 = vadd.f32 %v659_v5, %v629_v15  ;;  %v3352_v5 = vld [vmem:[#allocation2 + $0x1e4] sm:$0xf0] }
 0x21a   :  { %v661_v19 = vadd.f32 %v660_v17, %v632_v35 }
 0x21c   :  { %v662_v21 = vadd.f32 %v661_v19, %v634_v45  ;;  %v3262_v19 = vor.u32 %v3352_v5, %v3261_v63  ;;  %v3165_v63 = vld [vmem:[#allocation2 + $0x108] sm:$0xf] }
 0x21d   :  { %v3328_v5 = vld [vmem:[#allocation2 + $0x124] sm:$0xf0] }
 0x21e   :  { %v663_v22 = vadd.f32 %v662_v21, %v637_v13  ;;  %v642_v26 = vpop.f32.mrf.mxu2  ;;  %v3348_v21 = vld [vmem:[#allocation2 + $0x1cc] sm:$0xf]  ;;  %1295 = vmatpush.bf16.msrb.mxu3 %v3262_v19 }
 0x21f   :  { %v3324_v19 = vld [vmem:[#allocation2 + $0x10c] sm:$0xf] }
 0x220   :  { %v664_v24 = vadd.f32 %v663_v22, %v639_v58  ;;  %v3263_v22 = vld [vmem:[#allocation2 + $0x1e8] sm:$0xf0] }
 0x222   :  { %v665_v6 = vadd.f32 %v664_v24, %v642_v26 }
 0x226   :  { %v644_v32 = vpop.f32.mrf.mxu2 }
 0x227   :  { %v666_v46 = vadd.f32 %v665_v6, %v644_v32 }
 0x229   :  { %v667_v27 = vadd.f32 %v666_v46, %v3913_v20  ;;  %v3339_v46 = vld [vmem:[#allocation2 + $0x184] sm:$0xf] }
 0x22b   :  { %v668_v41 = vadd.f32 %v667_v27, %v3916_v28  ;;  %v3223_v27 = vld [vmem:[#allocation2 + $0x1a0] sm:$0xf0] }
 0x22d   :  { %v669_v38 = vrot.slane %v668_v41, 4 }
 0x22f   :  { %v670_v30 = vadd.f32 %v669_v38, %v668_v41  ;;  %v3221_v41 = vld [vmem:[#allocation2 + $0x180] sm:$0xf] }
 0x231   :  { %v671_v31 = vrot.slane %v670_v30, 2 }
 0x233   :  { %v672_v37 = vadd.f32 %v671_v31, %v670_v30  ;;  %v3226_v30 = vor.u32 %v3339_v46, %v3223_v27  ;;  %v3343_v31 = vld [vmem:[#allocation2 + $0x19c] sm:$0xf0] }
 0x234   :  { %v3125_v46 = vld [vmem:[#allocation2 + $0xc0] sm:$0xf] }
 0x235   :  { %v673_v2 = vrot.slane %v672_v37, 1 }
 0x237   :  { %v674_v39 = vadd.f32 %v673_v2, %v672_v37  ;;  %v3229_v37 = vld [vmem:[#allocation2 + $0x188] sm:$0xf] }
 0x238   :  { %v3344_v2 = vld [vmem:[#allocation2 + $0x1a4] sm:$0xf0] }
 0x239   :  { %v675_v40 = vmul.f32 %v674_v39, %v3722_v36 }
 0x23b   :  { %v3920_v57 = vsub.f32 %v612_v4, %v675_v40  ;;  %v3922_v47 = vsub.f32 %v614_v48, %v675_v40  ;;  %v3924_v42 = vsub.f32 %v617_v9, %v675_v40  ;;  %v3930_v44 = vsub.f32 %v619_v56, %v675_v40 }
 0x23c   :  { %v3932_v49 = vsub.f32 %v622_v54, %v675_v40  ;;  %v3936_v52 = vsub.f32 %v624_v55, %v675_v40  ;;  %v3940_v60 = vsub.f32 %v627_v10, %v675_v40  ;;  %v3944_v23 = vsub.f32 %v629_v15, %v675_v40  ;;  %v3347_v10 = vld [vmem:[#allocation2 + $0x1c4] sm:$0xf] }
 0x23d   :  { %v692_v61 = vmul.f32 %v3920_v57, %v3920_v57  ;;  %v693_v43 = vmul.f32 %v3922_v47, %v3922_v47  ;;  %v694_v50 = vmul.f32 %v3924_v42, %v3924_v42  ;;  %v695_v53 = vmul.f32 %v3930_v44, %v3930_v44 }
 0x23e   :  { %v696_v16 = vmul.f32 %v3932_v49, %v3932_v49  ;;  %v697_v1 = vmul.f32 %v3936_v52, %v3936_v52  ;;  %v3948_v29 = vsub.f32 %v632_v35, %v675_v40  ;;  %v698_v3 = vmul.f32 %v3940_v60, %v3940_v60 }
 0x23f   :  { %v708_v51 = vadd.f32 %v693_v43, %v692_v61  ;;  %v3952_v33 = vsub.f32 %v634_v45, %v675_v40  ;;  %v699_v7 = vmul.f32 %v3944_v23, %v3944_v23  ;;  %v3956_v0 = vsub.f32 %v637_v13, %v675_v40  ;;  %v3253_v13 = vld [vmem:[#allocation2 + $0x1c0] sm:$0xf] }
 0x240   :  { %v700_v4 = vmul.f32 %v3948_v29, %v3948_v29  ;;  %v3960_v48 = vsub.f32 %v639_v58, %v675_v40  ;;  %v3964_v9 = vsub.f32 %v642_v26, %v675_v40  ;;  %v3968_v56 = vsub.f32 %v644_v32, %v675_v40 }
 0x241   :  { %v709_v59 = vadd.f32 %v708_v51, %v694_v50  ;;  %v701_v35 = vmul.f32 %v3952_v33, %v3952_v33  ;;  %v702_v45 = vmul.f32 %v3956_v0, %v3956_v0  ;;  %v3258_v12 = vor.u32 %v3347_v10, %v3255_v11  ;;  %v3340_v50 = vld [vmem:[#allocation2 + $0x18c] sm:$0xf]  ;;  %v3323_v10 = vld [vmem:[#allocation2 + $0x104] sm:$0xf] }
 0x242   :  { %v703_v58 = vmul.f32 %v3960_v48, %v3960_v48  ;;  %v3254_v17 = vor.u32 %v3351_v14, %v3253_v13  ;;  %v3266_v26 = vor.u32 %v3348_v21, %v3263_v22  ;;  %v3973_v24 = vsub.f32 %v3913_v20, %v675_v40  ;;  %v3231_v51 = vld [vmem:[#allocation2 + $0x1a8] sm:$0xf0]  ;;  %v3159_v11 = vld [vmem:[#allocation2 + $0x120] sm:$0xf0]  ;;  %v3157_v13 = vld [vmem:[#allocation2 + $0x100] sm:$0xf] }
 0x243   :  { %v710_v62 = vadd.f32 %v709_v59, %v695_v53  ;;  %1246 = vmatpush.bf16.msrb.mxu2 %v3258_v12  ;;  %v704_v6 = vmul.f32 %v3964_v9, %v3964_v9  ;;  %v3978_v38 = vsub.f32 %v3916_v28, %v675_v40  ;;  %v705_v20 = vmul.f32 %v3968_v56, %v3968_v56  ;;  %v3331_v40 = vld [vmem:[#allocation2 + $0x144] sm:$0xf]  ;;  %v3327_v14 = vld [vmem:[#allocation2 + $0x11c] sm:$0xf0]  ;;  %v3167_v21 = vld [vmem:[#allocation2 + $0x128] sm:$0xf0] }
 0x244   :  { %1197 = vmatpush.bf16.msrb.mxu1 %v3254_v17  ;;  %1344 = vmatpush.bf16.msrb.mxu0 %v3266_v26  ;;  %v3222_v61 = vor.u32 %v3343_v31, %v3221_v41  ;;  %v3230_v43 = vor.u32 %v3344_v2, %v3229_v37  ;;  %v3234_v53 = vor.u32 %v3340_v50, %v3231_v51  ;;  %v3319_v41 = vld [vmem:[#allocation2 + $0xdc] sm:$0xf0]  ;;  %v3320_v31 = vld [vmem:[#allocation2 + $0xe4] sm:$0xf0]  ;;  %v3307_v51 = vld [vmem:[#allocation2 + $0x84] sm:$0xf] }
 0x245   :  { %v711_v25 = vadd.f32 %v710_v62, %v696_v16  ;;  %v706_v59 = vmul.f32 %v3973_v24, %v3973_v24  ;;  %v3191_v16 = vld [vmem:[#allocation2 + $0x160] sm:$0xf0]  ;;  %v3189_v62 = vld [vmem:[#allocation2 + $0x140] sm:$0xf]  ;;  %v3162_v12 = vor.u32 %v3323_v10, %v3159_v11  ;;  %v3166_v17 = vor.u32 %v3328_v5, %v3165_v63  ;;  %v3069_v10 = vld [vmem:[#allocation2 + $0x48] sm:$0xf] }
 0x246   :  { %1296 = vmatpush.bf16.msrb.mxu3 %v3230_v43  ;;  %v3170_v22 = vor.u32 %v3324_v19, %v3167_v21  ;;  %v3126_v2 = vor.u32 %v3319_v41, %v3125_v46  ;;  %v3304_v11 = vld [vmem:[#allocation2 + $0x64] sm:$0xf0]  ;;  %v3300_v63 = vld [vmem:[#allocation2 + $0x4c] sm:$0xf]  ;;  %v3031_v19 = vld [vmem:[#allocation2 + $0x20] sm:$0xf0] }
 0x247   :  { %v712_v34 = vadd.f32 %v711_v25, %v697_v1  ;;  %1247 = vmatpush.bf16.msrb.mxu2 %v3226_v30  ;;  %v3194_v1 = vor.u32 %v3331_v40, %v3191_v16  ;;  %v3335_v25 = vld [vmem:[#allocation2 + $0x15c] sm:$0xf0]  ;;  %v3133_v30 = vld [vmem:[#allocation2 + $0xc8] sm:$0xf]  ;;  %v3071_v5 = vld [vmem:[#allocation2 + $0x68] sm:$0xf0] }
 0x248   :  { %1198 = vmatpush.bf16.msrb.mxu1 %v3222_v61  ;;  %1345 = vmatpush.bf16.msrb.mxu0 %v3234_v53  ;;  %v3135_v61 = vld [vmem:[#allocation2 + $0xe8] sm:$0xf0]  ;;  %v3095_v53 = vld [vmem:[#allocation2 + $0xa0] sm:$0xf0]  ;;  %v3311_v40 = vld [vmem:[#allocation2 + $0x9c] sm:$0xf0] }
 0x249   :  { %v713_v8 = vadd.f32 %v712_v34, %v698_v3  ;;  %v3197_v3 = vld [vmem:[#allocation2 + $0x148] sm:$0xf]  ;;  %v3039_v41 = vld [vmem:[#allocation2 + $0x28] sm:$0xf0] }
 0x24a   :  { %v3336_v34 = vld [vmem:[#allocation2 + $0x164] sm:$0xf0] }
 0x24b   :  { %v714_v54 = vadd.f32 %v713_v8, %v699_v7  ;;  %v707_v7 = vmul.f32 %v3978_v38, %v3978_v38  ;;  %1248 = vmatpush.bf16.msrb.mxu2 %v3194_v1  ;;  %v3101_v16 = vld [vmem:[#allocation2 + $0x88] sm:$0xf] }
 0x24c   :  { %v3296_v46 = vld [vmem:[#allocation2 + $0x24] sm:$0xf0] }
 0x24d   :  { %v715_v55 = vadd.f32 %v714_v54, %v700_v4  ;;  %v3190_v4 = vor.u32 %v3335_v25, %v3189_v62  ;;  %v3198_v54 = vor.u32 %v3336_v34, %v3197_v3  ;;  %v3312_v62 = vld [vmem:[#allocation2 + $0xa4] sm:$0xf0]  ;;  %v3308_v34 = vld [vmem:[#allocation2 + $0x8c] sm:$0xf] }
 0x24e   :  { %v3102_v3 = vor.u32 %v3312_v62, %v3101_v16  ;;  %v3353_v16 = vld [vmem:[#allocation2 + $0x1ec] sm:$0xf0] }
 0x24f   :  { %v716_v18 = vadd.f32 %v715_v55, %v701_v35  ;;  %v3332_v35 = vld [vmem:[#allocation2 + $0x14c] sm:$0xf]  ;;  %1199 = vmatpush.bf16.msrb.mxu1 %v3190_v4  ;;  %1297 = vmatpush.bf16.msrb.mxu3 %v3198_v54  ;;  %v3299_v54 = vld [vmem:[#allocation2 + $0x44] sm:$0xf] }
 0x250   :  { %v3199_v55 = vld [vmem:[#allocation2 + $0x168] sm:$0xf0]  ;;  %1249 = vmatpush.bf16.msrb.mxu2 %v3162_v12 }
 0x251   :  { %v717_v15 = vadd.f32 %v716_v18, %v702_v45  ;;  %v3202_v45 = vor.u32 %v3332_v35, %v3199_v55  ;;  %v3063_v35 = vld [vmem:[#allocation2 + $0x60] sm:$0xf0]  ;;  %v3061_v55 = vld [vmem:[#allocation2 + $0x40] sm:$0xf] }
 0x253   :  { %v718_v32 = vadd.f32 %v717_v15, %v703_v58  ;;  %1346 = vmatpush.bf16.msrb.mxu0 %v3202_v45  ;;  %v3158_v15 = vor.u32 %v3327_v14, %v3157_v13  ;;  %1298 = vmatpush.bf16.msrb.mxu3 %v3166_v17  ;;  %v3066_v45 = vor.u32 %v3299_v54, %v3063_v35  ;;  %v3291_v17 = vld [vmem:[#allocation2 + $0x4] sm:$0xf] }
 0x254   :  { %v3070_v14 = vor.u32 %v3304_v11, %v3069_v10  ;;  %v3034_v21 = vor.u32 %v3291_v17, %v3031_v19 }
 0x255   :  { %v719_v39 = vadd.f32 %v718_v32, %v704_v6  ;;  %v3315_v6 = vld [vmem:[#allocation2 + $0xc4] sm:$0xf]  ;;  %1200 = vmatpush.bf16.msrb.mxu1 %v3158_v15 }
 0x256   :  { %v3127_v32 = vld [vmem:[#allocation2 + $0xe0] sm:$0xf0] }
 0x257   :  { %v720_v28 = vadd.f32 %v719_v39, %v705_v20  ;;  %v3130_v27 = vor.u32 %v3315_v6, %v3127_v32  ;;  %1347 = vmatpush.bf16.msrb.mxu0 %v3170_v22  ;;  %v3134_v20 = vor.u32 %v3320_v31, %v3133_v30  ;;  %v3316_v39 = vld [vmem:[#allocation2 + $0xcc] sm:$0xf]  ;;  %v3029_v22 = vld [vmem:[#allocation2] sm:$0xf]  ;;  %v3037_v6 = vld [vmem:[#allocation2 + $0x8] sm:$0xf] }
 0x258   :  { %v3138_v43 = vor.u32 %v3316_v39, %v3135_v61  ;;  %v3038_v30 = vor.u32 %v3296_v46, %v3037_v6  ;;  %v3271_v39 = vld [vmem:[#allocation2 + $0x1f0] sm:$0xf0] }
 0x259   :  { %v721_v8 = vadd.f32 %v720_v28, %v706_v59  ;;  %1250 = vmatpush.bf16.msrb.mxu2 %v3130_v27  ;;  %1201 = vmatpush.bf16.msrb.mxu1 %v3126_v2  ;;  %v3093_v59 = vld [vmem:[#allocation2 + $0x80] sm:$0xf]  ;;  %v3098_v28 = vor.u32 %v3307_v51, %v3095_v53  ;;  %v3292_v27 = vld [vmem:[#allocation2 + $0xc] sm:$0xf]  ;;  %v3354_v51 = vld [vmem:[#allocation2 + $0x1f4] sm:$0xf0] }
 0x25a   :  { %1299 = vmatpush.bf16.msrb.mxu3 %v3134_v20  ;;  %v3094_v25 = vor.u32 %v3311_v40, %v3093_v59  ;;  %v3042_v31 = vor.u32 %v3292_v27, %v3039_v41  ;;  %v3349_v20 = vld [vmem:[#allocation2 + $0x1d4] sm:$0xf]  ;;  %v3350_v53 = vld [vmem:[#allocation2 + $0x1dc] sm:$0xf]  ;;  %v3269_v40 = vld [vmem:[#allocation2 + $0x1d0] sm:$0xf] }
 0x25b   :  { %v722_v18 = vadd.f32 %v721_v8, %v707_v7  ;;  %1348 = vmatpush.bf16.msrb.mxu0 %v3138_v43  ;;  %v3103_v7 = vld [vmem:[#allocation2 + $0xa8] sm:$0xf0]  ;;  %v3274_v43 = vor.u32 %v3349_v20, %v3271_v39  ;;  %v3239_v6 = vld [vmem:[#allocation2 + $0x1b0] sm:$0xf0] }
 0x25c   :  { %v3106_v8 = vor.u32 %v3308_v34, %v3103_v7 }
 0x25d   :  { %v723_v58 = vrot.slane %v722_v18, 4  ;;  %1251 = vmatpush.bf16.msrb.mxu2 %v3098_v28  ;;  %1202 = vmatpush.bf16.msrb.mxu1 %v3094_v25  ;;  %v3279_v28 = vld [vmem:[#allocation2 + $0x1f8] sm:$0xf0]  ;;  %v3270_v25 = vor.u32 %v3353_v16, %v3269_v40 }
 0x25e   :  { %1300 = vmatpush.bf16.msrb.mxu3 %v3102_v3 }
 0x25f   :  { %v724_v26 = vadd.f32 %v723_v58, %v722_v18  ;;  %1349 = vmatpush.bf16.msrb.mxu0 %v3106_v8  ;;  %v3303_v18 = vld [vmem:[#allocation2 + $0x5c] sm:$0xf0]  ;;  %v3074_v58 = vor.u32 %v3300_v63, %v3071_v5 }
 0x260   :  { %v3062_v12 = vor.u32 %v3303_v18, %v3061_v55  ;;  %v3992_v8 = vld [vmem:[%s6212_s4 + $0x2] ss:$0 sm:$0xff] }
 0x261   :  { %v725_v37 = vrot.slane %v724_v26, 2  ;;  %1252 = vmatpush.bf16.msrb.mxu2 %v3066_v45 }
 0x262   :  { %1203 = vmatpush.bf16.msrb.mxu1 %v3062_v12  ;;  %1301 = vmatpush.bf16.msrb.mxu3 %v3070_v14 }
 0x263   :  { %v726_v50 = vadd.f32 %v725_v37, %v724_v26  ;;  %1350 = vmatpush.bf16.msrb.mxu0 %v3074_v58  ;;  %v3295_v26 = vld [vmem:[#allocation2 + $0x1c] sm:$0xf0] }
 0x264   :  { %v3030_v32 = vor.u32 %v3295_v26, %v3029_v22  ;;  %v3341_v22 = vld [vmem:[#allocation2 + $0x194] sm:$0xf] }
 0x265   :  { %v727_v1 = vrot.slane %v726_v50, 1  ;;  %1253 = vmatpush.bf16.msrb.mxu2 %v3034_v21 }
 0x266   :  { %1204 = vmatpush.bf16.msrb.mxu1 %v3030_v32  ;;  %1302 = vmatpush.bf16.msrb.mxu3 %v3038_v30  ;;  %v3245_v32 = vld [vmem:[#allocation2 + $0x198] sm:$0xf] }
 0x267   :  { %v728_v4 = vadd.f32 %v727_v1, %v726_v50  ;;  %1351 = vmatpush.bf16.msrb.mxu0 %v3042_v31  ;;  %v3277_v50 = vld [vmem:[#allocation2 + $0x1d8] sm:$0xf]  ;;  %v3282_v1 = vor.u32 %v3350_v53, %v3279_v28  ;;  %v3345_v28 = vld [vmem:[#allocation2 + $0x1ac] sm:$0xf0] }
 0x268   :  { %v3278_v59 = vor.u32 %v3354_v51, %v3277_v50  ;;  %v3346_v31 = vld [vmem:[#allocation2 + $0x1b4] sm:$0xf0] }
 0x269   :  { %v729_v13 = vmul.f32 %v728_v4, %v3722_v36  ;;  %1442 = vmatpush.bf16.msra.mxu2 %v3274_v43  ;;  %v3247_v43 = vld [vmem:[#allocation2 + $0x1b8] sm:$0xf0] }
 0x26a   :  { %1491 = vmatpush.bf16.msra.mxu3 %v3278_v59  ;;  %1393 = vmatpush.bf16.msra.mxu1 %v3270_v25  ;;  %v3237_v59 = vld [vmem:[#allocation2 + $0x190] sm:$0xf]  ;;  %v3246_v25 = vor.u32 %v3346_v31, %v3245_v32  ;;  %v3183_v32 = vld [vmem:[#allocation2 + $0x138] sm:$0xf0] }
 0x26b   :  { %v730_v15 = vadd.f32 1e-05, %v729_v13  ;;  %1540 = vmatpush.bf16.msra.mxu0 %v3282_v1 }
 0x26d   :  { %3405 = vrsqrt.f32 %v730_v15  ;;  %vm737_vm6 = vweird.f32 %v730_v15 }
 0x26e   :  { %1492 = vmatpush.bf16.msra.mxu3 %v3246_v25 }
 0x273   :  { %v3406_v37 = vpop.eup %3405 }
 0x274   :  { %v732_v2 = vmul.f32 %v3406_v37, %v730_v15  ;;  %vm738_vm5 = vweird.f32 %v3406_v37 }
 0x275   :  { %vm739_vm7 = vmor %vm737_vm6, %vm738_vm5 }
 0x276   :  { %v733_v61 = vmul.f32 %v3406_v37, %v732_v2 }
 0x278   :  { %v734_v62 = vmul.f32 0.5, %v733_v61  ;;  %v3342_v61 = vld [vmem:[#allocation2 + $0x19c] sm:$0xf] }
 0x27a   :  { %v735_v3 = vsub.f32 1.5, %v734_v62  ;;  %v3242_v62 = vor.u32 %v3341_v22, %v3239_v6  ;;  %v3181_v22 = vld [vmem:[#allocation2 + $0x118] sm:$0xf] }
 0x27b   :  { %v3330_v6 = vld [vmem:[#allocation2 + $0x134] sm:$0xf0] }
 0x27c   :  { %v736_v34 = vmul.f32 %v3406_v37, %v735_v3  ;;  %v3250_v3 = vor.u32 %v3342_v61, %v3247_v43  ;;  %1443 = vmatpush.bf16.msra.mxu2 %v3242_v62  ;;  %v3149_v62 = vld [vmem:[#allocation2 + $0xd8] sm:$0xf] }
 0x27e   :  { %v3987_v7 = vsel %vm739_vm7, %v3406_v37, %v736_v34  ;;  %1541 = vmatpush.bf16.msra.mxu0 %v3250_v3  ;;  %v3322_v3 = vld [vmem:[#allocation2 + $0xf4] sm:$0xf0] }
 0x27f   :  { %v749_v4 = vmul.f32 %v3987_v7, %v3948_v29  ;;  %v750_v54 = vmul.f32 %v3987_v7, %v3952_v33  ;;  %v751_v35 = vmul.f32 %v3987_v7, %v3956_v0  ;;  %v752_v55 = vmul.f32 %v3987_v7, %v3960_v48  ;;  %v4013_v33 = vld [vmem:[%s6212_s4 + $0x3] ss:$0 sm:$0xff] }
 0x280   :  { %v753_v45 = vmul.f32 %v3987_v7, %v3964_v9  ;;  %v754_v18 = vmul.f32 %v3987_v7, %v3968_v56  ;;  %v755_v10 = vmul.f32 %v3987_v7, %v3973_v24  ;;  %v756_v29 = vmul.f32 %v3987_v7, %v3978_v38 }
 0x281   :  { %v765_v0 = vmul.f32 %v749_v4, %v3992_v8  ;;  %v766_v48 = vmul.f32 %v750_v54, %v3992_v8  ;;  %v767_v9 = vmul.f32 %v751_v35, %v3992_v8  ;;  %v768_v11 = vmul.f32 %v752_v55, %v3992_v8 }
 0x282   :  { %v769_v56 = vmul.f32 %v753_v45, %v3992_v8  ;;  %v770_v24 = vmul.f32 %v754_v18, %v3992_v8  ;;  %v771_v13 = vmul.f32 %v755_v10, %v3992_v8  ;;  %v741_v38 = vmul.f32 %v3987_v7, %v3920_v57  ;;  %v3333_v18 = vld [vmem:[#allocation2 + $0x154] sm:$0xf] }
 0x283   :  { %v742_v12 = vmul.f32 %v3987_v7, %v3922_v47  ;;  %v772_v14 = vmul.f32 %v756_v29, %v3992_v8  ;;  %v781_v63 = vadd.f32 %v765_v0, %v4013_v33  ;;  %v782_v5 = vadd.f32 %v766_v48, %v4013_v33  ;;  %v3207_v10 = vld [vmem:[#allocation2 + $0x170] sm:$0xf0]  ;;  %v3213_v29 = vld [vmem:[#allocation2 + $0x158] sm:$0xf] }
 0x284   :  { %v783_v58 = vadd.f32 %v767_v9, %v4013_v33  ;;  %v784_v15 = vadd.f32 %v768_v11, %v4013_v33  ;;  %v785_v17 = vadd.f32 %v769_v56, %v4013_v33  ;;  %v786_v19 = vadd.f32 %v770_v24, %v4013_v33  ;;  %v3338_v9 = vld [vmem:[#allocation2 + $0x174] sm:$0xf0]  ;;  %v3215_v11 = vld [vmem:[#allocation2 + $0x178] sm:$0xf0] }
 0x285   :  { %v787_v21 = vadd.f32 %v771_v13, %v4013_v33  ;;  %v788_v57 = vadd.f32 %v772_v14, %v4013_v33  ;;  %v797_v47 = vmax.f32 %v781_v63, 0.0  ;;  %v798_v26 = vmax.f32 %v782_v5, 0.0  ;;  %v3205_v13 = vld [vmem:[#allocation2 + $0x150] sm:$0xf] }
 0x286   :  { %v799_v46 = vmax.f32 %v783_v58, 0.0  ;;  %v800_v27 = vmax.f32 %v784_v15, 0.0  ;;  %v801_v41 = vmax.f32 %v785_v17, 0.0  ;;  %v802_v30 = vmax.f32 %v786_v19, 0.0 }
 0x287   :  { %v803_v37 = vmax.f32 %v787_v21, 0.0  ;;  %v804_v2 = vmax.f32 %v788_v57, 0.0  ;;  %v4035_v20 = vpack.c.bf16 %v798_v26, %v797_v47  ;;  %v757_v39 = vmul.f32 %v741_v38, %v3992_v8  ;;  %v3337_v38 = vld [vmem:[#allocation2 + $0x16c] sm:$0xf0]  ;;  %v3325_v21 = vld [vmem:[#allocation2 + $0x114] sm:$0xf] }
 0x288   :  { %v4038_v50 = vpack.c.bf16 %v800_v27, %v799_v46  ;;  %v4040_v51 = vpack.c.bf16 %v802_v30, %v801_v41  ;;  %v758_v53 = vmul.f32 %v742_v12, %v3992_v8  ;;  %v3238_v4 = vor.u32 %v3345_v28, %v3237_v59  ;;  %v3175_v57 = vld [vmem:[#allocation2 + $0x130] sm:$0xf0]  ;;  %v3173_v41 = vld [vmem:[#allocation2 + $0x110] sm:$0xf] }
 0x289   :  { %v4043_v40 = vpack.c.bf16 %v804_v2, %v803_v37  ;;  %v773_v16 = vadd.f32 %v757_v39, %v4013_v33  ;;  %v743_v35 = vmul.f32 %v3987_v7, %v3924_v42  ;;  %v744_v55 = vmul.f32 %v3987_v7, %v3930_v44  ;;  %v3334_v44 = vld [vmem:[#allocation2 + $0x15c] sm:$0xf]  ;;  %v3329_v30 = vld [vmem:[#allocation2 + $0x12c] sm:$0xf0]  ;;  %v3317_v28 = vld [vmem:[#allocation2 + $0xd4] sm:$0xf] }
 0x28a   :  { %v774_v1 = vadd.f32 %v758_v53, %v4013_v33  ;;  %1394 = vmatpush.bf16.msra.mxu1 %v3238_v4  ;;  %v3210_v48 = vor.u32 %v3333_v18, %v3207_v10  ;;  %v3214_v56 = vor.u32 %v3338_v9, %v3213_v29  ;;  %v3218_v24 = vor.u32 %v3334_v44, %v3215_v11  ;;  %v3117_v9 = vld [vmem:[#allocation2 + $0x98] sm:$0xf] }
 0x28b   :  { %v789_v34 = vmax.f32 %v773_v16, 0.0  ;;  %v760_v0 = vmul.f32 %v744_v55, %v3992_v8  ;;  %v759_v42 = vmul.f32 %v743_v35, %v3992_v8  ;;  %v3206_v12 = vor.u32 %v3337_v38, %v3205_v13  ;;  %v3143_v16 = vld [vmem:[#allocation2 + $0xf0] sm:$0xf0]  ;;  %v3321_v35 = vld [vmem:[#allocation2 + $0xec] sm:$0xf0] }
 0x28c   :  { %v790_v54 = vmax.f32 %v774_v1, 0.0  ;;  %1444 = vmatpush.bf16.msra.mxu2 %v3210_v48  ;;  %1493 = vmatpush.bf16.msra.mxu3 %v3214_v56  ;;  %v745_v15 = vmul.f32 %v3987_v7, %v3932_v49  ;;  %v746_v17 = vmul.f32 %v3987_v7, %v3936_v52  ;;  %v3178_v26 = vor.u32 %v3325_v21, %v3175_v57  ;;  %v3326_v52 = vld [vmem:[#allocation2 + $0x11c] sm:$0xf]  ;;  %v3111_v48 = vld [vmem:[#allocation2 + $0xb0] sm:$0xf0] }
 0x28d   :  { %1542 = vmatpush.bf16.msra.mxu0 %v3218_v24  ;;  %v775_v14 = vadd.f32 %v759_v42, %v4013_v33  ;;  %v776_v63 = vadd.f32 %v760_v0, %v4013_v33  ;;  %v3182_v46 = vor.u32 %v3330_v6, %v3181_v22  ;;  %v3186_v27 = vor.u32 %v3326_v52, %v3183_v32  ;;  %v3309_v42 = vld [vmem:[#allocation2 + $0x94] sm:$0xf]  ;;  %v3314_v11 = vld [vmem:[#allocation2 + $0xb4] sm:$0xf0]  ;;  %v3310_v56 = vld [vmem:[#allocation2 + $0x9c] sm:$0xf] }
 0x28e   :  { %v4051_v45 = vpack.c.bf16 %v790_v54, %v789_v34  ;;  %1395 = vmatpush.bf16.msra.mxu1 %v3206_v12  ;;  %v761_v47 = vmul.f32 %v745_v15, %v3992_v8  ;;  %v762_v49 = vmul.f32 %v746_v17, %v3992_v8  ;;  %v3174_v31 = vor.u32 %v3329_v30, %v3173_v41  ;;  %v3141_v54 = vld [vmem:[#allocation2 + $0xd0] sm:$0xf]  ;;  %v3306_v17 = vld [vmem:[#allocation2 + $0x74] sm:$0xf0]  ;;  %v3302_v21 = vld [vmem:[#allocation2 + $0x5c] sm:$0xf] }
 0x28f   :  { %v791_v5 = vmax.f32 %v775_v14, 0.0  ;;  %v792_v58 = vmax.f32 %v776_v63, 0.0  ;;  %v747_v43 = vmul.f32 %v3987_v7, %v3940_v60  ;;  %v748_v53 = vmul.f32 %v3987_v7, %v3944_v23  ;;  %v3318_v23 = vld [vmem:[#allocation2 + $0xdc] sm:$0xf]  ;;  %v3109_v38 = vld [vmem:[#allocation2 + $0x90] sm:$0xf] }
 0x290   :  { %1205 = vmatmul.bf16.vlgmr.msrb.gmra.mxu1 %v4051_v45  ;;  %1254 = vmatmul.bf16.vlgmr.msrb.gmra.mxu2 %v4051_v45  ;;  %v778_v37 = vadd.f32 %v762_v49, %v4013_v33  ;;  %v777_v2 = vadd.f32 %v761_v47, %v4013_v33  ;;  %v3146_v25 = vor.u32 %v3317_v28, %v3143_v16  ;;  %v3151_v7 = vld [vmem:[#allocation2 + $0xf8] sm:$0xf0]  ;;  %v3313_v12 = vld [vmem:[#allocation2 + $0xac] sm:$0xf0]  ;;  %v3301_v63 = vld [vmem:[#allocation2 + $0x54] sm:$0xf] }
 0x291   :  { %1303 = vmatmul.bf16.vlgmr.msrb.gmra.mxu3 %v4051_v45  ;;  %1352 = vmatmul.bf16.vlgmr.msrb.gmra.mxu0 %v4051_v45  ;;  %v4065_v19 = vpack.c.bf16 %v792_v58, %v791_v5  ;;  %v763_v1 = vmul.f32 %v747_v43, %v3992_v8  ;;  %v764_v60 = vmul.f32 %v748_v53, %v3992_v8  ;;  %v3079_v5 = vld [vmem:[#allocation2 + $0x70] sm:$0xf0]  ;;  %v3085_v58 = vld [vmem:[#allocation2 + $0x58] sm:$0xf]  ;;  %v3087_v57 = vld [vmem:[#allocation2 + $0x78] sm:$0xf0] }
 0x292   :  { %1445 = vmatpush.bf16.msra.mxu2 %v3178_v26  ;;  %1494 = vmatpush.bf16.msra.mxu3 %v3182_v46  ;;  %v793_v39 = vmax.f32 %v777_v2, 0.0  ;;  %v794_v61 = vmax.f32 %v778_v37, 0.0  ;;  %v3150_v34 = vor.u32 %v3322_v3, %v3149_v62  ;;  %v3154_v4 = vor.u32 %v3318_v23, %v3151_v7  ;;  %v3077_v49 = vld [vmem:[#allocation2 + $0x50] sm:$0xf]  ;;  %v3293_v52 = vld [vmem:[#allocation2 + $0x14] sm:$0xf] }
 0x293   :  { %1543 = vmatpush.bf16.msra.mxu0 %v3186_v27  ;;  %1396 = vmatpush.bf16.msra.mxu1 %v3174_v31  ;;  %v3142_v55 = vor.u32 %v3321_v35, %v3141_v54  ;;  %v779_v18 = vadd.f32 %v763_v1, %v4013_v33  ;;  %v780_v10 = vadd.f32 %v764_v60, %v4013_v33  ;;  %v3119_v33 = vld [vmem:[#allocation2 + $0xb8] sm:$0xf0]  ;;  %v3305_v26 = vld [vmem:[#allocation2 + $0x6c] sm:$0xf0]  ;;  %v3047_v32 = vld [vmem:[#allocation2 + $0x30] sm:$0xf0] }
 0x294   :  { %v4079_v59 = vpack.c.bf16 %v794_v61, %v793_v39  ;;  %v3114_v44 = vor.u32 %v3309_v42, %v3111_v48  ;;  %v3118_v24 = vor.u32 %v3314_v11, %v3117_v9  ;;  %v3122_v13 = vor.u32 %v3310_v56, %v3119_v33  ;;  %v3053_v46 = vld [vmem:[#allocation2 + $0x18] sm:$0xf]  ;;  %v3294_v30 = vld [vmem:[#allocation2 + $0x1c] sm:$0xf]  ;;  %v3045_v39 = vld [vmem:[#allocation2 + $0x10] sm:$0xf] }
 0x295   :  { %v795_v29 = vmax.f32 %v779_v18, 0.0  ;;  %v796_v0 = vmax.f32 %v780_v10, 0.0  ;;  %v3110_v14 = vor.u32 %v3313_v12, %v3109_v38  ;;  %v3082_v15 = vor.u32 %v3301_v63, %v3079_v5  ;;  %v3298_v41 = vld [vmem:[#allocation2 + $0x34] sm:$0xf0]  ;;  %v3055_v31 = vld [vmem:[#allocation2 + $0x38] sm:$0xf0] }
 0x296   :  { %1446 = vmatpush.bf16.msra.mxu2 %v3146_v25  ;;  %1495 = vmatpush.bf16.msra.mxu3 %v3150_v34  ;;  %v3086_v22 = vor.u32 %v3306_v17, %v3085_v58  ;;  %v3090_v47 = vor.u32 %v3302_v21, %v3087_v57  ;;  %v3078_v6 = vor.u32 %v3305_v26, %v3077_v49  ;;  %v3297_v61 = vld [vmem:[#allocation2 + $0x2c] sm:$0xf0] }
 0x297   :  { %1544 = vmatpush.bf16.msra.mxu0 %v3154_v4  ;;  %1397 = vmatpush.bf16.msra.mxu1 %v3142_v55  ;;  %v4089_v8 = vpack.c.bf16 %v796_v0, %v795_v29  ;;  %v3050_v27 = vor.u32 %v3293_v52, %v3047_v32  ;;  %v3054_v37 = vor.u32 %v3298_v41, %v3053_v46 }
 0x298   :  { %v3058_v2 = vor.u32 %v3294_v30, %v3055_v31  ;;  %v3046_v43 = vor.u32 %v3297_v61, %v3045_v39 }
 0x29a   :  { %1447 = vmatpush.bf16.msra.mxu2 %v3114_v44  ;;  %1496 = vmatpush.bf16.msra.mxu3 %v3118_v24 }
 0x29b   :  { %1545 = vmatpush.bf16.msra.mxu0 %v3122_v13  ;;  %1398 = vmatpush.bf16.msra.mxu1 %v3110_v14 }
 0x29e   :  { %1448 = vmatpush.bf16.msra.mxu2 %v3082_v15  ;;  %1497 = vmatpush.bf16.msra.mxu3 %v3086_v22 }
 0x29f   :  { %1546 = vmatpush.bf16.msra.mxu0 %v3090_v47  ;;  %1399 = vmatpush.bf16.msra.mxu1 %v3078_v6 }
 0x2a0   :  { %1210 = vmatmul.bf16.gmra.mxu1 %v4065_v19  ;;  %1259 = vmatmul.bf16.gmra.mxu2 %v4065_v19 }
 0x2a1   :  { %1308 = vmatmul.bf16.gmra.mxu3 %v4065_v19  ;;  %1357 = vmatmul.bf16.gmra.mxu0 %v4065_v19 }
 0x2a2   :  { %1449 = vmatpush.bf16.msra.mxu2 %v3050_v27  ;;  %1498 = vmatpush.bf16.msra.mxu3 %v3054_v37 }
 0x2a3   :  { %1547 = vmatpush.bf16.msra.mxu0 %v3058_v2  ;;  %1400 = vmatpush.bf16.msra.mxu1 %v3046_v43 }
 0x2b0   :  { %1215 = vmatmul.bf16.gmra.mxu1 %v4079_v59  ;;  %1264 = vmatmul.bf16.gmra.mxu2 %v4079_v59 }
 0x2b1   :  { %1313 = vmatmul.bf16.gmra.mxu3 %v4079_v59  ;;  %1362 = vmatmul.bf16.gmra.mxu0 %v4079_v59 }
 0x2c0   :  { %1220 = vmatmul.bf16.gmra.mxu1 %v4089_v8  ;;  %1269 = vmatmul.bf16.gmra.mxu2 %v4089_v8 }
 0x2c1   :  { %1318 = vmatmul.bf16.gmra.mxu3 %v4089_v8  ;;  %1367 = vmatmul.bf16.gmra.mxu0 %v4089_v8 }
 0x2d0   :  { %1225 = vmatmul.bf16.gmra.mxu1 %v4035_v20  ;;  %1274 = vmatmul.bf16.gmra.mxu2 %v4035_v20 }
 0x2d1   :  { %1323 = vmatmul.bf16.gmra.mxu3 %v4035_v20  ;;  %1372 = vmatmul.bf16.gmra.mxu0 %v4035_v20 }
 0x2e0   :  { %1230 = vmatmul.bf16.gmra.mxu1 %v4038_v50  ;;  %1279 = vmatmul.bf16.gmra.mxu2 %v4038_v50 }
 0x2e1   :  { %1328 = vmatmul.bf16.gmra.mxu3 %v4038_v50  ;;  %1377 = vmatmul.bf16.gmra.mxu0 %v4038_v50 }
 0x2f0   :  { %1235 = vmatmul.bf16.gmra.mxu1 %v4040_v51  ;;  %1284 = vmatmul.bf16.gmra.mxu2 %v4040_v51 }
 0x2f1   :  { %1333 = vmatmul.bf16.gmra.mxu3 %v4040_v51  ;;  %1382 = vmatmul.bf16.gmra.mxu0 %v4040_v51 }
 0x300   :  { %1240 = vmatmul.bf16.gmra.mxu1 %v4043_v40  ;;  %1289 = vmatmul.bf16.gmra.mxu2 %v4043_v40 }
 0x301   :  { %1338 = vmatmul.bf16.gmra.mxu3 %v4043_v40  ;;  %1387 = vmatmul.bf16.gmra.mxu0 %v4043_v40 }
 0x30d   :  { %v4111_v53 = vpop.f32.mrf.mxu1 }
 0x30e   :  { %v4113_v28 = vpop.f32.mrf.mxu0 }
 0x310   :  { %1401 = vmatmul.bf16.vlgmr.msra.gmra.mxu1 %v4051_v45  ;;  %1450 = vmatmul.bf16.vlgmr.msra.gmra.mxu2 %v4051_v45 }
 0x311   :  { %1499 = vmatmul.bf16.vlgmr.msra.gmra.mxu3 %v4051_v45  ;;  %1548 = vmatmul.bf16.vlgmr.msra.gmra.mxu0 %v4051_v45 }
 0x313   :  { %v4119_v16 = vpop.f32.mrf.mxu2 }
 0x314   :  { %v4121_v62 = vpop.f32.mrf.mxu3 }
 0x315   :  { %v4123_v1 = vpop.f32.mrf.mxu1 }
 0x316   :  { %v4125_v60 = vpop.f32.mrf.mxu0 }
 0x317   :  { %v1660_v21 = vadd.f32 %v4125_v60, %v4113_v28 }
 0x31b   :  { %v4127_v25 = vpop.f32.mrf.mxu2 }
 0x31c   :  { %v4129_v3 = vpop.f32.mrf.mxu3  ;;  %v1618_v39 = vadd.f32 %v4127_v25, %v4119_v16 }
 0x31d   :  { %v4131_v23 = vpop.f32.mrf.mxu1 }
 0x31e   :  { %v4133_v7 = vpop.f32.mrf.mxu0 }
 0x31f   :  { %v1661_v22 = vadd.f32 %v1660_v21, %v4133_v7 }
 0x320   :  { %1406 = vmatmul.bf16.gmra.mxu1 %v4065_v19  ;;  %1455 = vmatmul.bf16.gmra.mxu2 %v4065_v19 }
 0x321   :  { %1504 = vmatmul.bf16.gmra.mxu3 %v4065_v19  ;;  %1553 = vmatmul.bf16.gmra.mxu0 %v4065_v19 }
 0x323   :  { %v4139_v45 = vpop.f32.mrf.mxu2 }
 0x324   :  { %6362 = vst [vmem:[#allocation8_spill] sm:$0xff] %v4139_v45  ;;  %v4145_v54 = vpop.f32.mrf.mxu3 }
 0x325   :  { %v4141_v34 = vpop.f32.mrf.mxu1 }
 0x326   :  { %v4143_v4 = vpop.f32.mrf.mxu0 }
 0x327   :  { %v1662_v26 = vadd.f32 %v1661_v22, %v4143_v4 }
 0x32b   :  { %v4147_v35 = vpop.f32.mrf.mxu2 }
 0x32c   :  { %6363 = vst [vmem:[#allocation9_spill] sm:$0xff] %v4147_v35  ;;  %v4155_v10 = vpop.f32.mrf.mxu3 }
 0x32d   :  { %v4149_v55 = vpop.f32.mrf.mxu1 }
 0x32e   :  { %v4151_v18 = vpop.f32.mrf.mxu0 }
 0x32f   :  { %v1663_v46 = vadd.f32 %v1662_v26, %v4151_v18 }
 0x330   :  { %1411 = vmatmul.bf16.gmra.mxu1 %v4079_v59  ;;  %1460 = vmatmul.bf16.gmra.mxu2 %v4079_v59 }
 0x331   :  { %1509 = vmatmul.bf16.gmra.mxu3 %v4079_v59  ;;  %1558 = vmatmul.bf16.gmra.mxu0 %v4079_v59 }
 0x333   :  { %v4159_v19 = vpop.f32.mrf.mxu2 }
 0x334   :  { %6364 = vst [vmem:[#allocation10_spill] sm:$0xff] %v4159_v19  ;;  %v4165_v42 = vpop.f32.mrf.mxu3 }
 0x335   :  { %v4161_v29 = vpop.f32.mrf.mxu1 }
 0x336   :  { %v4163_v0 = vpop.f32.mrf.mxu0 }
 0x337   :  { %v1664_v41 = vadd.f32 %v1663_v46, %v4163_v0 }
 0x33b   :  { %v4167_v48 = vpop.f32.mrf.mxu2 }
 0x33c   :  { %6365 = vst [vmem:[#allocation11_spill] sm:$0xff] %v4167_v48  ;;  %v4179_v11 = vpop.f32.mrf.mxu3 }
 0x33d   :  { %v4169_v9 = vpop.f32.mrf.mxu1 }
 0x33e   :  { %v4171_v44 = vpop.f32.mrf.mxu0 }
 0x33f   :  { %v1665_v31 = vadd.f32 %v1664_v41, %v4171_v44 }
 0x340   :  { %1416 = vmatmul.bf16.gmra.mxu1 %v4089_v8  ;;  %1465 = vmatmul.bf16.gmra.mxu2 %v4089_v8 }
 0x341   :  { %1514 = vmatmul.bf16.gmra.mxu3 %v4089_v8  ;;  %1563 = vmatmul.bf16.gmra.mxu0 %v4089_v8  ;;  %v1597_v8 = vadd.f32 %v4123_v1, %v4111_v53 }
 0x343   :  { %v4177_v59 = vpop.f32.mrf.mxu2  ;;  %v1598_v63 = vadd.f32 %v1597_v8, %v4131_v23 }
 0x344   :  { %6366 = vst [vmem:[#allocation12_spill] sm:$0xff] %v4177_v59  ;;  %v4191_v12 = vpop.f32.mrf.mxu3 }
 0x345   :  { %v4181_v56 = vpop.f32.mrf.mxu1  ;;  %v1599_v58 = vadd.f32 %v1598_v63, %v4141_v34  ;;  %v1619_v63 = vadd.f32 %v1618_v39, %v4139_v45 }
 0x346   :  { %v4183_v33 = vpop.f32.mrf.mxu0 }
 0x347   :  { %v1600_v17 = vadd.f32 %v1599_v58, %v4149_v55  ;;  %v1666_v43 = vadd.f32 %v1665_v31, %v4183_v33  ;;  %v1620_v21 = vadd.f32 %v1619_v63, %v4147_v35 }
 0x349   :  { %v1621_v22 = vadd.f32 %v1620_v21, %v4159_v19 }
 0x34b   :  { %v4185_v24 = vpop.f32.mrf.mxu2 }
 0x34c   :  { %6367 = vst [vmem:[#allocation13_spill] sm:$0xff] %v4185_v24  ;;  %v4210_v57 = vpop.f32.mrf.mxu3 }
 0x34d   :  { %v4187_v13 = vpop.f32.mrf.mxu1 }
 0x34e   :  { %v4189_v38 = vpop.f32.mrf.mxu0 }
 0x350   :  { %1421 = vmatmul.bf16.gmra.mxu1 %v4035_v20  ;;  %1470 = vmatmul.bf16.gmra.mxu2 %v4035_v20 }
 0x351   :  { %1519 = vmatmul.bf16.gmra.mxu3 %v4035_v20  ;;  %1568 = vmatmul.bf16.gmra.mxu0 %v4035_v20  ;;  %v1601_v20 = vadd.f32 %v1600_v17, %v4161_v29  ;;  %v1667_v17 = vadd.f32 %v1666_v43, %v4189_v38 }
 0x353   :  { %v4199_v14 = vpop.f32.mrf.mxu2  ;;  %v1602_v49 = vadd.f32 %v1601_v20, %v4169_v9 }
 0x354   :  { %6368 = vst [vmem:[#allocation14_spill] sm:$0xff] %v4199_v14  ;;  %v4232_v37 = vpop.f32.mrf.mxu3 }
 0x355   :  { %v4202_v5 = vpop.f32.mrf.mxu1  ;;  %v1603_v52 = vadd.f32 %v1602_v49, %v4181_v56 }
 0x356   :  { %v4205_v15 = vpop.f32.mrf.mxu0 }
 0x357   :  { %6369 = vst [vmem:[#allocation15_spill] sm:$0xff] %v4205_v15  ;;  %v1604_v27 = vadd.f32 %v1603_v52, %v4187_v13  ;;  %v1668_v20 = vadd.f32 %v1667_v17, %v4205_v15  ;;  %v1622_v52 = vadd.f32 %v1621_v22, %v4167_v48 }
 0x359   :  { %v1605_v30 = vadd.f32 %v1604_v27, %v4202_v5 }
 0x35b   :  { %v4214_v47 = vpop.f32.mrf.mxu2 }
 0x35c   :  { %6370 = vst [vmem:[#allocation16_spill] sm:$0xff] %v4214_v47  ;;  %v4254_v46 = vpop.f32.mrf.mxu3 }
 0x35d   :  { %v4218_v6 = vpop.f32.mrf.mxu1 }
 0x35e   :  { %v4221_v32 = vpop.f32.mrf.mxu0  ;;  %v1606_v61 = vadd.f32 %v1605_v30, %v4218_v6  ;;  %v1623_v30 = vadd.f32 %v1622_v52, %v4177_v59 }
 0x35f   :  { %6371 = vst [vmem:[#allocation17_spill] sm:$0xff] %v4221_v32  ;;  %v1669_v49 = vadd.f32 %v1668_v20, %v4221_v32  ;;  %v1639_v32 = vadd.f32 %v4129_v3, %v4121_v62 }
 0x360   :  { %1426 = vmatmul.bf16.gmra.mxu1 %v4038_v50  ;;  %1475 = vmatmul.bf16.gmra.mxu2 %v4038_v50  ;;  %v1624_v43 = vadd.f32 %v1623_v30, %v4185_v24 }
 0x361   :  { %1524 = vmatmul.bf16.gmra.mxu3 %v4038_v50  ;;  %1573 = vmatmul.bf16.gmra.mxu0 %v4038_v50 }
 0x362   :  { %v1625_v63 = vadd.f32 %v1624_v43, %v4199_v14 }
 0x363   :  { %v4234_v2 = vpop.f32.mrf.mxu2 }
 0x364   :  { %6372 = vst [vmem:[#allocation18_spill] sm:$0xff] %v4234_v2  ;;  %v4276_v52 = vpop.f32.mrf.mxu3 }
 0x365   :  { %v4240_v8 = vpop.f32.mrf.mxu1 }
 0x366   :  { %v1607_v50 = vadd.f32 %v1606_v61, %v4240_v8  ;;  %v4244_v58 = vpop.f32.mrf.mxu0 }
 0x367   :  { %v1670_v27 = vadd.f32 %v1669_v49, %v4244_v58 }
 0x36b   :  { %v4251_v26 = vpop.f32.mrf.mxu2 }
 0x36c   :  { %6373 = vst [vmem:[#allocation19_spill] sm:$0xff] %v4251_v26 }
 0x36d   :  { %v4257_v41 = vpop.f32.mrf.mxu1 }
 0x36e   :  { %v1608_v31 = vadd.f32 %v1607_v50, %v4257_v41  ;;  %v4261_v39 = vpop.f32.mrf.mxu0  ;;  %v1626_v50 = vadd.f32 %v1625_v63, %v4214_v47 }
 0x36f   :  { %v1671_v61 = vadd.f32 %v1670_v27, %v4261_v39 }
 0x370   :  { %1431 = vmatmul.bf16.gmra.mxu1 %v4040_v51  ;;  %1480 = vmatmul.bf16.gmra.mxu2 %v4040_v51  ;;  %v1627_v20 = vadd.f32 %v1626_v50, %v4234_v2  ;;  %v4289_v50 = vpop.f32.mrf.mxu3 }
 0x371   :  { %1529 = vmatmul.bf16.gmra.mxu3 %v4040_v51  ;;  %1578 = vmatmul.bf16.gmra.mxu0 %v4040_v51 }
 0x372   :  { %v1628_v30 = vadd.f32 %v1627_v20, %v4251_v26 }
 0x373   :  { %v4270_v17 = vpop.f32.mrf.mxu2 }
 0x374   :  { %6374 = vst [vmem:[#allocation20_spill] sm:$0xff] %v4270_v17  ;;  %v1629_v51 = vadd.f32 %v1628_v30, %v4270_v17  ;;  %v1640_v17 = vadd.f32 %v1639_v32, %v4145_v54 }
 0x375   :  { %v1238_v21 = vpop.f32.mrf.mxu1 }
 0x376   :  { %v1609_v22 = vadd.f32 %v1608_v31, %v1238_v21  ;;  %v4274_v49 = vpop.f32.mrf.mxu0 }
 0x377   :  { %v1672_v27 = vadd.f32 %v1671_v61, %v4274_v49 }
 0x378   :  { %v4296_v48 = vpop.f32.mrf.mxu3 }
 0x37b   :  { %v4281_v24 = vpop.f32.mrf.mxu2 }
 0x37c   :  { %6375 = vst [vmem:[#allocation21_spill] sm:$0xff] %v4281_v24  ;;  %v1630_v43 = vadd.f32 %v1629_v51, %v4281_v24 }
 0x37d   :  { %v1241_v14 = vpop.f32.mrf.mxu1 }
 0x37e   :  { %v1610_v63 = vadd.f32 %v1609_v22, %v1241_v14  ;;  %v4284_v47 = vpop.f32.mrf.mxu0 }
 0x37f   :  { %v1673_v31 = vadd.f32 %v1672_v27, %v4284_v47 }
 0x380   :  { %1436 = vmatmul.bf16.gmra.mxu1 %v4043_v40  ;;  %1485 = vmatmul.bf16.gmra.mxu2 %v4043_v40 }
 0x381   :  { %1534 = vmatmul.bf16.gmra.mxu3 %v4043_v40  ;;  %1583 = vmatmul.bf16.gmra.mxu0 %v4043_v40 }
 0x383   :  { %v4293_v61 = vpop.f32.mrf.mxu2 }
 0x384   :  { %6376 = vst [vmem:[#allocation22_spill] sm:$0xff] %v4293_v61  ;;  %v1631_v20 = vadd.f32 %v1630_v43, %v4293_v61 }
 0x385   :  { %v1243_v30 = vpop.f32.mrf.mxu1 }
 0x386   :  { %v1611_v22 = vadd.f32 %v1610_v63, %v1243_v30  ;;  %v1390_v51 = vpop.f32.mrf.mxu0  ;;  %v1641_v63 = vadd.f32 %v1640_v17, %v4155_v10 }
 0x387   :  { %v1674_v26 = vadd.f32 %v1673_v31, %v1390_v51 }
 0x388   :  { %v1612_v2 = vrot.slane %v1611_v22, 4 }
 0x389   :  { %v1675_v27 = vrot.slane %v1674_v26, 4 }
 0x38a   :  { %v1613_v59 = vadd.f32 %v1612_v2, %v1611_v22 }
 0x38b   :  { %v1676_v19 = vadd.f32 %v1675_v27, %v1674_v26  ;;  %v4301_v61 = vpop.f32.mrf.mxu2  ;;  %v1642_v26 = vadd.f32 %v1641_v63, %v4165_v42  ;;  %v4307_v27 = vpop.f32.mrf.mxu3 }
 0x38c   :  { %v1614_v35 = vrot.slane %v1613_v59, 2  ;;  %v1632_v2 = vadd.f32 %v1631_v20, %v4301_v61 }
 0x38d   :  { %v1677_v45 = vrot.slane %v1676_v19, 2 }
 0x38e   :  { %v1615_v40 = vadd.f32 %v1614_v35, %v1613_v59  ;;  %v1643_v35 = vadd.f32 %v1642_v26, %v4179_v11  ;;  %v1633_v32 = vrot.slane %v1632_v2, 4 }
 0x38f   :  { %v1678_v24 = vadd.f32 %v1677_v45, %v1676_v19 }
 0x390   :  { %v1616_v43 = vrot.slane %v1615_v40, 1  ;;  %v1644_v17 = vadd.f32 %v1643_v35, %v4191_v12 }
 0x391   :  { %v1679_v15 = vrot.slane %v1678_v24, 1 }
 0x392   :  { %v1617_v31 = vadd.f32 %v1616_v43, %v1615_v40 }
 0x393   :  { %v1680_v59 = vadd.f32 %v1679_v15, %v1678_v24 }
 0x394   :  { %v1765_v22 = vmul.f32 %v1617_v31, %v3722_v36 }
 0x396   :  { %v4311_v45 = vsub.f32 %v4111_v53, %v1765_v22  ;;  %v4314_v19 = vsub.f32 %v4123_v1, %v1765_v22  ;;  %v4318_v20 = vsub.f32 %v4218_v6, %v1765_v22  ;;  %v4321_v40 = vsub.f32 %v4240_v8, %v1765_v22 }
 0x397   :  { %v4324_v43 = vsub.f32 %v4257_v41, %v1765_v22  ;;  %v4326_v63 = vsub.f32 %v1238_v21, %v1765_v22  ;;  %v4328_v53 = vsub.f32 %v1241_v14, %v1765_v22  ;;  %v4330_v31 = vsub.f32 %v1243_v30, %v1765_v22 }
 0x398   :  { %6377 = vst [vmem:[#allocation23_spill] sm:$0xff] %v4311_v45  ;;  %v1645_v1 = vadd.f32 %v1644_v17, %v4210_v57  ;;  %v4334_v24 = vsub.f32 %v4131_v23, %v1765_v22  ;;  %v1901_v15 = vmul.f32 %v4311_v45, %v4311_v45  ;;  %v1909_v6 = vmul.f32 %v4314_v19, %v4314_v19  ;;  %v4353_v17 = vpop.f32.mrf.mxu3 }
 0x399   :  { %6378 = vst [vmem:[#allocation24_spill] sm:$0xff] %v4314_v19  ;;  %v4341_v8 = vmul.f32 %v1680_v59, %v3722_v36  ;;  %v1634_v41 = vadd.f32 %v1633_v32, %v1632_v2  ;;  %v4345_v21 = vsub.f32 %v4141_v34, %v1765_v22  ;;  %v4349_v23 = vsub.f32 %v4149_v55, %v1765_v22 }
 0x39a   :  { %6379 = vst [vmem:[#allocation25_spill] sm:$0xff] %v4334_v24  ;;  %v1646_v14 = vadd.f32 %v1645_v1, %v4232_v37  ;;  %v1917_v26 = vmul.f32 %v4334_v24, %v4334_v24  ;;  %v2029_v35 = vadd.f32 %v1909_v6, %v1901_v15  ;;  %v4365_v55 = vsub.f32 %v4161_v29, %v1765_v22 }
 0x39b   :  { %6380 = vst [vmem:[#allocation26_spill] sm:$0xff] %v4345_v21  ;;  %v4357_v59 = vsub.f32 %v4113_v28, %v4341_v8  ;;  %v4361_v2 = vsub.f32 %v4125_v60, %v4341_v8  ;;  %v1635_v34 = vrot.slane %v1634_v41, 2  ;;  %v1925_v1 = vmul.f32 %v4345_v21, %v4345_v21 }
 0x39c   :  { %v1647_v30 = vadd.f32 %v1646_v14, %v4254_v46  ;;  %6381 = vst [vmem:[#allocation27_spill] sm:$0xff] %v4349_v23  ;;  %v2030_v15 = vadd.f32 %v2029_v35, %v1917_v26  ;;  %v4370_v6 = vsub.f32 %v4169_v9, %v1765_v22  ;;  %v4374_v28 = vsub.f32 %v4244_v58, %v4341_v8 }
 0x39d   :  { %6382 = vst [vmem:[#allocation28_spill] sm:$0xff] %v4357_v59  ;;  %v4378_v60 = vsub.f32 %v4261_v39, %v4341_v8  ;;  %v4382_v14 = vsub.f32 %v4274_v49, %v4341_v8  ;;  %v1933_v29 = vmul.f32 %v4349_v23, %v4349_v23  ;;  %v4388_v9 = vsub.f32 %v4284_v47, %v4341_v8 }
 0x39e   :  { %6383 = vst [vmem:[#allocation29_spill] sm:$0xff] %v4361_v2  ;;  %v1648_v32 = vadd.f32 %v1647_v30, %v4276_v52  ;;  %v2031_v30 = vadd.f32 %v2030_v15, %v1925_v1  ;;  %v4391_v26 = vsub.f32 %v1390_v51, %v4341_v8  ;;  %v4395_v58 = vsub.f32 %v4133_v7, %v4341_v8 }
 0x39f   :  { %6384 = vst [vmem:[#allocation30_spill] sm:$0xff] %v4365_v55  ;;  %v1904_v39 = vmul.f32 %v4357_v59, %v4357_v59  ;;  %v1912_v49 = vmul.f32 %v4361_v2, %v4361_v2  ;;  %v1636_v35 = vadd.f32 %v1635_v34, %v1634_v41  ;;  %v4403_v15 = vsub.f32 %v4181_v56, %v1765_v22 }
 0x3a0   :  { %6385 = vst [vmem:[#allocation31_spill] sm:$0xff] %v4370_v6  ;;  %v1649_v1 = vadd.f32 %v1648_v32, %v4289_v50  ;;  %v1941_v47 = vmul.f32 %v4365_v55, %v4365_v55  ;;  %v2032_v51 = vadd.f32 %v2031_v30, %v1933_v29  ;;  %v4409_v7 = vsub.f32 %v4143_v4, %v4341_v8 }
 0x3a1   :  { %6386 = vst [vmem:[#allocation32_spill] sm:$0xff] %v4395_v58  ;;  %v4413_v59 = vsub.f32 %v4187_v13, %v1765_v22  ;;  %v1949_v41 = vmul.f32 %v4370_v6, %v4370_v6  ;;  %v4419_v56 = vsub.f32 %v4151_v18, %v4341_v8  ;;  %v1920_v32 = vmul.f32 %v4395_v58, %v4395_v58  ;;  %v6404_v6 = vld [vmem:[#allocation10_spill] sm:$0xff] }
 0x3a2   :  { %6387 = vst [vmem:[#allocation33_spill] sm:$0xff] %v4403_v15  ;;  %v1650_v23 = vadd.f32 %v1649_v1, %v4296_v48  ;;  %v2033_v34 = vadd.f32 %v2032_v51, %v1941_v47  ;;  %v2092_v29 = vadd.f32 %v1912_v49, %v1904_v39  ;;  %v1637_v30 = vrot.slane %v1636_v35, 1  ;;  %v4435_v39 = vpop.f32.mrf.mxu3 }
 0x3a3   :  { %6388 = vst [vmem:[#allocation34_spill] sm:$0xff] %v4409_v7  ;;  %v4425_v1 = vsub.f32 %v4202_v5, %v1765_v22  ;;  %v1957_v13 = vmul.f32 %v4403_v15, %v4403_v15  ;;  %v4431_v47 = vsub.f32 %v4163_v0, %v4341_v8  ;;  %v1928_v18 = vmul.f32 %v4409_v7, %v4409_v7 }
 0x3a4   :  { %6389 = vst [vmem:[#allocation35_spill] sm:$0xff] %v4419_v56  ;;  %v1651_v4 = vadd.f32 %v1650_v23, %v4307_v27  ;;  %v2034_v2 = vadd.f32 %v2033_v34, %v1949_v41  ;;  %v2093_v51 = vadd.f32 %v2092_v29, %v1920_v32  ;;  %v1638_v58 = vadd.f32 %v1637_v30, %v1636_v35 }
 0x3a5   :  { %6390 = vst [vmem:[#allocation36_spill] sm:$0xff] %v4431_v47  ;;  %v1965_v5 = vmul.f32 %v4413_v59, %v4413_v59  ;;  %v4442_v49 = vsub.f32 %v4171_v44, %v4341_v8  ;;  %v1936_v0 = vmul.f32 %v4419_v56, %v4419_v56  ;;  %v1973_v35 = vmul.f32 %v4425_v1, %v4425_v1 }
 0x3a6   :  { %v1652_v23 = vadd.f32 %v1651_v4, %v4353_v17  ;;  %v2035_v22 = vadd.f32 %v2034_v2, %v1957_v13  ;;  %v2094_v41 = vadd.f32 %v2093_v51, %v1928_v18  ;;  %v4447_v34 = vmul.f32 %v1638_v58, %v3722_v36 }
 0x3a7   :  { %6391 = vst [vmem:[#allocation37_spill] sm:$0xff] %v4442_v49  ;;  %v4453_v29 = vsub.f32 %v4183_v33, %v4341_v8  ;;  %v1981_v44 = vmul.f32 %v4318_v20, %v4318_v20  ;;  %v1944_v30 = vmul.f32 %v4431_v47, %v4431_v47  ;;  %v1989_v58 = vmul.f32 %v4321_v40, %v4321_v40 }
 0x3a8   :  { %v2036_v32 = vadd.f32 %v2035_v22, %v1965_v5  ;;  %v1653_v2 = vadd.f32 %v1652_v23, %v4435_v39  ;;  %v2095_v4 = vadd.f32 %v2094_v41, %v1936_v0  ;;  %v1997_v13 = vmul.f32 %v4324_v43, %v4324_v43  ;;  %v6395_v41 = vld [vmem:[#allocation15_spill] sm:$0xff] }
 0x3a9   :  { %6392 = vst [vmem:[#allocation38_spill] sm:$0xff] %v4453_v29  ;;  %v4466_v33 = vsub.f32 %v4189_v38, %v4341_v8  ;;  %v1952_v51 = vmul.f32 %v4442_v49, %v4442_v49  ;;  %v4472_v5 = vsub.f32 %v4119_v16, %v4447_v34  ;;  %v4476_v22 = vsub.f32 %v4127_v25, %v4447_v34  ;;  %v6397_v16 = vld [vmem:[#allocation21_spill] sm:$0xff]  ;;  %v6398_v25 = vld [vmem:[#allocation22_spill] sm:$0xff] }
 0x3aa   :  { %v2037_v18 = vadd.f32 %v2036_v32, %v1973_v35  ;;  %v2096_v23 = vadd.f32 %v2095_v4, %v1944_v30  ;;  %v4480_v35 = vsub.f32 %v6395_v41, %v4341_v8  ;;  %v1960_v38 = vmul.f32 %v4453_v29, %v4453_v29  ;;  %v6396_v30 = vld [vmem:[#allocation20_spill] sm:$0xff]  ;;  %v6399_v41 = vld [vmem:[#allocation17_spill] sm:$0xff] }
 0x3ab   :  { %6393 = vst [vmem:[#allocation39_spill] sm:$0xff] %v4472_v5  ;;  %v1654_v32 = vrot.slane %v1653_v2, 4  ;;  %v4486_v4 = vsub.f32 %v6396_v30, %v4447_v34  ;;  %v4490_v49 = vsub.f32 %v6397_v16, %v4447_v34  ;;  %v4498_v56 = vsub.f32 %v6399_v41, %v4341_v8  ;;  %v6400_v16 = vld [vmem:[#allocation8_spill] sm:$0xff] }
 0x3ac   :  { %6394 = vst [vmem:[#allocation40_spill] sm:$0xff] %v4476_v22  ;;  %v2038_v0 = vadd.f32 %v2037_v18, %v1981_v44  ;;  %v2097_v47 = vadd.f32 %v2096_v23, %v1952_v51  ;;  %v4494_v44 = vsub.f32 %v6398_v25, %v4447_v34  ;;  %v1968_v51 = vmul.f32 %v4466_v33, %v4466_v33 }
 0x3ad   :  { %v4504_v23 = vsub.f32 %v4301_v61, %v4447_v34  ;;  %v4508_v29 = vsub.f32 %v6400_v16, %v4447_v34  ;;  %v1902_v25 = vmul.f32 %v4472_v5, %v4472_v5  ;;  %v2005_v8 = vmul.f32 %v4326_v63, %v4326_v63 }
 0x3ae   :  { %v2039_v18 = vadd.f32 %v2038_v0, %v1989_v58  ;;  %v2098_v30 = vadd.f32 %v2097_v47, %v1960_v38  ;;  %v1910_v58 = vmul.f32 %v4476_v22, %v4476_v22  ;;  %v1655_v41 = vadd.f32 %v1654_v32, %v1653_v2  ;;  %v6402_v47 = vld [vmem:[#allocation9_spill] sm:$0xff] }
 0x3af   :  { %6401 = vst [vmem:[#allocation15_spill] sm:$0xff] %v4508_v29  ;;  %v1976_v61 = vmul.f32 %v4480_v35, %v4480_v35  ;;  %v4520_v38 = vsub.f32 %v6402_v47, %v4447_v34  ;;  %v2013_v16 = vmul.f32 %v4328_v53, %v4328_v53  ;;  %v1984_v22 = vmul.f32 %v4498_v56, %v4498_v56  ;;  %v6406_v47 = vld [vmem:[#allocation11_spill] sm:$0xff] }
 0x3b0   :  { %v2040_v0 = vadd.f32 %v2039_v18, %v1997_v13  ;;  %v2099_v7 = vadd.f32 %v2098_v30, %v1968_v51  ;;  %v4528_v13 = vsub.f32 %v6404_v6, %v4447_v34  ;;  %v1918_v2 = vmul.f32 %v4508_v29, %v4508_v29 }
 0x3b1   :  { %6403 = vst [vmem:[#allocation20_spill] sm:$0xff] %v4520_v38  ;;  %v2050_v32 = vadd.f32 %v1910_v58, %v1902_v25  ;;  %v2021_v18 = vmul.f32 %v4330_v31, %v4330_v31  ;;  %v1992_v30 = vmul.f32 %v4374_v28, %v4374_v28  ;;  %v1926_v6 = vmul.f32 %v4520_v38, %v4520_v38 }
 0x3b2   :  { %v2041_v5 = vadd.f32 %v2040_v0, %v2005_v8  ;;  %v2100_v15 = vadd.f32 %v2099_v7, %v1976_v61  ;;  %6405 = vst [vmem:[#allocation21_spill] sm:$0xff] %v4528_v13  ;;  %v1656_v8 = vrot.slane %v1655_v41, 2  ;;  %v4538_v7 = vsub.f32 %v6406_v47, %v4447_v34 }
 0x3b3   :  { %v2051_v61 = vadd.f32 %v2050_v32, %v1918_v2  ;;  %v2000_v25 = vmul.f32 %v4378_v60, %v4378_v60  ;;  %v2008_v21 = vmul.f32 %v4382_v14, %v4382_v14  ;;  %v6410_v32 = vld [vmem:[#allocation13_spill] sm:$0xff] }
 0x3b4   :  { %v2042_v51 = vadd.f32 %v2041_v5, %v2013_v16  ;;  %v2101_v0 = vadd.f32 %v2100_v15, %v1984_v22  ;;  %6407 = vst [vmem:[#allocation22_spill] sm:$0xff] %v4538_v7  ;;  %v1657_v58 = vadd.f32 %v1656_v8, %v1655_v41  ;;  %v6408_v5 = vld [vmem:[#allocation12_spill] sm:$0xff]  ;;  %v1934_v15 = vmul.f32 %v4528_v13, %v4528_v13 }
 0x3b5   :  { %v4546_v16 = vsub.f32 %v6408_v5, %v4447_v34  ;;  %v2052_v22 = vadd.f32 %v2051_v61, %v1926_v6  ;;  %v1942_v41 = vmul.f32 %v4538_v7, %v4538_v7  ;;  %v2016_v8 = vmul.f32 %v4388_v9, %v4388_v9 }
 0x3b6   :  { %v2043_v55 = vadd.f32 %v2042_v51, %v2021_v18  ;;  %v2102_v29 = vadd.f32 %v2101_v0, %v1992_v30  ;;  %v1658_v38 = vrot.slane %v1657_v58, 1  ;;  %v4554_v18 = vsub.f32 %v6410_v32, %v4447_v34  ;;  %v6412_v0 = vld [vmem:[#allocation14_spill] sm:$0xff] }
 0x3b7   :  { %6409 = vst [vmem:[#allocation17_spill] sm:$0xff] %v4546_v16  ;;  %v2053_v51 = vadd.f32 %v2052_v22, %v1934_v15  ;;  %v4562_v6 = vsub.f32 %v6412_v0, %v4447_v34  ;;  %v2024_v13 = vmul.f32 %v4391_v26, %v4391_v26 }
 0x3b8   :  { %v2044_v47 = vrot.slane %v2043_v55, 4  ;;  %v2103_v2 = vadd.f32 %v2102_v29, %v2000_v25  ;;  %6411 = vst [vmem:[#allocation8_spill] sm:$0xff] %v4554_v18  ;;  %v1950_v29 = vmul.f32 %v4546_v16, %v4546_v16  ;;  %v1659_v5 = vadd.f32 %v1658_v38, %v1657_v58 }
 0x3b9   :  { %v2054_v25 = vadd.f32 %v2053_v51, %v1942_v41  ;;  %v1958_v22 = vmul.f32 %v4554_v18, %v4554_v18  ;;  %v1966_v38 = vmul.f32 %v4562_v6, %v4562_v6 }
 0x3ba   :  { %v2045_v30 = vadd.f32 %v2044_v47, %v2043_v55  ;;  %v2104_v61 = vadd.f32 %v2103_v2, %v2008_v21  ;;  %v6413_v55 = vld [vmem:[#allocation16_spill] sm:$0xff]  ;;  %v6414_v21 = vld [vmem:[#allocation18_spill] sm:$0xff]  ;;  %v4581_v51 = vmul.f32 %v1659_v5, %v3722_v36 }
 0x3bb   :  { %v4570_v15 = vsub.f32 %v6413_v55, %v4447_v34  ;;  %v2055_v47 = vadd.f32 %v2054_v25, %v1950_v29  ;;  %v4576_v2 = vsub.f32 %v6414_v21, %v4447_v34  ;;  %v4585_v55 = vpop.f32.mrf.mxu0 }
 0x3bc   :  { %v2046_v32 = vrot.slane %v2045_v30, 2  ;;  %v2105_v7 = vadd.f32 %v2104_v61, %v2016_v8  ;;  %v4583_v61 = vpop.f32.mrf.mxu1  ;;  %6415 = vst [vmem:[#allocation9_spill] sm:$0xff] %v4585_v55  ;;  %v4601_v21 = vsub.f32 %v4129_v3, %v4581_v51  ;;  %v4632_v19 = vsub.f32 %v4155_v10, %v4581_v51 }
 0x3bd   :  { %v2056_v58 = vadd.f32 %v2055_v47, %v1958_v22  ;;  %v4597_v47 = vsub.f32 %v4121_v62, %v4581_v51  ;;  %v4645_v10 = vsub.f32 %v4165_v42, %v4581_v51 }
 0x3be   :  { %v2047_v0 = vadd.f32 %v2046_v32, %v2045_v30  ;;  %v2106_v41 = vadd.f32 %v2105_v7, %v2024_v13  ;;  %v6416_v30 = vld [vmem:[#allocation19_spill] sm:$0xff]  ;;  %v1974_v13 = vmul.f32 %v4570_v15, %v4570_v15  ;;  %v1982_v32 = vmul.f32 %v4576_v2, %v4576_v2  ;;  %6418 = vst [vmem:[#allocation11_spill] sm:$0xff] %v4601_v21 }
 0x3bf   :  { %v4589_v29 = vsub.f32 %v6416_v30, %v4447_v34  ;;  %v2057_v7 = vadd.f32 %v2056_v58, %v1966_v38  ;;  %6417 = vst [vmem:[#allocation10_spill] sm:$0xff] %v4597_v47  ;;  %v1911_v3 = vmul.f32 %v4601_v21, %v4601_v21 }
 0x3c0   :  { %v2048_v8 = vrot.slane %v2047_v0, 1  ;;  %v2107_v18 = vrot.slane %v2106_v41, 4  ;;  %6423 = vst [vmem:[#allocation18_spill] sm:$0xff] %v4632_v19 }
 0x3c1   :  { %v2058_v22 = vadd.f32 %v2057_v7, %v1974_v13  ;;  %v1990_v38 = vmul.f32 %v4589_v29, %v4589_v29  ;;  %v1903_v13 = vmul.f32 %v4597_v47, %v4597_v47  ;;  %v4614_v7 = vpop.f32.mrf.mxu3  ;;  %v2022_v47 = vmul.f32 %v4504_v23, %v4504_v23  ;;  %6427 = vst [vmem:[#allocation43_spill] sm:$0xff] %v4645_v10 }
 0x3c2   :  { %v2049_v25 = vadd.f32 %v2048_v8, %v2047_v0  ;;  %v2108_v5 = vadd.f32 %v2107_v18, %v2106_v41  ;;  %v1998_v18 = vmul.f32 %v4486_v4, %v4486_v4  ;;  %v4608_v41 = vpop.f32.mrf.mxu2  ;;  %6420 = vst [vmem:[#allocation13_spill] sm:$0xff] %v4614_v7 }
 0x3c3   :  { %v2059_v0 = vadd.f32 %v2058_v22, %v1982_v32  ;;  %6419 = vst [vmem:[#allocation12_spill] sm:$0xff] %v4608_v41  ;;  %v4618_v32 = vpop.f32.mrf.mxu0  ;;  %v2071_v21 = vadd.f32 %v1911_v3, %v1903_v13 }
 0x3c4   :  { %v2197_v34 = vmul.f32 %v2049_v25, %v3722_v36  ;;  %v2109_v30 = vrot.slane %v2108_v5, 2  ;;  %v4616_v25 = vpop.f32.mrf.mxu1  ;;  %6421 = vst [vmem:[#allocation14_spill] sm:$0xff] %v4618_v32 }
 0x3c5   :  { %v2060_v62 = vadd.f32 %v2059_v0, %v1990_v38  ;;  %v2014_v38 = vmul.f32 %v4494_v44, %v4494_v44 }
 0x3c6   :  { %v2205_v58 = vadd.f32 1e-05, %v2197_v34  ;;  %v2110_v8 = vadd.f32 %v2109_v30, %v2108_v5  ;;  %v2006_v34 = vmul.f32 %v4490_v49, %v4490_v49  ;;  %v4624_v5 = vsub.f32 %v4145_v54, %v4581_v51 }
 0x3c7   :  { %v2061_v16 = vadd.f32 %v2060_v62, %v1998_v18 }
 0x3c8   :  { %3407 = vrsqrt.f32 %v2205_v58  ;;  %v2111_v22 = vrot.slane %v2110_v8, 1  ;;  %6422 = vst [vmem:[#allocation16_spill] sm:$0xff] %v4624_v5  ;;  %v1919_v18 = vmul.f32 %v4624_v5, %v4624_v5  ;;  %v1935_v5 = vmul.f32 %v4645_v10, %v4645_v10 }
 0x3c9   :  { %v2062_v0 = vadd.f32 %v2061_v16, %v2006_v34  ;;  %vm2219_vm9 = vweird.f32 %v2205_v58 }
 0x3ca   :  { %v2112_v30 = vadd.f32 %v2111_v22, %v2110_v8  ;;  %v4637_v8 = vpop.f32.mrf.mxu2  ;;  %v2072_v16 = vadd.f32 %v2071_v21, %v1919_v18 }
 0x3cb   :  { %v2063_v24 = vadd.f32 %v2062_v0, %v2014_v38  ;;  %6424 = vst [vmem:[#allocation19_spill] sm:$0xff] %v4637_v8  ;;  %v4641_v3 = vpop.f32.mrf.mxu0  ;;  %v1927_v38 = vmul.f32 %v4632_v19, %v4632_v19  ;;  %v4649_v0 = vpop.f32.mrf.mxu3  ;;  %v4661_v19 = vsub.f32 %v4179_v11, %v4581_v51 }
 0x3cc   :  { %v2200_v54 = vmul.f32 %v2112_v30, %v3722_v36  ;;  %v4639_v13 = vpop.f32.mrf.mxu1  ;;  %6426 = vst [vmem:[#allocation42_spill] sm:$0xff] %v4641_v3  ;;  %v3283_v30 = vld [vmem:[%s6212_s4 + $0x4] ss:$8 sm:$0xf] }
 0x3cd   :  { %v2064_v7 = vadd.f32 %v2063_v24, %v2022_v47  ;;  %6425 = vst [vmem:[#allocation41_spill] sm:$0xff] %v4639_v13  ;;  %v3284_v47 = vld [vmem:[%s6212_s4 + $0x4] ss:$8 sm:$0xf0]  ;;  %v1943_v45 = vmul.f32 %v4661_v19, %v4661_v19 }
 0x3ce   :  { %v3408_v62 = vpop.eup %3407  ;;  %6428 = vst [vmem:[#allocation44_spill] sm:$0xff] %v4649_v0  ;;  %v4654_v24 = vadd.f32 1e-05, %v2200_v54  ;;  %v4665_v0 = vor.u32 %v3284_v47, %v3283_v30 }
 0x3cf   :  { %v2214_v22 = vmul.f32 %v3408_v62, %v2205_v58  ;;  %v2065_v18 = vrot.slane %v2064_v7, 4  ;;  %vm2220_vm8 = vweird.f32 %v3408_v62  ;;  %6429 = vst [vmem:[#allocation45_spill] sm:$0xff] %v4661_v19  ;;  %v4691_v58 = vsub.f32 %v4191_v12, %v4581_v51 }
 0x3d0   :  { %6430 = vst [vmem:[#allocation46_spill] sm:$0xff] %v4665_v0  ;;  %3409 = vrsqrt.f32 %v4654_v24  ;;  %vm2221_vm10 = vmor %vm2219_vm9, %vm2220_vm8  ;;  %v4687_v8 = vperm.slane %v4665_v0, 0  ;;  %vm2249_vm12 = vweird.f32 %v4654_v24 }
 0x3d1   :  { %v2215_v34 = vmul.f32 %v3408_v62, %v2214_v22  ;;  %v2073_v22 = vadd.f32 %v2072_v16, %v1927_v38  ;;  %v3286_v16 = vld [vmem:[%s6212_s4 + $0x5] ss:$8 sm:$0xf0]  ;;  %v2066_v11 = vadd.f32 %v2065_v18, %v2064_v7  ;;  %6436 = vst [vmem:[#allocation52_spill] sm:$0xff] %v4691_v58 }
 0x3d2   :  { %v4668_v54 = vpop.f32.mrf.mxu2 }
 0x3d3   :  { %v2216_v21 = vmul.f32 0.5, %v2215_v34  ;;  %6431 = vst [vmem:[#allocation47_spill] sm:$0xff] %v4668_v54  ;;  %v3285_v34 = vld [vmem:[%s6212_s4 + $0x5] ss:$8 sm:$0xf]  ;;  %v4678_v30 = vpop.f32.mrf.mxu0  ;;  %v2067_v41 = vrot.slane %v2066_v11, 2 }
 0x3d4   :  { %v4676_v10 = vpop.f32.mrf.mxu1  ;;  %6433 = vst [vmem:[#allocation49_spill] sm:$0xff] %v4678_v30  ;;  %v4684_v54 = vor.u32 %v3286_v16, %v3285_v34  ;;  %s3482_s4 = smov [#allocation5]  }
 0x3d5   :  { %v2217_v42 = vsub.f32 1.5, %v2216_v21  ;;  %v2074_v21 = vadd.f32 %v2073_v22, %v1935_v5  ;;  %6432 = vst [vmem:[#allocation48_spill] sm:$0xff] %v4676_v10  ;;  %v4693_v5 = vpop.f32.mrf.mxu3  ;;  %s2991_s27 = sshll.u32 %s3482_s4, 4  ;;  %s2992_s27 = int_to_ptr.vmem [resolvable:$true] %s2991_s27 }
 0x3d6   :  { %6435 = vst [vmem:[#allocation51_spill] sm:$0xff] %v4684_v54  ;;  %v3410_v18 = vpop.eup %3409 }
 0x3d7   :  { %v2218_v38 = vmul.f32 %v3408_v62, %v2217_v42  ;;  %v2075_v7 = vadd.f32 %v2074_v21, %v1943_v45  ;;  %6437 = vst [vmem:[#allocation53_spill] sm:$0xff] %v4693_v5  ;;  %v2068_v21 = vadd.f32 %v2067_v41, %v2066_v11  ;;  %vm2250_vm11 = vweird.f32 %v3410_v18 }
 0x3d8   :  { %vm2251_vm13 = vmor %vm2249_vm12, %vm2250_vm11  ;;  %vm2949_vm11 = vcmask 1045508   ;;  %vm2951_vm12 = vcmask 1043456  }
 0x3d9   :  { %v4680_v47 = vsel %vm2221_vm10, %v3408_v62, %v2218_v38  ;;  %vm2947_vm10 = vcmask 1041408  }
 0x3da   :  { %6434 = vst [vmem:[#allocation50_spill] sm:$0xff] %v4680_v47  ;;  %v2357_v62 = vmul.f32 %v4680_v47, %v4413_v59  ;;  %v2365_v22 = vmul.f32 %v4680_v47, %v4425_v1  ;;  %v2373_v42 = vmul.f32 %v4680_v47, %v4318_v20  ;;  %v2381_v34 = vmul.f32 %v4680_v47, %v4321_v40  ;;  %v4714_v38 = vpop.f32.mrf.mxu2 }
 0x3db   :  { %v2389_v12 = vmul.f32 %v4680_v47, %v4324_v43  ;;  %v2397_v45 = vmul.f32 %v4680_v47, %v4326_v63  ;;  %v2405_v16 = vmul.f32 %v4680_v47, %v4328_v53  ;;  %v2413_v59 = vmul.f32 %v4680_v47, %v4330_v31  ;;  %6439 = vst [vmem:[#allocation55_spill] sm:$0xff] %v4714_v38  ;;  %v4728_v5 = vpop.f32.mrf.mxu0 }
 0x3dc   :  { %v4712_v1 = vperm.slane %v4684_v54, 0  ;;  %v2244_v20 = vmul.f32 %v3410_v18, %v4654_v24  ;;  %v4719_v40 = vsub.f32 %v4210_v57, %v4581_v51  ;;  %v1951_v43 = vmul.f32 %v4691_v58, %v4691_v58  ;;  %v4726_v19 = vpop.f32.mrf.mxu1  ;;  %6442 = vst [vmem:[#allocation58_spill] sm:$0xff] %v4728_v5 }
 0x3dd   :  { %v2502_v63 = vmul.f32 %v4687_v8, %v2357_v62  ;;  %v2510_v53 = vmul.f32 %v4687_v8, %v2365_v22  ;;  %v2518_v31 = vmul.f32 %v4687_v8, %v2373_v42  ;;  %6441 = vst [vmem:[#allocation57_spill] sm:$0xff] %v4726_v19  ;;  %v2526_v47 = vmul.f32 %v4687_v8, %v2381_v34 }
 0x3de   :  { %6438 = vst [vmem:[#allocation54_spill] sm:$0xff] %v4712_v1  ;;  %v2076_v38 = vadd.f32 %v2075_v7, %v1951_v43  ;;  %v2534_v58 = vmul.f32 %v4687_v8, %v2389_v12  ;;  %v4736_v62 = vsub.f32 %v4232_v37, %v4581_v51  ;;  %v1959_v41 = vmul.f32 %v4719_v40, %v4719_v40 }
 0x3df   :  { %6440 = vst [vmem:[#allocation56_spill] sm:$0xff] %v4719_v40  ;;  %v2647_v57 = vadd.f32 %v4712_v1, %v2502_v63  ;;  %v2655_v30 = vadd.f32 %v4712_v1, %v2510_v53  ;;  %v2663_v11 = vadd.f32 %v4712_v1, %v2518_v31  ;;  %v2245_v42 = vmul.f32 %v3410_v18, %v2244_v20  ;;  %v4742_v63 = vpop.f32.mrf.mxu3 }
 0x3e0   :  { %v2069_v7 = vrot.slane %v2068_v21, 1  ;;  %v2542_v34 = vmul.f32 %v4687_v8, %v2397_v45  ;;  %v2077_v43 = vadd.f32 %v2076_v38, %v1959_v41  ;;  %6443 = vst [vmem:[#allocation59_spill] sm:$0xff] %v4742_v63  ;;  %v2671_v53 = vadd.f32 %v4712_v1, %v2526_v47 }
 0x3e1   :  { %v2815_v22 = vmax.f32 %v2647_v57, %v2655_v30  ;;  %v2246_v5 = vmul.f32 0.5, %v2245_v42  ;;  %v2550_v10 = vmul.f32 %v4687_v8, %v2405_v16  ;;  %v4750_v30 = vsub.f32 %v4254_v46, %v4581_v51 }
 0x3e2   :  { %v2070_v19 = vadd.f32 %v2069_v7, %v2068_v21  ;;  %v4745_v37 = vpop.f32.mrf.mxu2  ;;  %v1967_v45 = vmul.f32 %v4736_v62, %v4736_v62  ;;  %v2679_v38 = vadd.f32 %v4712_v1, %v2534_v58  ;;  %v2558_v16 = vmul.f32 %v4687_v8, %v2413_v59 }
 0x3e3   :  { %v2816_v12 = vmax.f32 %v2815_v22, %v2663_v11  ;;  %v2247_v31 = vsub.f32 1.5, %v2246_v5  ;;  %v4758_v21 = vpop.f32.mrf.mxu0  ;;  %v4764_v46 = vsub.f32 %v4276_v52, %v4581_v51  ;;  %v2687_v41 = vadd.f32 %v4712_v1, %v2542_v34 }
 0x3e4   :  { %v2198_v47 = vmul.f32 %v2070_v19, %v3722_v36  ;;  %v4756_v57 = vpop.f32.mrf.mxu1  ;;  %6445 = vst [vmem:[#allocation61_spill] sm:$0xff] %v4758_v21  ;;  %v2078_v22 = vadd.f32 %v2077_v43, %v1967_v45  ;;  %v2695_v5 = vadd.f32 %v4712_v1, %v2550_v10  ;;  %v1975_v24 = vmul.f32 %v4750_v30, %v4750_v30 }
 0x3e5   :  { %v2817_v20 = vmax.f32 %v2816_v12, %v2671_v53  ;;  %6444 = vst [vmem:[#allocation60_spill] sm:$0xff] %v4756_v57  ;;  %v2248_v58 = vmul.f32 %v3410_v18, %v2247_v31  ;;  %v4777_v52 = vsub.f32 %v4289_v50, %v4581_v51  ;;  %v1983_v59 = vmul.f32 %v4764_v46, %v4764_v46 }
 0x3e6   :  { %6446 = vst [vmem:[#allocation62_spill] sm:$0xff] %v4764_v46  ;;  %v4768_v19 = vadd.f32 1e-05, %v2198_v47  ;;  %v2703_v34 = vadd.f32 %v4712_v1, %v2558_v16  ;;  %v4783_v53 = vperm.slane %v4665_v0, 3  ;;  %v2079_v10 = vadd.f32 %v2078_v22, %v1975_v24 }
 0x3e7   :  { %v2818_v11 = vmax.f32 %v2817_v20, %v2679_v38  ;;  %v4771_v7 = vsel %vm2251_vm13, %v3410_v18, %v2248_v58  ;;  %6447 = vst [vmem:[#allocation63_spill] sm:$0xff] %v4777_v52  ;;  %v4794_v38 = vpop.f32.mrf.mxu3 }
 0x3e8   :  { %v2360_v18 = vmul.f32 %v4771_v7, %v4466_v33  ;;  %v2368_v45 = vmul.f32 %v4771_v7, %v4480_v35  ;;  %v2376_v50 = vmul.f32 %v4771_v7, %v4498_v56  ;;  %3411 = vrsqrt.f32 %v4768_v19  ;;  %6448 = vst [vmem:[#allocation64_spill] sm:$0xff] %v4794_v38 }
 0x3e9   :  { %v2819_v42 = vmax.f32 %v2818_v11, %v2687_v41  ;;  %v2384_v31 = vmul.f32 %v4771_v7, %v4374_v28  ;;  %v2392_v47 = vmul.f32 %v4771_v7, %v4378_v60  ;;  %v2400_v33 = vmul.f32 %v4771_v7, %v4382_v14 }
 0x3ea   :  { %v4785_v12 = vpop.f32.mrf.mxu2  ;;  %v2408_v56 = vmul.f32 %v4771_v7, %v4388_v9  ;;  %v2416_v41 = vmul.f32 %v4771_v7, %v4391_v26  ;;  %v4813_v11 = vperm.slane %v4684_v54, 3  ;;  %v2080_v28 = vadd.f32 %v2079_v10, %v1983_v59 }
 0x3eb   :  { %v2820_v43 = vmax.f32 %v2819_v42, %v2695_v5  ;;  %v4806_v35 = vpop.f32.mrf.mxu0  ;;  %v2505_v58 = vmul.f32 %v4783_v53, %v2360_v18  ;;  %v4818_v60 = vsub.f32 %v4296_v48, %v4581_v51  ;;  %v2513_v14 = vmul.f32 %v4783_v53, %v2368_v45 }
 0x3ec   :  { %v4804_v16 = vpop.f32.mrf.mxu1  ;;  %6450 = vst [vmem:[#allocation66_spill] sm:$0xff] %v4806_v35  ;;  %v2521_v22 = vmul.f32 %v4783_v53, %v2376_v50  ;;  %v1991_v9 = vmul.f32 %v4777_v52, %v4777_v52  ;;  %v2529_v26 = vmul.f32 %v4783_v53, %v2384_v31  ;;  %v4831_v48 = vsub.f32 %v4307_v27, %v4581_v51 }
 0x3ed   :  { %v4796_v20 = vmax.f32 %v2820_v43, %v2703_v34  ;;  %6449 = vst [vmem:[#allocation65_spill] sm:$0xff] %v4804_v16  ;;  %v2650_v42 = vadd.f32 %v4813_v11, %v2505_v58  ;;  %v2658_v24 = vadd.f32 %v4813_v11, %v2513_v14  ;;  %v1999_v43 = vmul.f32 %v4818_v60, %v4818_v60 }
 0x3ee   :  { %6451 = vst [vmem:[#allocation67_spill] sm:$0xff] %v4813_v11  ;;  %v3412_v5 = vpop.eup %3411  ;;  %v2081_v59 = vadd.f32 %v2080_v28, %v1991_v9  ;;  %v2537_v10 = vmul.f32 %v4783_v53, %v2392_v47  ;;  %v2666_v18 = vadd.f32 %v4813_v11, %v2521_v22  ;;  %v2545_v28 = vmul.f32 %v4783_v53, %v2400_v33 }
 0x3ef   :  { %6452 = vst [vmem:[#allocation68_spill] sm:$0xff] %v4818_v60  ;;  %v2854_v45 = vmax.f32 %v2650_v42, %v2658_v24  ;;  %v2224_v50 = vmul.f32 %v3412_v5, %v4768_v19  ;;  %v4843_v14 = vpop.f32.mrf.mxu3  ;;  %v2674_v27 = vadd.f32 %v4813_v11, %v2529_v26  ;;  %v4848_v47 = vsub.f32 %v4353_v17, %v4581_v51 }
 0x3f0   :  { %6453 = vst [vmem:[#allocation69_spill] sm:$0xff] %v4831_v48  ;;  %v2082_v40 = vadd.f32 %v2081_v59, %v1999_v43  ;;  %v2007_v22 = vmul.f32 %v4831_v48, %v4831_v48  ;;  %v2553_v42 = vmul.f32 %v4783_v53, %v2408_v56  ;;  %v2682_v24 = vadd.f32 %v4813_v11, %v2537_v10 }
 0x3f1   :  { %6456 = vst [vmem:[#allocation72_spill] sm:$0xff] %v4843_v14  ;;  %v2855_v9 = vmax.f32 %v2854_v45, %v2666_v18  ;;  %v2225_v1 = vmul.f32 %v3412_v5, %v2224_v50  ;;  %v2561_v52 = vmul.f32 %v4783_v53, %v2416_v41  ;;  %v2690_v26 = vadd.f32 %v4813_v11, %v2545_v28 }
 0x3f2   :  { %v4827_v34 = vpop.f32.mrf.mxu2  ;;  %6457 = vst [vmem:[#allocation73_spill] sm:$0xff] %v4848_v47  ;;  %vm2230_vm14 = vweird.f32 %v3412_v5  ;;  %v2083_v59 = vadd.f32 %v2082_v40, %v2007_v22  ;;  %v4860_v17 = vsub.f32 %v4435_v39, %v4581_v51  ;;  %v2015_v56 = vmul.f32 %v4848_v47, %v4848_v47 }
 0x3f3   :  { %v4840_v58 = vpop.f32.mrf.mxu0  ;;  %v2856_v60 = vmax.f32 %v2855_v9, %v2674_v27  ;;  %v2226_v33 = vmul.f32 0.5, %v2225_v1  ;;  %v2698_v10 = vadd.f32 %v4813_v11, %v2553_v42  ;;  %vm2229_vm15 = vweird.f32 %v4768_v19 }
 0x3f4   :  { %v4838_v31 = vpop.f32.mrf.mxu1  ;;  %6455 = vst [vmem:[#allocation71_spill] sm:$0xff] %v4840_v58  ;;  %vm2231_vm0 = vmor %vm2229_vm15, %vm2230_vm14  ;;  %v2706_v40 = vadd.f32 %v4813_v11, %v2561_v52  ;;  %v2084_v39 = vadd.f32 %v2083_v59, %v2015_v56  ;;  %v2023_v22 = vmul.f32 %v4860_v17, %v4860_v17 }
 0x3f5   :  { %6454 = vst [vmem:[#allocation70_spill] sm:$0xff] %v4838_v31  ;;  %v2857_v18 = vmax.f32 %v2856_v60, %v2682_v24  ;;  %v2227_v45 = vsub.f32 1.5, %v2226_v33 }
 0x3f6   :  { %6459 = vst [vmem:[#allocation75_spill] sm:$0xff] %v4860_v17 }
 0x3f7   :  { %v2858_v1 = vmax.f32 %v2857_v18, %v2690_v26  ;;  %v2228_v50 = vmul.f32 %v3412_v5, %v2227_v45  ;;  %v4873_v51 = vpop.f32.mrf.mxu3  ;;  %v2085_v18 = vadd.f32 %v2084_v39, %v2023_v22  ;;  %v4901_v45 = vperm.slane %v4684_v54, 1 }
 0x3f8   :  { %6462 = vst [vmem:[#allocation78_spill] sm:$0xff] %v4873_v51 }
 0x3f9   :  { %v2859_v28 = vmax.f32 %v2858_v1, %v2698_v10  ;;  %v4871_v27 = vsel %vm2231_vm0, %v3412_v5, %v2228_v50  ;;  %v4886_v5 = vperm.slane %v4665_v0, 1  ;;  %6464 = vst [vmem:[#allocation80_spill] sm:$0xff] %v4901_v45  ;;  %v2086_v10 = vrot.slane %v2085_v18, 4 }
 0x3fa   :  { %v4856_v43 = vpop.f32.mrf.mxu2  ;;  %v2358_v19 = vmul.f32 %v4871_v27, %v4562_v6  ;;  %v2366_v42 = vmul.f32 %v4871_v27, %v4570_v15  ;;  %v2374_v52 = vmul.f32 %v4871_v27, %v4576_v2  ;;  %v2382_v24 = vmul.f32 %v4871_v27, %v4589_v29 }
 0x3fb   :  { %6458 = vst [vmem:[#allocation74_spill] sm:$0xff] %v4856_v43  ;;  %v4868_v60 = vpop.f32.mrf.mxu0  ;;  %v4875_v9 = vmax.f32 %v2859_v28, %v2706_v40  ;;  %v2390_v33 = vmul.f32 %v4871_v27, %v4486_v4  ;;  %v2398_v26 = vmul.f32 %v4871_v27, %v4490_v49  ;;  %v2406_v15 = vmul.f32 %v4871_v27, %v4494_v44 }
 0x3fc   :  { %v4866_v41 = vpop.f32.mrf.mxu1  ;;  %6461 = vst [vmem:[#allocation77_spill] sm:$0xff] %v4868_v60  ;;  %v2414_v2 = vmul.f32 %v4871_v27, %v4504_v23  ;;  %v2503_v4 = vmul.f32 %v4886_v5, %v2358_v19  ;;  %v2511_v49 = vmul.f32 %v4886_v5, %v2366_v42  ;;  %v2519_v56 = vmul.f32 %v4886_v5, %v2374_v52 }
 0x3fd   :  { %6460 = vst [vmem:[#allocation76_spill] sm:$0xff] %v4866_v41  ;;  %v2527_v1 = vmul.f32 %v4886_v5, %v2382_v24  ;;  %v2535_v40 = vmul.f32 %v4886_v5, %v2390_v33  ;;  %v2087_v22 = vadd.f32 %v2086_v10, %v2085_v18  ;;  %v2543_v42 = vmul.f32 %v4886_v5, %v2398_v26 }
 0x3fe   :  { %v2648_v44 = vadd.f32 %v4901_v45, %v2503_v4  ;;  %v2656_v23 = vadd.f32 %v4901_v45, %v2511_v49  ;;  %v2664_v28 = vadd.f32 %v4901_v45, %v2519_v56  ;;  %v2551_v49 = vmul.f32 %v4886_v5, %v2406_v15 }
 0x3ff   :  { %v4913_v50 = vpop.f32.mrf.mxu3  ;;  %v2672_v52 = vadd.f32 %v4901_v45, %v2527_v1  ;;  %v2680_v17 = vadd.f32 %v4901_v45, %v2535_v40  ;;  %v2088_v47 = vrot.slane %v2087_v22, 2  ;;  %v2559_v56 = vmul.f32 %v4886_v5, %v2414_v2 }
 0x400   :  { %6467 = vst [vmem:[#allocation83_spill] sm:$0xff] %v4913_v50  ;;  %v2828_v39 = vmax.f32 %v2648_v44, %v2656_v23  ;;  %v2688_v18 = vadd.f32 %v4901_v45, %v2543_v42  ;;  %v2696_v26 = vadd.f32 %v4901_v45, %v2551_v49  ;;  %vm2967_vm0 = vcmask 1041409  }
 0x401   :  { %v2089_v1 = vadd.f32 %v2088_v47, %v2087_v22  ;;  %v1744_v47 = vadd.f32 %v4618_v32, %v4585_v55 }
 0x402   :  { %v4894_v6 = vpop.f32.mrf.mxu2  ;;  %v2829_v11 = vmax.f32 %v2828_v39, %v2664_v28  ;;  %v2704_v39 = vadd.f32 %v4901_v45, %v2559_v56  ;;  %v6475_v45 = vld [vmem:[#allocation58_spill] sm:$0xff] }
 0x403   :  { %6463 = vst [vmem:[#allocation79_spill] sm:$0xff] %v4894_v6  ;;  %v4905_v29 = vpop.f32.mrf.mxu0  ;;  %v2090_v2 = vrot.slane %v2089_v1, 1  ;;  %v1745_v56 = vadd.f32 %v1744_v47, %v4641_v3 }
 0x404   :  { %v4903_v59 = vpop.f32.mrf.mxu1  ;;  %6466 = vst [vmem:[#allocation82_spill] sm:$0xff] %v4905_v29  ;;  %v2830_v33 = vmax.f32 %v2829_v11, %v2672_v52 }
 0x405   :  { %6465 = vst [vmem:[#allocation81_spill] sm:$0xff] %v4903_v59  ;;  %v2091_v42 = vadd.f32 %v2090_v2, %v2089_v1  ;;  %v6473_v1 = vld [vmem:[#allocation49_spill] sm:$0xff] }
 0x406   :  { %v2831_v10 = vmax.f32 %v2830_v33, %v2680_v17  ;;  %v1681_v17 = vadd.f32 %v4616_v25, %v4583_v61 }
 0x407   :  { %v4932_v28 = vpop.f32.mrf.mxu3 }
 0x408   :  { %v2832_v44 = vmax.f32 %v2831_v10, %v2688_v18  ;;  %6470 = vst [vmem:[#allocation86_spill] sm:$0xff] %v4932_v28  ;;  %v1682_v22 = vadd.f32 %v1681_v17, %v4639_v13  ;;  %v2199_v18 = vmul.f32 %v2091_v42, %v3722_v36  ;;  %v6471_v10 = vld [vmem:[#allocation48_spill] sm:$0xff] }
 0x40a   :  { %v4917_v19 = vpop.f32.mrf.mxu2  ;;  %v2833_v15 = vmax.f32 %v2832_v44, %v2696_v26  ;;  %v1683_v26 = vadd.f32 %v1682_v22, %v6471_v10  ;;  %v4960_v55 = vadd.f32 1e-05, %v2199_v18 }
 0x40b   :  { %v4923_v4 = vpop.f32.mrf.mxu0 }
 0x40c   :  { %v4921_v24 = vpop.f32.mrf.mxu1  ;;  %6469 = vst [vmem:[#allocation85_spill] sm:$0xff] %v4923_v4  ;;  %v4939_v40 = vmax.f32 %v2833_v15, %v2704_v39  ;;  %v1746_v39 = vadd.f32 %v1745_v56, %v6473_v1  ;;  %v6474_v15 = vld [vmem:[#allocation57_spill] sm:$0xff]  ;;  %3413 = vrsqrt.f32 %v4960_v55  ;;  %v6479_v1 = vld [vmem:[#allocation47_spill] sm:$0xff]  ;;  %vm2239_vm2 = vweird.f32 %v4960_v55 }
 0x40d   :  { %6468 = vst [vmem:[#allocation84_spill] sm:$0xff] %v4921_v24  ;;  %v1684_v2 = vadd.f32 %v1683_v26, %v6474_v15 }
 0x40e   :  { %v1747_v32 = vadd.f32 %v1746_v39, %v6475_v45  ;;  %v6476_v39 = vld [vmem:[#allocation12_spill] sm:$0xff] }
 0x40f   :  { %v4955_v44 = vpop.f32.mrf.mxu3  ;;  %v1685_v17 = vadd.f32 %v1684_v2, %v4756_v57  ;;  %v6477_v2 = vld [vmem:[#allocation19_spill] sm:$0xff]  ;;  %v6483_v57 = vld [vmem:[#allocation44_spill] sm:$0xff] }
 0x410   :  { %6472 = vst [vmem:[#allocation87_spill] sm:$0xff] %v4955_v44  ;;  %v1748_v46 = vadd.f32 %v1747_v32, %v4758_v21  ;;  %v1702_v45 = vadd.f32 %v6477_v2, %v6476_v39  ;;  %v6484_v39 = vld [vmem:[#allocation55_spill] sm:$0xff] }
 0x411   :  { %v1686_v42 = vadd.f32 %v1685_v17, %v4804_v16 }
 0x412   :  { %v4930_v23 = vpop.f32.mrf.mxu2  ;;  %v1749_v56 = vadd.f32 %v1748_v46, %v4806_v35  ;;  %v1703_v3 = vadd.f32 %v1702_v45, %v6479_v1  ;;  %v4984_v35 = vpop.eup %3413  ;;  %v6485_v45 = vld [vmem:[#allocation24_spill] sm:$0xff] }
 0x413   :  { %v4937_v11 = vpop.f32.mrf.mxu0  ;;  %v1687_v26 = vadd.f32 %v1686_v42, %v4838_v31  ;;  %v6480_v42 = vld [vmem:[#allocation23_spill] sm:$0xff]  ;;  %v6481_v31 = vld [vmem:[#allocation50_spill] sm:$0xff]  ;;  %vm2240_vm1 = vweird.f32 %v4984_v35 }
 0x414   :  { %v4935_v48 = vpop.f32.mrf.mxu1  ;;  %v1750_v18 = vadd.f32 %v1749_v56, %v4840_v58  ;;  %v2293_v56 = vmul.f32 %v6481_v31, %v6480_v42  ;;  %v6482_v58 = vld [vmem:[#allocation13_spill] sm:$0xff]  ;;  %vm2241_vm3 = vmor %vm2239_vm2, %vm2240_vm1  ;;  %vm2969_vm1 = vcmask 1043459   ;;  %vm2971_vm2 = vcmask 1045509  }
 0x415   :  { %v1688_v32 = vadd.f32 %v1687_v26, %v4866_v41  ;;  %v1723_v2 = vadd.f32 %v6483_v57, %v6482_v58  ;;  %v1704_v26 = vadd.f32 %v1703_v3, %v6484_v39  ;;  %v6488_v3 = vld [vmem:[#allocation27_spill] sm:$0xff]  ;;  %v6489_v58 = vld [vmem:[#allocation53_spill] sm:$0xff] }
 0x416   :  { %v1751_v17 = vadd.f32 %v1750_v18, %v4868_v60 }
 0x417   :  { %v4978_v21 = vpop.f32.mrf.mxu3  ;;  %v1689_v16 = vadd.f32 %v1688_v32, %v4903_v59  ;;  %v2301_v32 = vmul.f32 %v6481_v31, %v6485_v45  ;;  %v1724_v39 = vadd.f32 %v1723_v2, %v6489_v58  ;;  %v6490_v45 = vld [vmem:[#allocation30_spill] sm:$0xff]  ;;  %v5020_v2 = vmul.f32 %v4687_v8, %v2293_v56 }
 0x418   :  { %6478 = vst [vmem:[#allocation88_spill] sm:$0xff] %v4978_v21  ;;  %v1752_v46 = vadd.f32 %v1751_v17, %v4905_v29  ;;  %v6486_v17 = vld [vmem:[#allocation25_spill] sm:$0xff]  ;;  %v6487_v29 = vld [vmem:[#allocation26_spill] sm:$0xff]  ;;  %v2333_v10 = vmul.f32 %v6481_v31, %v6490_v45 }
 0x419   :  { %v1690_v41 = vadd.f32 %v1689_v16, %v4921_v24  ;;  %v2309_v1 = vmul.f32 %v6481_v31, %v6486_v17  ;;  %v2317_v42 = vmul.f32 %v6481_v31, %v6487_v29  ;;  %v2325_v16 = vmul.f32 %v6481_v31, %v6488_v3  ;;  %v6491_v17 = vld [vmem:[#allocation31_spill] sm:$0xff]  ;;  %6493 = vst [vmem:[#allocation23_spill] sm:$0xff] %v5020_v2 }
 0x41a   :  { %v4943_v52 = vpop.f32.mrf.mxu2  ;;  %v1753_v60 = vadd.f32 %v1752_v46, %v4923_v4  ;;  %v1705_v24 = vadd.f32 %v1704_v26, %v4745_v37  ;;  %v2341_v54 = vmul.f32 %v6481_v31, %v6491_v17  ;;  %v2234_v29 = vmul.f32 %v4984_v35, %v4960_v55  ;;  %v6492_v4 = vld [vmem:[#allocation33_spill] sm:$0xff] }
 0x41b   :  { %v4950_v33 = vpop.f32.mrf.mxu0  ;;  %v1691_v59 = vadd.f32 %v1690_v41, %v4935_v48  ;;  %v2349_v3 = vmul.f32 %v6481_v31, %v6492_v4  ;;  %v5025_v45 = vmul.f32 %v4687_v8, %v2301_v32  ;;  %v5028_v17 = vmul.f32 %v4687_v8, %v2309_v1 }
 0x41c   :  { %v4948_v49 = vpop.f32.mrf.mxu1  ;;  %v1754_v46 = vadd.f32 %v1753_v60, %v4937_v11  ;;  %v1706_v26 = vadd.f32 %v1705_v24, %v4785_v12  ;;  %v5031_v58 = vmul.f32 %v4687_v8, %v2317_v42  ;;  %v5035_v31 = vmul.f32 %v4687_v8, %v2325_v16 }
 0x41d   :  { %v1692_v41 = vadd.f32 %v1691_v59, %v4948_v49  ;;  %6494 = vst [vmem:[#allocation50_spill] sm:$0xff] %v5025_v45  ;;  %v1725_v4 = vadd.f32 %v1724_v39, %v4742_v63  ;;  %v5043_v32 = vmul.f32 %v4687_v8, %v2333_v10  ;;  %v5046_v1 = vmul.f32 %v4687_v8, %v2341_v54  ;;  %v6507_v63 = vld [vmem:[#allocation36_spill] sm:$0xff] }
 0x41e   :  { %6495 = vst [vmem:[#allocation24_spill] sm:$0xff] %v5028_v17  ;;  %v1755_v60 = vadd.f32 %v1754_v46, %v4950_v33  ;;  %v1707_v24 = vadd.f32 %v1706_v26, %v4827_v34  ;;  %v2235_v42 = vmul.f32 %v4984_v35, %v2234_v29  ;;  %v5051_v16 = vmul.f32 %v4687_v8, %v2349_v3 }
 0x41f   :  { %6496 = vst [vmem:[#allocation25_spill] sm:$0xff] %v5031_v58  ;;  %v5039_v56 = vpop.f32.mrf.mxu3  ;;  %v1726_v39 = vadd.f32 %v1725_v4, %v4794_v38  ;;  %v2822_v4 = vrot.slane %v4796_v20, 4  ;;  %v6506_v38 = vld [vmem:[#allocation35_spill] sm:$0xff] }
 0x420   :  { %6497 = vst [vmem:[#allocation26_spill] sm:$0xff] %v5035_v31  ;;  %v1708_v26 = vadd.f32 %v1707_v24, %v4856_v43  ;;  %v6505_v24 = vld [vmem:[#allocation34_spill] sm:$0xff]  ;;  %v2236_v17 = vmul.f32 0.5, %v2235_v42 }
 0x421   :  { %6498 = vst [vmem:[#allocation27_spill] sm:$0xff] %v5039_v56  ;;  %v6509_v43 = vld [vmem:[#allocation38_spill] sm:$0xff] }
 0x422   :  { %v4964_v13 = vpop.f32.mrf.mxu2  ;;  %6499 = vst [vmem:[#allocation30_spill] sm:$0xff] %v5043_v32  ;;  %v6502_v32 = vld [vmem:[#allocation28_spill] sm:$0xff] }
 0x423   :  { %v4969_v22 = vpop.f32.mrf.mxu0  ;;  %6500 = vst [vmem:[#allocation31_spill] sm:$0xff] %v5046_v1  ;;  %v2296_v54 = vmul.f32 %v4771_v7, %v6502_v32  ;;  %v6503_v1 = vld [vmem:[#allocation29_spill] sm:$0xff]  ;;  %v2328_v32 = vmul.f32 %v4771_v7, %v6506_v38 }
 0x424   :  { %v4967_v47 = vpop.f32.mrf.mxu1  ;;  %v1756_v46 = vadd.f32 %v1755_v60, %v4969_v22  ;;  %6501 = vst [vmem:[#allocation33_spill] sm:$0xff] %v5051_v16  ;;  %v2304_v29 = vmul.f32 %v4771_v7, %v6503_v1  ;;  %v6504_v60 = vld [vmem:[#allocation32_spill] sm:$0xff]  ;;  %v1709_v16 = vadd.f32 %v1708_v26, %v4894_v6  ;;  %v2336_v1 = vmul.f32 %v4771_v7, %v6507_v63 }
 0x425   :  { %v1693_v59 = vadd.f32 %v1692_v41, %v4967_v47  ;;  %v2312_v8 = vmul.f32 %v4771_v7, %v6504_v60  ;;  %v6508_v60 = vld [vmem:[#allocation37_spill] sm:$0xff]  ;;  %v5085_v6 = vmul.f32 %v4783_v53, %v2296_v54  ;;  %v2237_v54 = vsub.f32 1.5, %v2236_v17 }
 0x426   :  { %v2344_v2 = vmul.f32 %v4771_v7, %v6508_v60  ;;  %v1710_v26 = vadd.f32 %v1709_v16, %v4917_v19  ;;  %v5088_v38 = vmul.f32 %v4783_v53, %v2304_v29  ;;  %v5101_v16 = vmul.f32 %v4783_v53, %v2328_v32 }
 0x427   :  { %v5091_v63 = vmul.f32 %v4783_v53, %v2312_v8  ;;  %v1727_v29 = vadd.f32 %v1726_v39, %v4843_v14  ;;  %v5105_v8 = vmul.f32 %v4783_v53, %v2336_v1  ;;  %v2861_v32 = vrot.slane %v4875_v9, 4 }
 0x428   :  { %6510 = vst [vmem:[#allocation28_spill] sm:$0xff] %v5088_v38  ;;  %v2835_v1 = vrot.slane %v4939_v40, 4 }
 0x429   :  { %6511 = vst [vmem:[#allocation29_spill] sm:$0xff] %v5091_v63  ;;  %v5108_v63 = vmul.f32 %v4783_v53, %v2344_v2  ;;  %v1728_v17 = vadd.f32 %v1727_v29, %v4873_v51  ;;  %v6535_v51 = vld [vmem:[#allocation51_spill] sm:$0xff] }
 0x42a   :  { %v5003_v57 = vpop.f32.mrf.mxu2  ;;  %6513 = vst [vmem:[#allocation34_spill] sm:$0xff] %v5101_v16 }
 0x42b   :  { %v4994_v18 = vpop.f32.mrf.mxu0  ;;  %6514 = vst [vmem:[#allocation35_spill] sm:$0xff] %v5105_v8 }
 0x42c   :  { %v4992_v15 = vpop.f32.mrf.mxu1  ;;  %v1757_v3 = vadd.f32 %v1756_v46, %v4994_v18  ;;  %6515 = vst [vmem:[#allocation36_spill] sm:$0xff] %v5108_v63 }
 0x42d   :  { %v1694_v31 = vadd.f32 %v1693_v59, %v4992_v15  ;;  %v2320_v59 = vmul.f32 %v4771_v7, %v6505_v24  ;;  %v2352_v24 = vmul.f32 %v4771_v7, %v6509_v43  ;;  %v1711_v7 = vadd.f32 %v1710_v26, %v4930_v23 }
 0x42f   :  { %v5097_v60 = vmul.f32 %v4783_v53, %v2320_v59 }
 0x432   :  { %v5076_v45 = vpop.f32.mrf.mxu2 }
 0x433   :  { %v5058_v10 = vpop.f32.mrf.mxu0 }
 0x434   :  { %v5056_v41 = vpop.f32.mrf.mxu1  ;;  %v1758_v46 = vadd.f32 %v1757_v3, %v5058_v10  ;;  %v5094_v3 = vmax.f32 %v4796_v20, %v2822_v4  ;;  %v1712_v20 = vadd.f32 %v1711_v7, %v4943_v52  ;;  %v5111_v4 = vpop.f32.mrf.mxu3  ;;  %v2238_v7 = vmul.f32 %v4984_v35, %v2237_v54 }
 0x435   :  { %v1695_v58 = vadd.f32 %v1694_v31, %v5056_v41  ;;  %6516 = vst [vmem:[#allocation37_spill] sm:$0xff] %v5111_v4 }
 0x436   :  { %v1759_v42 = vrot.slane %v1758_v46, 4  ;;  %6512 = vst [vmem:[#allocation32_spill] sm:$0xff] %v5094_v3  ;;  %v1713_v2 = vadd.f32 %v1712_v20, %v4964_v13  ;;  %v2862_v3 = vmax.f32 %v4875_v9, %v2861_v32  ;;  %v6520_v20 = vld [vmem:[#allocation15_spill] sm:$0xff]  ;;  %v6523_v9 = vld [vmem:[#allocation22_spill] sm:$0xff] }
 0x437   :  { %v1696_v31 = vrot.slane %v1695_v58, 4  ;;  %v2334_v32 = vmul.f32 %v4871_v27, %v6523_v9 }
 0x438   :  { %v1760_v38 = vadd.f32 %v1759_v42, %v1758_v46 }
 0x439   :  { %v1697_v43 = vadd.f32 %v1696_v31, %v1695_v58  ;;  %v5114_v58 = vmul.f32 %v4783_v53, %v2352_v24  ;;  %v6518_v31 = vld [vmem:[#allocation39_spill] sm:$0xff]  ;;  %v1729_v53 = vadd.f32 %v1728_v17, %v4913_v50  ;;  %v6519_v24 = vld [vmem:[#allocation40_spill] sm:$0xff]  ;;  %v6522_v17 = vld [vmem:[#allocation21_spill] sm:$0xff]  ;;  %v5148_v50 = vsel %vm2241_vm3, %v4984_v35, %v2238_v7 }
 0x43a   :  { %v1761_v39 = vrot.slane %v1760_v38, 2  ;;  %v2294_v42 = vmul.f32 %v4871_v27, %v6518_v31  ;;  %v2302_v29 = vmul.f32 %v4871_v27, %v6519_v24  ;;  %v5135_v54 = vpop.f32.mrf.mxu2  ;;  %v2326_v8 = vmul.f32 %v4871_v27, %v6522_v17 }
 0x43b   :  { %v1698_v59 = vrot.slane %v1697_v43, 2  ;;  %6517 = vst [vmem:[#allocation38_spill] sm:$0xff] %v5114_v58  ;;  %v1714_v58 = vadd.f32 %v1713_v2, %v5003_v57  ;;  %v2836_v24 = vmax.f32 %v4939_v40, %v2835_v1  ;;  %v6524_v2 = vld [vmem:[#allocation17_spill] sm:$0xff]  ;;  %v1730_v17 = vadd.f32 %v1729_v53, %v4932_v28 }
 0x43c   :  { %v1762_v63 = vadd.f32 %v1761_v39, %v1760_v38  ;;  %v5159_v9 = vmul.f32 %v4886_v5, %v2302_v29  ;;  %v2359_v7 = vmul.f32 %v5148_v50, %v4736_v62  ;;  %v5167_v53 = vperm.slane %v4665_v0, 2 }
 0x43d   :  { %v1699_v26 = vadd.f32 %v1698_v59, %v1697_v43  ;;  %v2310_v43 = vmul.f32 %v4871_v27, %v6520_v20  ;;  %v6521_v59 = vld [vmem:[#allocation20_spill] sm:$0xff]  ;;  %v1715_v38 = vadd.f32 %v1714_v58, %v5076_v45  ;;  %v2342_v20 = vmul.f32 %v4871_v27, %v6524_v2 }
 0x43e   :  { %v2318_v31 = vmul.f32 %v4871_v27, %v6521_v59  ;;  %v6525_v59 = vld [vmem:[#allocation8_spill] sm:$0xff]  ;;  %v1763_v1 = vrot.slane %v1762_v63, 1  ;;  %v2837_v35 = vrot.slane %v2836_v24, 2  ;;  %v2367_v29 = vmul.f32 %v5148_v50, %v4750_v30 }
 0x43f   :  { %v1700_v46 = vrot.slane %v1699_v26, 1  ;;  %v2350_v55 = vmul.f32 %v4871_v27, %v6525_v59  ;;  %v1716_v58 = vadd.f32 %v1715_v38, %v5135_v54  ;;  %v5162_v27 = vmul.f32 %v4886_v5, %v2310_v43  ;;  %v5170_v38 = vpop.f32.mrf.mxu3 }
 0x440   :  { %6526 = vst [vmem:[#allocation39_spill] sm:$0xff] %v5170_v38  ;;  %v5186_v2 = vmul.f32 %v4886_v5, %v2326_v8  ;;  %v5192_v28 = vmul.f32 %v4886_v5, %v2334_v32  ;;  %v5195_v30 = vmul.f32 %v4886_v5, %v2342_v20  ;;  %v2504_v8 = vmul.f32 %v5167_v53, %v2359_v7  ;;  %v6536_v32 = vld [vmem:[#allocation41_spill] sm:$0xff] }
 0x441   :  { %v1701_v39 = vadd.f32 %v1700_v46, %v1699_v26  ;;  %v2863_v46 = vrot.slane %v2862_v3, 2  ;;  %v5156_v26 = vmul.f32 %v4886_v5, %v2294_v42  ;;  %v5173_v42 = vmul.f32 %v4886_v5, %v2318_v31 }
 0x442   :  { %6529 = vst [vmem:[#allocation20_spill] sm:$0xff] %v5186_v2  ;;  %v5204_v0 = vperm.slane %v6535_v51, 2  ;;  %vm2973_vm3 = vcmask 1047559  }
 0x443   :  { %v5152_v40 = vmul.f32 %v1701_v39, %v3722_v36  ;;  %v1731_v39 = vadd.f32 %v1730_v17, %v4955_v44  ;;  %v1764_v17 = vadd.f32 %v1763_v1, %v1762_v63  ;;  %v1717_v44 = vrot.slane %v1716_v58, 4  ;;  %6531 = vst [vmem:[#allocation22_spill] sm:$0xff] %v5192_v28 }
 0x444   :  { %v5189_v31 = vmax.f32 %v2862_v3, %v2863_v46  ;;  %6532 = vst [vmem:[#allocation17_spill] sm:$0xff] %v5195_v30  ;;  %v2512_v3 = vmul.f32 %v5167_v53, %v2367_v29 }
 0x445   :  { %v5179_v43 = vsub.f32 %v4583_v61, %v5152_v40  ;;  %v5183_v62 = vsub.f32 %v4616_v25, %v5152_v40  ;;  %v1732_v59 = vadd.f32 %v1731_v39, %v4978_v21  ;;  %v5198_v61 = vmul.f32 %v4886_v5, %v2350_v55  ;;  %v6539_v39 = vld [vmem:[#allocation11_spill] sm:$0xff] }
 0x446   :  { %6530 = vst [vmem:[#allocation21_spill] sm:$0xff] %v5189_v31  ;;  %v5200_v25 = vmax.f32 %v2836_v24, %v2837_v35  ;;  %v5210_v1 = vsub.f32 %v6536_v32, %v5152_v40  ;;  %v6538_v24 = vld [vmem:[#allocation10_spill] sm:$0xff]  ;;  %v5222_v35 = vmul.f32 %v1764_v17, %v3722_v36  ;;  %v1718_v7 = vadd.f32 %v1717_v44, %v1716_v58  ;;  %v6545_v17 = vld [vmem:[#allocation69_spill] sm:$0xff] }
 0x447   :  { %6527 = vst [vmem:[#allocation40_spill] sm:$0xff] %v5179_v43  ;;  %v1733_v63 = vadd.f32 %v1732_v59, %v5039_v56  ;;  %v1905_v20 = vmul.f32 %v5179_v43, %v5179_v43  ;;  %v1913_v5 = vmul.f32 %v5183_v62, %v5183_v62  ;;  %v5218_v55 = vmul.f32 %v5148_v50, %v6538_v24  ;;  %v6540_v59 = vld [vmem:[#allocation62_spill] sm:$0xff]  ;;  %v6541_v43 = vld [vmem:[#allocation63_spill] sm:$0xff]  ;;  %v6544_v56 = vld [vmem:[#allocation68_spill] sm:$0xff] }
 0x448   :  { %6528 = vst [vmem:[#allocation15_spill] sm:$0xff] %v5183_v62  ;;  %v5226_v29 = vmul.f32 %v5148_v50, %v6539_v39  ;;  %v2375_v32 = vmul.f32 %v5148_v50, %v6540_v59  ;;  %v2383_v62 = vmul.f32 %v5148_v50, %v6541_v43  ;;  %v2399_v44 = vmul.f32 %v5148_v50, %v6545_v17  ;;  %v6546_v58 = vld [vmem:[#allocation73_spill] sm:$0xff]  ;;  %v5254_v17 = vpop.f32.mrf.mxu3 }
 0x449   :  { %6533 = vst [vmem:[#allocation8_spill] sm:$0xff] %v5198_v61  ;;  %v1734_v46 = vadd.f32 %v1733_v63, %v5111_v4  ;;  %v2391_v63 = vmul.f32 %v5148_v50, %v6544_v56  ;;  %v2407_v39 = vmul.f32 %v5148_v50, %v6546_v58  ;;  %v2649_v4 = vadd.f32 %v5204_v0, %v2504_v8  ;;  %v6547_v31 = vld [vmem:[#allocation57_spill] sm:$0xff]  ;;  %v6549_v61 = vld [vmem:[#allocation75_spill] sm:$0xff]  ;;  %v6553_v8 = vld [vmem:[#allocation14_spill] sm:$0xff] }
 0x44a   :  { %6534 = vst [vmem:[#allocation89_spill] sm:$0xff] %v5200_v25  ;;  %v6542_v25 = vld [vmem:[#allocation48_spill] sm:$0xff]  ;;  %v2657_v59 = vadd.f32 %v5204_v0, %v2512_v3  ;;  %v5246_v43 = vsub.f32 %v6547_v31, %v5152_v40  ;;  %v2113_v21 = vadd.f32 %v1913_v5, %v1905_v20  ;;  %v5252_v56 = vmul.f32 %v5148_v50, %v6549_v61  ;;  %v6551_v58 = vld [vmem:[#allocation9_spill] sm:$0xff] }
 0x44b   :  { %6537 = vst [vmem:[#allocation41_spill] sm:$0xff] %v5210_v1  ;;  %v5234_v24 = vsub.f32 %v6542_v25, %v5152_v40  ;;  %v1921_v25 = vmul.f32 %v5210_v1, %v5210_v1  ;;  %v5258_v30 = vsub.f32 %v6551_v58, %v5222_v35  ;;  %v5262_v3 = vsub.f32 %v6553_v8, %v5222_v35  ;;  %v6555_v1 = vld [vmem:[#allocation60_spill] sm:$0xff] }
 0x44c   :  { %6548 = vst [vmem:[#allocation11_spill] sm:$0xff] %v5246_v43  ;;  %v1719_v31 = vrot.slane %v1718_v7, 2  ;;  %v2520_v51 = vmul.f32 %v5167_v53, %v2375_v32  ;;  %v5267_v20 = vsub.f32 %v6555_v1, %v5152_v40  ;;  %v2528_v28 = vmul.f32 %v5167_v53, %v2383_v62  ;;  %v6557_v32 = vld [vmem:[#allocation65_spill] sm:$0xff] }
 0x44d   :  { %6543 = vst [vmem:[#allocation10_spill] sm:$0xff] %v5234_v24  ;;  %v1929_v61 = vmul.f32 %v5234_v24, %v5234_v24  ;;  %v2114_v5 = vadd.f32 %v2113_v21, %v1921_v25  ;;  %v2536_v58 = vmul.f32 %v5167_v53, %v2391_v63  ;;  %v5274_v16 = vmul.f32 %v5167_v53, %v2399_v44  ;;  %v6559_v21 = vld [vmem:[#allocation42_spill] sm:$0xff] }
 0x44e   :  { %6550 = vst [vmem:[#allocation62_spill] sm:$0xff] %v5254_v17  ;;  %v5277_v8 = vmul.f32 %v5167_v53, %v2407_v39  ;;  %v2841_v2 = vmax.f32 %v2649_v4, %v2657_v59  ;;  %v5281_v14 = vsub.f32 %v6557_v32, %v5152_v40  ;;  %v1937_v1 = vmul.f32 %v5246_v43, %v5246_v43  ;;  %v6561_v59 = vld [vmem:[#allocation70_spill] sm:$0xff] }
 0x44f   :  { %6552 = vst [vmem:[#allocation63_spill] sm:$0xff] %v5258_v30  ;;  %v2115_v24 = vadd.f32 %v2114_v5, %v1929_v61  ;;  %v5287_v62 = vsub.f32 %v6559_v21, %v5222_v35  ;;  %v1908_v63 = vmul.f32 %v5258_v30, %v5258_v30  ;;  %v1916_v44 = vmul.f32 %v5262_v3, %v5262_v3 }
 0x450   :  { %6554 = vst [vmem:[#allocation48_spill] sm:$0xff] %v5262_v3  ;;  %v1720_v39 = vadd.f32 %v1719_v31, %v1718_v7  ;;  %v2665_v4 = vadd.f32 %v5204_v0, %v2520_v51  ;;  %v5296_v25 = vsub.f32 %v6561_v59, %v5152_v40  ;;  %v1945_v61 = vmul.f32 %v5267_v20, %v5267_v20  ;;  %v6563_v7 = vld [vmem:[#allocation49_spill] sm:$0xff]  ;;  %v6565_v59 = vld [vmem:[#allocation76_spill] sm:$0xff] }
 0x451   :  { %6556 = vst [vmem:[#allocation68_spill] sm:$0xff] %v5267_v20  ;;  %v2116_v5 = vadd.f32 %v2115_v24, %v1937_v1  ;;  %v5301_v32 = vadd.f32 %v5204_v0, %v2528_v28  ;;  %v5304_v21 = vadd.f32 %v5204_v0, %v2536_v58  ;;  %v1735_v30 = vadd.f32 %v1734_v46, %v5170_v38  ;;  %v6566_v1 = vld [vmem:[#allocation58_spill] sm:$0xff]  ;;  %v6585_v38 = vld [vmem:[#allocation85_spill] sm:$0xff] }
 0x452   :  { %6558 = vst [vmem:[#allocation69_spill] sm:$0xff] %v5281_v14  ;;  %v5309_v31 = vsub.f32 %v6563_v7, %v5222_v35  ;;  %v5311_v51 = vmax.f32 %v2841_v2, %v2665_v4  ;;  %v5315_v3 = vsub.f32 %v6565_v59, %v5152_v40  ;;  %v1953_v24 = vmul.f32 %v5281_v14, %v5281_v14  ;;  %v6568_v4 = vld [vmem:[#allocation81_spill] sm:$0xff] }
 0x453   :  { %6560 = vst [vmem:[#allocation73_spill] sm:$0xff] %v5287_v62  ;;  %v2117_v28 = vadd.f32 %v2116_v5, %v1945_v61  ;;  %v5321_v58 = vsub.f32 %v6566_v1, %v5222_v35  ;;  %v1924_v46 = vmul.f32 %v5287_v62, %v5287_v62  ;;  %v2176_v20 = vadd.f32 %v1916_v44, %v1908_v63  ;;  %v6569_v61 = vld [vmem:[#allocation61_spill] sm:$0xff]  ;;  %v5338_v44 = vpop.f32.mrf.mxu3 }
 0x454   :  { %6562 = vst [vmem:[#allocation57_spill] sm:$0xff] %v5296_v25  ;;  %v1721_v7 = vrot.slane %v1720_v39, 1  ;;  %v1736_v2 = vadd.f32 %v1735_v30, %v5254_v17  ;;  %v5328_v43 = vsub.f32 %v6568_v4, %v5152_v40  ;;  %v1961_v59 = vmul.f32 %v5296_v25, %v5296_v25  ;;  %v6572_v4 = vld [vmem:[#allocation84_spill] sm:$0xff] }
 0x455   :  { %6564 = vst [vmem:[#allocation75_spill] sm:$0xff] %v5309_v31  ;;  %v2118_v14 = vadd.f32 %v2117_v28, %v1953_v24  ;;  %v5334_v5 = vsub.f32 %v6569_v61, %v5222_v35  ;;  %v1932_v1 = vmul.f32 %v5309_v31, %v5309_v31  ;;  %v2177_v62 = vadd.f32 %v2176_v20, %v1924_v46  ;;  %v6573_v61 = vld [vmem:[#allocation66_spill] sm:$0xff]  ;;  %v6579_v31 = vld [vmem:[#allocation12_spill] sm:$0xff] }
 0x456   :  { %6567 = vst [vmem:[#allocation9_spill] sm:$0xff] %v5321_v58  ;;  %v1722_v63 = vadd.f32 %v1721_v7, %v1720_v39  ;;  %v5344_v17 = vsub.f32 %v6572_v4, %v5152_v40  ;;  %v1969_v24 = vmul.f32 %v5315_v3, %v5315_v3  ;;  %v5350_v25 = vsub.f32 %v6573_v61, %v5222_v35  ;;  %v6575_v61 = vld [vmem:[#allocation71_spill] sm:$0xff] }
 0x457   :  { %6570 = vst [vmem:[#allocation14_spill] sm:$0xff] %v5334_v5  ;;  %v2119_v28 = vadd.f32 %v2118_v14, %v1961_v59  ;;  %v1940_v20 = vmul.f32 %v5321_v58, %v5321_v58  ;;  %v2178_v39 = vadd.f32 %v2177_v62, %v1932_v1  ;;  %v5359_v7 = vsub.f32 %v4935_v48, %v5152_v40 }
 0x458   :  { %6571 = vst [vmem:[#allocation60_spill] sm:$0xff] %v5338_v44  ;;  %v5355_v46 = vmul.f32 %v1722_v63, %v3722_v36  ;;  %v1977_v4 = vmul.f32 %v5328_v43, %v5328_v43  ;;  %v1737_v14 = vadd.f32 %v1736_v2, %v5338_v44  ;;  %v5366_v59 = vsub.f32 %v4948_v49, %v5152_v40 }
 0x459   :  { %6574 = vst [vmem:[#allocation65_spill] sm:$0xff] %v5350_v25  ;;  %v2120_v30 = vadd.f32 %v2119_v28, %v1969_v24  ;;  %v5370_v62 = vsub.f32 %v6575_v61, %v5222_v35  ;;  %v1948_v1 = vmul.f32 %v5334_v5, %v5334_v5  ;;  %v2179_v63 = vadd.f32 %v2178_v39, %v1940_v20  ;;  %v6577_v28 = vld [vmem:[#allocation77_spill] sm:$0xff]  ;;  %v6581_v20 = vld [vmem:[#allocation19_spill] sm:$0xff] }
 0x45a   :  { %v5376_v48 = vsub.f32 %v4967_v47, %v5152_v40  ;;  %v1985_v24 = vmul.f32 %v5344_v17, %v5344_v17  ;;  %v5382_v49 = vsub.f32 %v6577_v28, %v5222_v35  ;;  %v1956_v61 = vmul.f32 %v5350_v25, %v5350_v25 }
 0x45b   :  { %6576 = vst [vmem:[#allocation42_spill] sm:$0xff] %v5370_v62  ;;  %v2121_v2 = vadd.f32 %v2120_v30, %v1977_v4  ;;  %v2180_v58 = vadd.f32 %v2179_v63, %v1948_v1  ;;  %v5388_v5 = vsub.f32 %v6579_v31, %v5355_v46  ;;  %v5392_v47 = vsub.f32 %v6581_v20, %v5355_v46  ;;  %v6583_v31 = vld [vmem:[#allocation82_spill] sm:$0xff] }
 0x45c   :  { %6578 = vst [vmem:[#allocation70_spill] sm:$0xff] %v5382_v49  ;;  %v5396_v39 = vsub.f32 %v4992_v15, %v5152_v40  ;;  %v1993_v30 = vmul.f32 %v5359_v7, %v5359_v7  ;;  %v1738_v28 = vrot.slane %v1737_v14, 4  ;;  %v5402_v1 = vsub.f32 %v5056_v41, %v5152_v40 }
 0x45d   :  { %6580 = vst [vmem:[#allocation49_spill] sm:$0xff] %v5388_v5  ;;  %v2122_v4 = vadd.f32 %v2121_v2, %v1985_v24  ;;  %v5406_v63 = vsub.f32 %v6583_v31, %v5222_v35  ;;  %v1964_v20 = vmul.f32 %v5370_v62, %v5370_v62  ;;  %v2181_v25 = vadd.f32 %v2180_v58, %v1956_v61  ;;  %v6586_v2 = vld [vmem:[#allocation47_spill] sm:$0xff] }
 0x45e   :  { %6582 = vst [vmem:[#allocation76_spill] sm:$0xff] %v5392_v47  ;;  %v2001_v15 = vmul.f32 %v5366_v59, %v5366_v59  ;;  %v5414_v24 = vsub.f32 %v6585_v38, %v5222_v35  ;;  %v1972_v41 = vmul.f32 %v5382_v49, %v5382_v49  ;;  %v5420_v31 = vsub.f32 %v6586_v2, %v5355_v46 }
 0x45f   :  { %6584 = vst [vmem:[#allocation58_spill] sm:$0xff] %v5406_v63  ;;  %v2123_v44 = vadd.f32 %v2122_v4, %v1993_v30  ;;  %v2182_v40 = vadd.f32 %v2181_v25, %v1964_v20  ;;  %v1906_v62 = vmul.f32 %v5388_v5, %v5388_v5  ;;  %v1914_v58 = vmul.f32 %v5392_v47, %v5392_v47  ;;  %v6588_v5 = vld [vmem:[#allocation55_spill] sm:$0xff] }
 0x460   :  { %6587 = vst [vmem:[#allocation81_spill] sm:$0xff] %v5420_v31  ;;  %v2009_v61 = vmul.f32 %v5376_v48, %v5376_v48  ;;  %v5430_v38 = vsub.f32 %v4937_v11, %v5222_v35  ;;  %v1739_v4 = vadd.f32 %v1738_v28, %v1737_v14  ;;  %v2017_v25 = vmul.f32 %v5396_v39, %v5396_v39 }
 0x461   :  { %v2124_v30 = vadd.f32 %v2123_v44, %v2001_v15  ;;  %v1980_v20 = vmul.f32 %v5406_v63, %v5406_v63  ;;  %v2183_v2 = vadd.f32 %v2182_v40, %v1972_v41  ;;  %v5438_v49 = vsub.f32 %v6588_v5, %v5355_v46 }
 0x462   :  { %v2025_v47 = vmul.f32 %v5402_v1, %v5402_v1  ;;  %v5444_v11 = vsub.f32 %v4950_v33, %v5222_v35  ;;  %v1988_v14 = vmul.f32 %v5414_v24, %v5414_v24  ;;  %v5450_v15 = vsub.f32 %v4745_v37, %v5355_v46 }
 0x463   :  { %6589 = vst [vmem:[#allocation61_spill] sm:$0xff] %v5438_v49  ;;  %v2125_v44 = vadd.f32 %v2124_v30, %v2009_v61  ;;  %v2184_v28 = vadd.f32 %v2183_v2, %v1980_v20  ;;  %v1922_v5 = vmul.f32 %v5420_v31, %v5420_v31  ;;  %v2134_v41 = vadd.f32 %v1914_v58, %v1906_v62 }
 0x464   :  { %6590 = vst [vmem:[#allocation84_spill] sm:$0xff] %v5450_v15  ;;  %v5456_v61 = vsub.f32 %v4969_v22, %v5222_v35  ;;  %v1996_v33 = vmul.f32 %v5430_v38, %v5430_v38  ;;  %v1740_v30 = vrot.slane %v1739_v4, 2  ;;  %v5462_v20 = vsub.f32 %v4785_v12, %v5355_v46 }
 0x465   :  { %v2126_v40 = vadd.f32 %v2125_v44, %v2017_v25  ;;  %v2185_v63 = vadd.f32 %v2184_v28, %v1988_v14  ;;  %v1930_v37 = vmul.f32 %v5438_v49, %v5438_v49  ;;  %v2135_v2 = vadd.f32 %v2134_v41, %v1922_v5 }
 0x466   :  { %6591 = vst [vmem:[#allocation66_spill] sm:$0xff] %v5462_v20  ;;  %v5468_v62 = vsub.f32 %v4994_v18, %v5222_v35  ;;  %v2004_v22 = vmul.f32 %v5444_v11, %v5444_v11  ;;  %v1741_v58 = vadd.f32 %v1740_v30, %v1739_v4  ;;  %v5474_v44 = vsub.f32 %v4827_v34, %v5355_v46  ;;  %v6595_v34 = vld [vmem:[#allocation74_spill] sm:$0xff]  ;;  %v6597_v30 = vld [vmem:[#allocation79_spill] sm:$0xff] }
 0x467   :  { %v2127_v31 = vadd.f32 %v2126_v40, %v2025_v47  ;;  %v2186_v25 = vadd.f32 %v2185_v63, %v1996_v33  ;;  %v1938_v12 = vmul.f32 %v5450_v15, %v5450_v15  ;;  %v2136_v14 = vadd.f32 %v2135_v2, %v1930_v37 }
 0x468   :  { %6592 = vst [vmem:[#allocation71_spill] sm:$0xff] %v5474_v44  ;;  %v6593_v47 = vmax.f32 %v5311_v51, %v5301_v32  ;;  %v5484_v5 = vsub.f32 %v5058_v10, %v5222_v35  ;;  %v2012_v63 = vmul.f32 %v5456_v61, %v5456_v61  ;;  %v5490_v41 = vsub.f32 %v6595_v34, %v5355_v46 }
 0x469   :  { %v2128_v18 = vrot.slane %v2127_v31, 4  ;;  %v2187_v4 = vadd.f32 %v2186_v25, %v2004_v22  ;;  %v1946_v40 = vmul.f32 %v5462_v20, %v5462_v20  ;;  %v2137_v33 = vadd.f32 %v2136_v14, %v1938_v12  ;;  %v6598_v25 = vld [vmem:[#allocation16_spill] sm:$0xff] }
 0x46a   :  { %v2844_v28 = vmax.f32 %v6593_v47, %v5304_v21  ;;  %6594 = vst [vmem:[#allocation77_spill] sm:$0xff] %v5484_v5  ;;  %v2689_v32 = vadd.f32 %v5204_v0, %v5274_v16  ;;  %v2020_v10 = vmul.f32 %v5468_v62, %v5468_v62  ;;  %v1742_v35 = vrot.slane %v1741_v58, 1 }
 0x46b   :  { %6596 = vst [vmem:[#allocation12_spill] sm:$0xff] %v5490_v41  ;;  %v2129_v21 = vadd.f32 %v2128_v18, %v2127_v31  ;;  %v2188_v51 = vadd.f32 %v2187_v4, %v2012_v63  ;;  %v5500_v37 = vsub.f32 %v6597_v30, %v5355_v46  ;;  %v1954_v2 = vmul.f32 %v5474_v44, %v5474_v44  ;;  %v6599_v30 = vld [vmem:[#allocation18_spill] sm:$0xff] }
 0x46c   :  { %v2138_v22 = vadd.f32 %v2137_v33, %v1946_v40  ;;  %v2311_v12 = vmul.f32 %v5148_v50, %v6598_v25  ;;  %v2845_v14 = vmax.f32 %v2844_v28, %v2689_v32  ;;  %v2028_v16 = vmul.f32 %v5484_v5, %v5484_v5  ;;  %v6615_v44 = vld [vmem:[#allocation50_spill] sm:$0xff] }
 0x46d   :  { %v2130_v47 = vrot.slane %v2129_v21, 2  ;;  %v2189_v31 = vadd.f32 %v2188_v51, %v2020_v10  ;;  %v5510_v18 = vsub.f32 %v4917_v19, %v5355_v46  ;;  %v1962_v63 = vmul.f32 %v5490_v41, %v5490_v41 }
 0x46e   :  { %v2139_v4 = vadd.f32 %v2138_v22, %v1954_v2  ;;  %v2560_v34 = vmul.f32 %v5167_v53, %v5252_v56  ;;  %v2697_v40 = vadd.f32 %v5204_v0, %v5277_v8  ;;  %v1743_v33 = vadd.f32 %v1742_v35, %v1741_v58  ;;  %v6600_v22 = vld [vmem:[#allocation43_spill] sm:$0xff]  ;;  %v6601_v35 = vld [vmem:[#allocation45_spill] sm:$0xff] }
 0x46f   :  { %v2131_v28 = vadd.f32 %v2130_v47, %v2129_v21  ;;  %v2190_v32 = vadd.f32 %v2189_v31, %v2028_v16  ;;  %v5520_v10 = vsub.f32 %v4930_v23, %v5355_v46  ;;  %v1970_v19 = vmul.f32 %v5500_v37, %v5500_v37 }
 0x470   :  { %v2140_v51 = vadd.f32 %v2139_v4, %v1962_v63  ;;  %v2319_v2 = vmul.f32 %v5148_v50, %v6599_v30  ;;  %v2327_v56 = vmul.f32 %v5148_v50, %v6600_v22  ;;  %v2846_v25 = vmax.f32 %v2845_v14, %v2697_v40  ;;  %v6603_v30 = vld [vmem:[#allocation52_spill] sm:$0xff] }
 0x471   :  { %v2132_v41 = vrot.slane %v2131_v28, 1  ;;  %v2191_v8 = vrot.slane %v2190_v32, 4  ;;  %v5530_v58 = vsub.f32 %v4943_v52, %v5355_v46  ;;  %v1978_v23 = vmul.f32 %v5510_v18, %v5510_v18 }
 0x472   :  { %v2141_v21 = vadd.f32 %v2140_v51, %v1970_v19  ;;  %v2335_v47 = vmul.f32 %v5148_v50, %v6601_v35  ;;  %v2705_v16 = vadd.f32 %v5204_v0, %v2560_v34  ;;  %v5538_v63 = vmul.f32 %v1743_v33, %v3722_v36  ;;  %v6604_v51 = vld [vmem:[#allocation56_spill] sm:$0xff] }
 0x473   :  { %v2133_v31 = vadd.f32 %v2132_v41, %v2131_v28  ;;  %v2192_v14 = vadd.f32 %v2191_v8, %v2190_v32  ;;  %v5542_v4 = vsub.f32 %v4964_v13, %v5355_v46  ;;  %v1986_v52 = vmul.f32 %v5520_v10, %v5520_v10 }
 0x474   :  { %v2142_v40 = vadd.f32 %v2141_v21, %v1978_v23  ;;  %v2343_v19 = vmul.f32 %v5148_v50, %v6603_v30  ;;  %v2351_v22 = vmul.f32 %v5148_v50, %v6604_v51  ;;  %v2847_v34 = vmax.f32 %v2846_v25, %v2705_v16  ;;  %v6606_v21 = vld [vmem:[#allocation13_spill] sm:$0xff]  ;;  %v6608_v25 = vld [vmem:[#allocation44_spill] sm:$0xff] }
 0x475   :  { %6602 = vst [vmem:[#allocation19_spill] sm:$0xff] %v5542_v4  ;;  %v2201_v41 = vmul.f32 %v2133_v31, %v3722_v36  ;;  %v2193_v28 = vrot.slane %v2192_v14, 2  ;;  %v5553_v33 = vsub.f32 %v5003_v57, %v5355_v46  ;;  %v1994_v13 = vmul.f32 %v5530_v58, %v5530_v58 }
 0x476   :  { %v2143_v32 = vadd.f32 %v2142_v40, %v1986_v52  ;;  %v2440_v8 = vmul.f32 %v5167_v53, %v5218_v55  ;;  %v5563_v50 = vsub.f32 %v6606_v21, %v5538_v63  ;;  %v5567_v35 = vsub.f32 %v6608_v25, %v5538_v63 }
 0x477   :  { %6605 = vst [vmem:[#allocation82_spill] sm:$0xff] %v5553_v33  ;;  %v5559_v23 = vadd.f32 1e-05, %v2201_v41  ;;  %v2194_v16 = vadd.f32 %v2193_v28, %v2192_v14  ;;  %v5571_v57 = vsub.f32 %v5076_v45, %v5355_v46  ;;  %v2002_v31 = vmul.f32 %v5542_v4, %v5542_v4  ;;  %v6612_v41 = vld [vmem:[#allocation23_spill] sm:$0xff]  ;;  %v6613_v28 = vld [vmem:[#allocation54_spill] sm:$0xff] }
 0x478   :  { %6607 = vst [vmem:[#allocation85_spill] sm:$0xff] %v5563_v50  ;;  %v2144_v52 = vadd.f32 %v2143_v32, %v1994_v13  ;;  %v2448_v55 = vmul.f32 %v5167_v53, %v5226_v29  ;;  %v2456_v40 = vmul.f32 %v5167_v53, %v2311_v12  ;;  %v2848_v30 = vrot.slane %v2847_v34, 4  ;;  %v6614_v32 = vld [vmem:[#allocation80_spill] sm:$0xff] }
 0x479   :  { %6609 = vst [vmem:[#allocation47_spill] sm:$0xff] %v5567_v35  ;;  %3415 = vrsqrt.f32 %v5559_v23  ;;  %v5581_v51 = vsub.f32 %v5135_v54, %v5355_v46  ;;  %v2010_v45 = vmul.f32 %v5553_v33, %v5553_v33  ;;  %v2583_v21 = vadd.f32 %v6613_v28, %v6612_v41  ;;  %v6618_v33 = vld [vmem:[#allocation67_spill] sm:$0xff] }
 0x47a   :  { %6610 = vst [vmem:[#allocation55_spill] sm:$0xff] %v5571_v57  ;;  %v2145_v14 = vadd.f32 %v2144_v52, %v2002_v31  ;;  %v2195_v13 = vrot.slane %v2194_v16, 1  ;;  %v1907_v29 = vmul.f32 %v5563_v50, %v5563_v50  ;;  %v1915_v12 = vmul.f32 %v5567_v35, %v5567_v35 }
 0x47b   :  { %6611 = vst [vmem:[#allocation74_spill] sm:$0xff] %v5581_v51  ;;  %v2584_v25 = vadd.f32 %v6614_v32, %v5156_v26  ;;  %v2018_v54 = vmul.f32 %v5571_v57, %v5571_v57  ;;  %v2591_v31 = vadd.f32 %v6613_v28, %v6615_v44  ;;  %v2592_v52 = vadd.f32 %v6614_v32, %v5159_v9 }
 0x47c   :  { %v2146_v46 = vadd.f32 %v2145_v14, %v2010_v45  ;;  %v2464_v41 = vmul.f32 %v5167_v53, %v2319_v2  ;;  %v2472_v50 = vmul.f32 %v5167_v53, %v2327_v56  ;;  %v5602_v20 = vmul.f32 %v5167_v53, %v2335_v47  ;;  %v6616_v14 = vld [vmem:[#allocation53_spill] sm:$0xff] }
 0x47d   :  { %v5605_v35 = vmul.f32 %v5167_v53, %v2343_v19  ;;  %v5608_v26 = vmul.f32 %v5167_v53, %v2351_v22  ;;  %v2026_v45 = vmul.f32 %v5581_v51, %v5581_v51  ;;  %v5614_v9 = vsub.f32 %v6616_v14, %v5538_v63 }
 0x47e   :  { %v2147_v44 = vadd.f32 %v2146_v46, %v2018_v54  ;;  %v5616_v15 = vmax.f32 %v2847_v34, %v2848_v30  ;;  %v2196_v56 = vadd.f32 %v2195_v13, %v2194_v16  ;;  %v2155_v47 = vadd.f32 %v1915_v12, %v1907_v29  ;;  %v6619_v46 = vld [vmem:[#allocation24_spill] sm:$0xff] }
 0x47f   :  { %6617 = vst [vmem:[#allocation79_spill] sm:$0xff] %v5614_v9  ;;  %v3416_v2 = vpop.eup %3415  ;;  %v2585_v49 = vadd.f32 %v5204_v0, %v2440_v8  ;;  %v2711_v53 = vmax.f32 %v2583_v21, %v2591_v31  ;;  %v2724_v22 = vmax.f32 %v2584_v25, %v2592_v52  ;;  %v5622_v51 = vadd.f32 %v6618_v33, %v5085_v6  ;;  %v6620_v8 = vld [vmem:[#allocation59_spill] sm:$0xff]  ;;  %v6622_v29 = vld [vmem:[#allocation28_spill] sm:$0xff]  ;;  %v6623_v25 = vld [vmem:[#allocation29_spill] sm:$0xff] }
 0x480   :  { %v2254_v19 = vmul.f32 %v3416_v2, %v5559_v23  ;;  %v2148_v57 = vadd.f32 %v2147_v44, %v2026_v45  ;;  %v2593_v54 = vadd.f32 %v5204_v0, %v2448_v55  ;;  %v2599_v14 = vadd.f32 %v6613_v28, %v6619_v46 }
 0x481   :  { %v2600_v34 = vadd.f32 %v6614_v32, %v5162_v27  ;;  %v5631_v13 = vsub.f32 %v6620_v8, %v5538_v63  ;;  %v1923_v21 = vmul.f32 %v5614_v9, %v5614_v9  ;;  %v2204_v6 = vmul.f32 %v2196_v56, %v3722_v36  ;;  %v6626_v8 = vld [vmem:[#allocation25_spill] sm:$0xff] }
 0x482   :  { %v2255_v16 = vmul.f32 %v3416_v2, %v2254_v19  ;;  %v2149_v30 = vrot.slane %v2148_v57, 4  ;;  %v5638_v55 = vadd.f32 %v6618_v33, %v6622_v29  ;;  %v2601_v12 = vadd.f32 %v5204_v0, %v2456_v40  ;;  %v6624_v19 = vld [vmem:[#allocation64_spill] sm:$0xff] }
 0x483   :  { %6621 = vst [vmem:[#allocation16_spill] sm:$0xff] %v5631_v13  ;;  %v5643_v27 = vadd.f32 %v6618_v33, %v6623_v25  ;;  %v2156_v52 = vadd.f32 %v2155_v47, %v1923_v21  ;;  %v2712_v45 = vmax.f32 %v2711_v53, %v2599_v14  ;;  %v2725_v44 = vmax.f32 %v2724_v22, %v2600_v34  ;;  %v6627_v14 = vld [vmem:[#allocation26_spill] sm:$0xff] }
 0x484   :  { %v2256_v31 = vmul.f32 0.5, %v2255_v16  ;;  %v5647_v46 = vsub.f32 %v6624_v19, %v5538_v63  ;;  %v2607_v56 = vadd.f32 %v6613_v28, %v6626_v8  ;;  %v2608_v29 = vadd.f32 %v6614_v32, %v5173_v42  ;;  %v6631_v19 = vld [vmem:[#allocation34_spill] sm:$0xff] }
 0x485   :  { %v5654_v40 = vadd.f32 %v5204_v0, %v2464_v41  ;;  %vm2260_vm4 = vweird.f32 %v3416_v2  ;;  %v2150_v25 = vadd.f32 %v2149_v30, %v2148_v57  ;;  %v1931_v47 = vmul.f32 %v5631_v13, %v5631_v13  ;;  %v6628_v57 = vld [vmem:[#allocation72_spill] sm:$0xff] }
 0x486   :  { %6625 = vst [vmem:[#allocation18_spill] sm:$0xff] %v5647_v46  ;;  %v2257_v9 = vsub.f32 1.5, %v2256_v31  ;;  %vm2259_vm5 = vweird.f32 %v5559_v23  ;;  %v5659_v53 = vadd.f32 1e-05, %v2204_v6  ;;  %v5663_v22 = vadd.f32 %v6618_v33, %v5097_v60  ;;  %v6630_v31 = vld [vmem:[#allocation20_spill] sm:$0xff] }
 0x487   :  { %v2615_v42 = vadd.f32 %v6613_v28, %v6627_v14  ;;  %v2157_v41 = vadd.f32 %v2156_v52, %v1931_v47  ;;  %v2713_v16 = vmax.f32 %v2712_v45, %v2607_v56  ;;  %v2726_v21 = vmax.f32 %v2725_v44, %v2608_v29  ;;  %vm2261_vm6 = vmor %vm2259_vm5, %vm2260_vm4  ;;  %v6632_v44 = vld [vmem:[#allocation46_spill] sm:$0xff] }
 0x488   :  { %v2258_v34 = vmul.f32 %v3416_v2, %v2257_v9  ;;  %v5669_v30 = vsub.f32 %v6628_v57, %v5538_v63  ;;  %v2616_v23 = vadd.f32 %v6614_v32, %v6630_v31  ;;  %v2617_v6 = vadd.f32 %v5204_v0, %v2472_v50  ;;  %v6633_v29 = vld [vmem:[#allocation30_spill] sm:$0xff]  ;;  %v6635_v57 = vld [vmem:[#allocation31_spill] sm:$0xff] }
 0x489   :  { %v5676_v60 = vadd.f32 %v6618_v33, %v6631_v19  ;;  %v2151_v9 = vrot.slane %v2150_v25, 2  ;;  %v1939_v52 = vmul.f32 %v5647_v46, %v5647_v46  ;;  %v2737_v45 = vmax.f32 %v2585_v49, %v2593_v54  ;;  %v6634_v14 = vld [vmem:[#allocation22_spill] sm:$0xff] }
 0x48a   :  { %6629 = vst [vmem:[#allocation43_spill] sm:$0xff] %v5669_v30  ;;  %v5678_v8 = vsel %vm2261_vm6, %v3416_v2, %v2258_v34  ;;  %v5683_v56 = vperm.slane %v6632_v44, 4  ;;  %v2623_v47 = vadd.f32 %v6613_v28, %v6633_v29  ;;  %v2624_v50 = vadd.f32 %v6614_v32, %v6634_v14 }
 0x48b   :  { %v2631_v31 = vadd.f32 %v6613_v28, %v6635_v57  ;;  %3417 = vrsqrt.f32 %v5659_v53  ;;  %v2158_v2 = vadd.f32 %v2157_v41, %v1939_v52  ;;  %v2714_v34 = vmax.f32 %v2713_v16, %v2615_v42  ;;  %v6636_v57 = vld [vmem:[#allocation78_spill] sm:$0xff]  ;;  %v6637_v16 = vld [vmem:[#allocation51_spill] sm:$0xff] }
 0x48c   :  { %v2727_v19 = vmax.f32 %v2726_v21, %v2616_v23  ;;  %v2361_v49 = vmul.f32 %v5678_v8, %v5315_v3  ;;  %v2369_v54 = vmul.f32 %v5678_v8, %v5328_v43  ;;  %v2377_v29 = vmul.f32 %v5678_v8, %v5344_v17  ;;  %v6638_v43 = vld [vmem:[#allocation83_spill] sm:$0xff]  ;;  %v6639_v17 = vld [vmem:[#allocation17_spill] sm:$0xff] }
 0x48d   :  { %v2385_v14 = vmul.f32 %v5678_v8, %v5359_v7  ;;  %v2152_v46 = vadd.f32 %v2151_v9, %v2150_v25  ;;  %v5702_v13 = vsub.f32 %v6636_v57, %v5538_v63  ;;  %v1947_v42 = vmul.f32 %v5669_v30, %v5669_v30  ;;  %v6640_v7 = vld [vmem:[#allocation33_spill] sm:$0xff] }
 0x48e   :  { %v2738_v41 = vmax.f32 %v2737_v45, %v2601_v12  ;;  %v5707_v3 = vperm.slane %v6637_v16, 4  ;;  %v5711_v21 = vsub.f32 %v6638_v43, %v5538_v63  ;;  %v2632_v23 = vadd.f32 %v6614_v32, %v6639_v17 }
 0x48f   :  { %v2639_v25 = vadd.f32 %v6613_v28, %v6640_v7  ;;  %v2159_v9 = vadd.f32 %v2158_v2, %v1947_v42  ;;  %v2715_v52 = vmax.f32 %v2714_v34, %v2623_v47  ;;  %v2728_v57 = vmax.f32 %v2727_v19, %v2624_v50  ;;  %v6641_v28 = vld [vmem:[#allocation86_spill] sm:$0xff] }
 0x490   :  { %v2750_v30 = vmax.f32 %v5622_v51, %v5638_v55  ;;  %v2393_v12 = vmul.f32 %v5678_v8, %v5366_v59  ;;  %v2506_v45 = vmul.f32 %v5683_v56, %v2361_v49  ;;  %v2514_v43 = vmul.f32 %v5683_v56, %v2369_v54 }
 0x491   :  { %v2522_v4 = vmul.f32 %v5683_v56, %v2377_v29  ;;  %v5724_v5 = vpop.eup %3417  ;;  %v2153_v17 = vrot.slane %v2152_v46, 1  ;;  %v5728_v2 = vsub.f32 %v6641_v28, %v5538_v63  ;;  %v1955_v47 = vmul.f32 %v5702_v13, %v5702_v13 }
 0x492   :  { %v2739_v51 = vmax.f32 %v2738_v41, %v5654_v40  ;;  %v2401_v59 = vmul.f32 %v5678_v8, %v5376_v48  ;;  %v2530_v55 = vmul.f32 %v5683_v56, %v2385_v14  ;;  %v2651_v50 = vadd.f32 %v5707_v3, %v2506_v45 }
 0x493   :  { %v2659_v34 = vadd.f32 %v5707_v3, %v2514_v43  ;;  %v2160_v19 = vadd.f32 %v2159_v9, %v1955_v47  ;;  %v2716_v49 = vmax.f32 %v2715_v52, %v2631_v31  ;;  %v2729_v54 = vmax.f32 %v2728_v57, %v2632_v23  ;;  %v6642_v23 = vld [vmem:[#allocation8_spill] sm:$0xff] }
 0x494   :  { %v2751_v29 = vmax.f32 %v2750_v30, %v5643_v27  ;;  %v2409_v42 = vmul.f32 %v5678_v8, %v5396_v39  ;;  %v2538_v7 = vmul.f32 %v5683_v56, %v2393_v12  ;;  %v2667_v40 = vadd.f32 %v5707_v3, %v2522_v4 }
 0x495   :  { %v2867_v41 = vmax.f32 %v2651_v50, %v2659_v34  ;;  %v2417_v48 = vmul.f32 %v5678_v8, %v5402_v1  ;;  %v2284_v14 = vmul.f32 %v5724_v5, %v5659_v53  ;;  %v1963_v31 = vmul.f32 %v5711_v21, %v5711_v21 }
 0x496   :  { %v2640_v27 = vadd.f32 %v6614_v32, %v6642_v23  ;;  %v2546_v30 = vmul.f32 %v5683_v56, %v2401_v59  ;;  %v2675_v39 = vadd.f32 %v5707_v3, %v2530_v55  ;;  %v2154_v52 = vadd.f32 %v2153_v17, %v2152_v46  ;;  %v6643_v32 = vld [vmem:[#allocation87_spill] sm:$0xff] }
 0x497   :  { %v2868_v9 = vmax.f32 %v2867_v41, %v2667_v40  ;;  %v2161_v4 = vadd.f32 %v2160_v19, %v1963_v31  ;;  %v2717_v57 = vmax.f32 %v2716_v49, %v2639_v25  ;;  %v2740_v12 = vmax.f32 %v2739_v51, %v2617_v6 }
 0x498   :  { %v2752_v1 = vmax.f32 %v2751_v29, %v5663_v22  ;;  %v2554_v45 = vmul.f32 %v5683_v56, %v2409_v42  ;;  %v2683_v43 = vadd.f32 %v5707_v3, %v2538_v7  ;;  %v2730_v47 = vmax.f32 %v2729_v54, %v2640_v27 }
 0x499   :  { %v2869_v28 = vmax.f32 %v2868_v9, %v2675_v39  ;;  %v2562_v50 = vmul.f32 %v5683_v56, %v2417_v48  ;;  %v5759_v59 = vsub.f32 %v6643_v32, %v5538_v63  ;;  %v1971_v46 = vmul.f32 %v5728_v2, %v5728_v2  ;;  %v6645_v48 = vld [vmem:[#allocation35_spill] sm:$0xff]  ;;  %v6646_v39 = vld [vmem:[#allocation32_spill] sm:$0xff] }
 0x49a   :  { %v2625_v6 = vadd.f32 %v5204_v0, %v5602_v20  ;;  %v2691_v22 = vadd.f32 %v5707_v3, %v2546_v30  ;;  %v2285_v17 = vmul.f32 %v5724_v5, %v2284_v14  ;;  %v2202_v51 = vmul.f32 %v2154_v52, %v3722_v36  ;;  %v6644_v20 = vld [vmem:[#allocation88_spill] sm:$0xff] }
 0x49b   :  { %v2870_v25 = vmax.f32 %v2869_v28, %v2683_v43  ;;  %v2850_v55 = vrot.slane %v5616_v15, 2  ;;  %v2162_v34 = vadd.f32 %v2161_v4, %v1971_v46  ;;  %v2753_v49 = vmax.f32 %v2752_v1, %v5676_v60 }
 0x49c   :  { %v2741_v19 = vmax.f32 %v2740_v12, %v2625_v6  ;;  %v2699_v54 = vadd.f32 %v5707_v3, %v2554_v45  ;;  %v2718_v42 = vrot.slane %v2717_v57, 4  ;;  %v2731_v7 = vrot.slane %v2730_v47, 4 }
 0x49d   :  { %v2871_v29 = vmax.f32 %v2870_v25, %v2691_v22  ;;  %v5773_v40 = vsub.f32 %v6644_v20, %v5538_v63  ;;  %v1979_v41 = vmul.f32 %v5759_v59, %v5759_v59  ;;  %v2626_v14 = vadd.f32 %v6618_v33, %v6645_v48  ;;  %v6652_v20 = vld [vmem:[#allocation37_spill] sm:$0xff] }
 0x49e   :  { %v2633_v31 = vadd.f32 %v5204_v0, %v5605_v35  ;;  %v2707_v60 = vadd.f32 %v5707_v3, %v2562_v50  ;;  %v2286_v27 = vmul.f32 0.5, %v2285_v17  ;;  %v5782_v30 = vadd.f32 1e-05, %v2202_v51  ;;  %v6648_v35 = vld [vmem:[#allocation21_spill] sm:$0xff]  ;;  %v6649_v50 = vld [vmem:[#allocation27_spill] sm:$0xff] }
 0x49f   :  { %v2872_v23 = vmax.f32 %v2871_v29, %v2699_v54  ;;  %v6647_v9 = vrot.slane %v6646_v39, 2  ;;  %v2851_v4 = vmax.f32 %v5616_v15, %v2850_v55  ;;  %v2163_v12 = vadd.f32 %v2162_v34, %v1979_v41  ;;  %v6650_v15 = vld [vmem:[#allocation89_spill] sm:$0xff] }
 0x4a0   :  { %v2742_v1 = vmax.f32 %v2741_v19, %v2633_v31  ;;  %v2719_v43 = vmax.f32 %v2717_v57, %v2718_v42  ;;  %v2732_v28 = vmax.f32 %v2730_v47, %v2731_v7  ;;  %v2754_v32 = vmax.f32 %v2753_v49, %v2626_v14  ;;  %v6651_v57 = vld [vmem:[#allocation36_spill] sm:$0xff]  ;;  %v6653_v14 = vld [vmem:[#allocation38_spill] sm:$0xff] }
 0x4a1   :  { %v2825_v52 = vmax.f32 %v6646_v39, %v6647_v9  ;;  %v5788_v45 = vmax.f32 %v2872_v23, %v2707_v60  ;;  %v2865_v46 = vrot.slane %v6648_v35, 1  ;;  %v5793_v6 = vsub.f32 %v6649_v50, %v5538_v63  ;;  %v6654_v23 = vld [vmem:[#allocation39_spill] sm:$0xff] }
 0x4a2   :  { %v1987_v22 = vmul.f32 %v5773_v40, %v5773_v40  ;;  %v2641_v25 = vadd.f32 %v5204_v0, %v5608_v26  ;;  %v2839_v17 = vrot.slane %v6650_v15, 1  ;;  %v2287_v51 = vsub.f32 1.5, %v2286_v27 }
 0x4a3   :  { %3419 = vrsqrt.f32 %v5782_v30  ;;  %v2634_v47 = vadd.f32 %v6618_v33, %v6651_v57  ;;  %v2852_v55 = vrot.slane %v2851_v4, 1  ;;  %v2720_v49 = vrot.slane %v2719_v43, 2 }
 0x4a4   :  { %v2164_v34 = vadd.f32 %v2163_v12, %v1987_v22  ;;  %v2743_v19 = vmax.f32 %v2742_v1, %v2641_v25  ;;  %v2733_v54 = vrot.slane %v2732_v28, 2  ;;  %v2826_v42 = vrot.slane %v2825_v52, 1  ;;  %v6655_v25 = vld [vmem:[#allocation62_spill] sm:$0xff] }
 0x4a5   :  { %v2755_v29 = vmax.f32 %v2754_v32, %v2634_v47  ;;  %v2866_v7 = vmax.f32 %v6648_v35, %v2865_v46  ;;  %v5806_v0 = vsub.f32 %v6652_v20, %v5538_v63  ;;  %v1995_v26 = vmul.f32 %v5793_v6, %v5793_v6 }
 0x4a6   :  { %v2840_v41 = vmax.f32 %v6650_v15, %v2839_v17  ;;  %v2288_v48 = vmul.f32 %v5724_v5, %v2287_v51  ;;  %vm2290_vm7 = vweird.f32 %v5724_v5  ;;  %v2642_v31 = vadd.f32 %v6618_v33, %v6653_v14 }
 0x4a7   :  { %v2853_v60 = vmax.f32 %v2851_v4, %v2852_v55  ;;  %v5817_v27 = vsub.f32 %v6654_v23, %v5538_v63  ;;  %v2165_v39 = vadd.f32 %v2164_v34, %v1995_v26  ;;  %v2744_v9 = vrot.slane %v2743_v19, 4  ;;  %v6656_v55 = vld [vmem:[#allocation70_spill] sm:$0xff] }
 0x4a8   :  { %vm2289_vm8 = vweird.f32 %v5659_v53  ;;  %v2721_v1 = vmax.f32 %v2719_v43, %v2720_v49  ;;  %v2734_v32 = vmax.f32 %v2732_v28, %v2733_v54  ;;  %v2756_v35 = vmax.f32 %v2755_v29, %v2642_v31 }
 0x4a9   :  { %v3420_v12 = vpop.eup %3419  ;;  %v2827_v46 = vmax.f32 %v2825_v52, %v2826_v42  ;;  %vm2291_vm9 = vmor %vm2289_vm8, %vm2290_vm7  ;;  %v2003_v50 = vmul.f32 %v5806_v0, %v5806_v0  ;;  %v2943_v22 = vrot.slane %v2866_v7, 2  ;;  %v2941_v33 = vrot.slane %v2840_v41, 6 }
 0x4aa   :  { %v5823_v4 = vsel %vm2291_vm9, %v5724_v5, %v2288_v48  ;;  %v5827_v15 = vsub.f32 %v6655_v25, %v5538_v63  ;;  %v2942_v17 = vrot.slane %v2853_v60, 4  ;;  %v2264_v53 = vmul.f32 %v3420_v12, %v5782_v30  ;;  %v6657_v5 = vld [vmem:[#allocation58_spill] sm:$0xff] }
 0x4ab   :  { %v2166_v43 = vadd.f32 %v2165_v39, %v2003_v50  ;;  %v2745_v28 = vmax.f32 %v2743_v19, %v2744_v9  ;;  %v2011_v52 = vmul.f32 %v5817_v27, %v5817_v27  ;;  %v2722_v51 = vrot.slane %v2721_v1, 1  ;;  %v6658_v19 = vld [vmem:[#allocation60_spill] sm:$0xff] }
 0x4ac   :  { %v2735_v57 = vrot.slane %v2734_v32, 1  ;;  %v2757_v47 = vrot.slane %v2756_v35, 4  ;;  %v2364_v34 = vmul.f32 %v5823_v4, %v6656_v55  ;;  %v2372_v49 = vmul.f32 %v5823_v4, %v6657_v5  ;;  %v6659_v55 = vld [vmem:[#allocation40_spill] sm:$0xff] }
 0x4ad   :  { %v5837_v54 = vperm.slane %v6632_v44, 7  ;;  %v2265_v29 = vmul.f32 %v3420_v12, %v2264_v53  ;;  %v5840_v42 = vperm.slane %v6637_v16, 7  ;;  %v5844_v7 = vsub.f32 %v6658_v19, %v5538_v63 }
 0x4ae   :  { %v2019_v20 = vmul.f32 %v5827_v15, %v5827_v15  ;;  %v2736_v26 = vmax.f32 %v2734_v32, %v2735_v57  ;;  %v2167_v48 = vadd.f32 %v2166_v43, %v2011_v52  ;;  %v2746_v14 = vrot.slane %v2745_v28, 2 }
 0x4af   :  { %v2266_v41 = vmul.f32 0.5, %v2265_v29  ;;  %v2723_v31 = vmax.f32 %v2721_v1, %v2722_v51  ;;  %v2758_v60 = vmax.f32 %v2756_v35, %v2757_v47  ;;  %v2509_v39 = vmul.f32 %v5837_v54, %v2364_v34 }
 0x4b0   :  { %v2935_v23 = vrot.slane %v2736_v26, 6  ;;  %v2517_v9 = vmul.f32 %v5837_v54, %v2372_v49  ;;  %vm2270_vm13 = vweird.f32 %v3420_v12  ;;  %v2956_v32 = vsel %vm2947_vm10, %v2827_v46, %v2941_v33  ;;  %v6661_v26 = vld [vmem:[#allocation41_spill] sm:$0xff] }
 0x4b1   :  { %v2267_v50 = vsub.f32 1.5, %v2266_v41  ;;  %v2957_v25 = vsel %vm2949_vm11, %v2942_v17, %v2943_v22  ;;  %vm2269_vm14 = vweird.f32 %v5782_v30  ;;  %v2380_v1 = vmul.f32 %v5823_v4, %v5414_v24 }
 0x4b2   :  { %v5851_v63 = vsel %vm2947_vm10, %v2723_v31, %v2935_v23  ;;  %v2168_v35 = vadd.f32 %v2167_v48, %v2019_v20  ;;  %v2759_v43 = vrot.slane %v2758_v60, 2  ;;  %v2958_v52 = vsel %vm2951_vm12, %v2956_v32, %v2957_v25  ;;  %vm2271_vm15 = vmor %vm2269_vm14, %vm2270_vm13 }
 0x4b3   :  { %v2268_v53 = vmul.f32 %v3420_v12, %v2267_v50  ;;  %v2027_v51 = vmul.f32 %v5844_v7, %v5844_v7  ;;  %v2654_v57 = vadd.f32 %v5840_v42, %v2509_v39  ;;  %v2662_v46 = vadd.f32 %v5840_v42, %v2517_v9 }
 0x4b4   :  { %v2747_v22 = vmax.f32 %v2745_v28, %v2746_v14  ;;  %v2388_v30 = vmul.f32 %v5823_v4, %v5430_v38  ;;  %v2525_v24 = vmul.f32 %v5837_v54, %v2380_v1  ;;  %v2760_v47 = vmax.f32 %v2758_v60, %v2759_v43  ;;  %v6660_v28 = vld [vmem:[#allocation15_spill] sm:$0xff]  ;;  %v6664_v43 = vld [vmem:[#allocation77_spill] sm:$0xff] }
 0x4b5   :  { %v5863_v33 = vsel %vm2271_vm15, %v3420_v12, %v2268_v53  ;;  %v2169_v17 = vadd.f32 %v2168_v35, %v2027_v51  ;;  %v5870_v34 = vmul.f32 %v5678_v8, %v6659_v55  ;;  %v5877_v12 = vperm.slane %v6632_v44, 5  ;;  %v6663_v1 = vld [vmem:[#allocation11_spill] sm:$0xff] }
 0x4b6   :  { %v2362_v5 = vmul.f32 %v5863_v33, %v5500_v37  ;;  %v2370_v49 = vmul.f32 %v5863_v33, %v5510_v18  ;;  %v5881_v38 = vmul.f32 %v5678_v8, %v6660_v28  ;;  %v2396_v29 = vmul.f32 %v5823_v4, %v5444_v11  ;;  %v6662_v37 = vld [vmem:[#allocation10_spill] sm:$0xff]  ;;  %v6665_v51 = vld [vmem:[#allocation19_spill] sm:$0xff] }
 0x4b7   :  { %v2906_v19 = vmax.f32 %v2654_v57, %v2662_v46  ;;  %v2748_v20 = vrot.slane %v2747_v22, 1  ;;  %v5887_v41 = vmul.f32 %v5678_v8, %v6661_v26  ;;  %v5891_v48 = vmul.f32 %v5678_v8, %v6662_v37 }
 0x4b8   :  { %v2404_v18 = vmul.f32 %v5823_v4, %v5456_v61  ;;  %v2378_v14 = vmul.f32 %v5863_v33, %v5520_v10  ;;  %v2533_v31 = vmul.f32 %v5837_v54, %v2388_v30  ;;  %v2670_v11 = vadd.f32 %v5840_v42, %v2525_v24 }
 0x4b9   :  { %v2170_v60 = vrot.slane %v2169_v17, 4  ;;  %v2761_v23 = vrot.slane %v2760_v47, 1  ;;  %v2386_v39 = vmul.f32 %v5863_v33, %v5530_v58  ;;  %v2507_v9 = vmul.f32 %v5877_v12, %v2362_v5  ;;  %v6666_v5 = vld [vmem:[#allocation82_spill] sm:$0xff] }
 0x4ba   :  { %v2515_v50 = vmul.f32 %v5877_v12, %v2370_v49  ;;  %v5904_v32 = vperm.slane %v6637_v16, 5  ;;  %v2412_v61 = vmul.f32 %v5823_v4, %v5468_v62  ;;  %v2541_v10 = vmul.f32 %v5837_v54, %v2396_v29 }
 0x4bb   :  { %v2907_v25 = vmax.f32 %v2906_v19, %v2670_v11  ;;  %v2749_v53 = vmax.f32 %v2747_v22, %v2748_v20  ;;  %v5911_v35 = vmul.f32 %v5678_v8, %v6663_v1  ;;  %v2420_v58 = vmul.f32 %v5823_v4, %v6664_v43 }
 0x4bc   :  { %v2394_v57 = vmul.f32 %v5863_v33, %v6665_v51  ;;  %v2523_v46 = vmul.f32 %v5877_v12, %v2378_v14  ;;  %v2549_v30 = vmul.f32 %v5837_v54, %v2404_v18  ;;  %v2678_v62 = vadd.f32 %v5840_v42, %v2533_v31  ;;  %v6667_v18 = vld [vmem:[#allocation55_spill] sm:$0xff] }
 0x4bd   :  { %v2171_v24 = vadd.f32 %v2170_v60, %v2169_v17  ;;  %v2762_v55 = vmax.f32 %v2760_v47, %v2761_v23  ;;  %v2402_v22 = vmul.f32 %v5863_v33, %v6666_v5  ;;  %v2531_v49 = vmul.f32 %v5877_v12, %v2386_v39  ;;  %v6668_v60 = vld [vmem:[#allocation74_spill] sm:$0xff] }
 0x4be   :  { %v2652_v28 = vadd.f32 %v5904_v32, %v2507_v9  ;;  %v2660_v29 = vadd.f32 %v5904_v32, %v2515_v50  ;;  %v2557_v19 = vmul.f32 %v5837_v54, %v2412_v61  ;;  %v2686_v20 = vadd.f32 %v5840_v42, %v2541_v10 }
 0x4bf   :  { %v2908_v26 = vmax.f32 %v2907_v25, %v2678_v62  ;;  %v2936_v37 = vrot.slane %v2749_v53, 4  ;;  %v2410_v14 = vmul.f32 %v5863_v33, %v6667_v18  ;;  %v2539_v17 = vmul.f32 %v5877_v12, %v2394_v57 }
 0x4c0   :  { %v2668_v47 = vadd.f32 %v5904_v32, %v2523_v46  ;;  %v2880_v31 = vmax.f32 %v2652_v28, %v2660_v29  ;;  %v2694_v11 = vadd.f32 %v5840_v42, %v2549_v30  ;;  %v2418_v23 = vmul.f32 %v5863_v33, %v6668_v60 }
 0x4c1   :  { %v2172_v39 = vrot.slane %v2171_v24, 2  ;;  %v2937_v9 = vrot.slane %v2762_v55, 2  ;;  %v2547_v50 = vmul.f32 %v5877_v12, %v2402_v22  ;;  %v2676_v61 = vadd.f32 %v5904_v32, %v2531_v49  ;;  %v6669_v22 = vld [vmem:[#allocation68_spill] sm:$0xff] }
 0x4c2   :  { %v2881_v10 = vmax.f32 %v2880_v31, %v2668_v47  ;;  %v2966_v25 = vrot.slane %v2958_v52, 7  ;;  %v2909_v53 = vmax.f32 %v2908_v26, %v2686_v20  ;;  %v2555_v51 = vmul.f32 %v5877_v12, %v2410_v14  ;;  %v6670_v14 = vld [vmem:[#allocation69_spill] sm:$0xff] }
 0x4c3   :  { %v2173_v1 = vadd.f32 %v2172_v39, %v2171_v24  ;;  %v2950_v43 = vsel %vm2949_vm11, %v2936_v37, %v2937_v9  ;;  %v2684_v57 = vadd.f32 %v5904_v32, %v2539_v17  ;;  %v2563_v30 = vmul.f32 %v5877_v12, %v2418_v23  ;;  %v6671_v47 = vld [vmem:[#allocation57_spill] sm:$0xff] }
 0x4c4   :  { %v2882_v46 = vmax.f32 %v2881_v10, %v2676_v61  ;;  %v2952_v55 = vsel %vm2951_vm12, %v5851_v63, %v2950_v43  ;;  %v2692_v52 = vadd.f32 %v5904_v32, %v2547_v50  ;;  %v2337_v49 = vmul.f32 %v5678_v8, %v6669_v22  ;;  %v6678_v22 = vld [vmem:[#allocation65_spill] sm:$0xff] }
 0x4c5   :  { %v2174_v62 = vrot.slane %v2173_v1, 1  ;;  %v2968_v24 = vsel %vm2967_vm0, %v2966_v25, %v2952_v55  ;;  %v2874_v28 = vrot.slane %v5788_v45, 4  ;;  %v2910_v26 = vmax.f32 %v2909_v53, %v2694_v11 }
 0x4c6   :  { %v2883_v5 = vmax.f32 %v2882_v46, %v2684_v57  ;;  %v2970_v20 = vsel %vm2969_vm1, %v2966_v25, %v2968_v24  ;;  %v2700_v37 = vadd.f32 %v5904_v32, %v2555_v51  ;;  %v2345_v17 = vmul.f32 %v5678_v8, %v6670_v14  ;;  %v6674_v51 = vld [vmem:[#allocation73_spill] sm:$0xff]  ;;  %v6675_v57 = vld [vmem:[#allocation75_spill] sm:$0xff] }
 0x4c7   :  { %v2175_v29 = vadd.f32 %v2174_v62, %v2173_v1  ;;  %v2972_v63 = vsel %vm2971_vm2, %v2966_v25, %v2970_v20  ;;  %v2353_v31 = vmul.f32 %v5678_v8, %v6671_v47  ;;  %v2565_v39 = vmul.f32 %v5837_v54, %v2420_v58  ;;  %v6676_v46 = vld [vmem:[#allocation9_spill] sm:$0xff]  ;;  %v6677_v62 = vld [vmem:[#allocation14_spill] sm:$0xff] }
 0x4c8   :  { %v2884_v18 = vmax.f32 %v2883_v5, %v2692_v52  ;;  %v2974_v23 = vsel %vm2973_vm3, %v2966_v25, %v2972_v63  ;;  %v2702_v9 = vadd.f32 %v5840_v42, %v2557_v19  ;;  %v2708_v11 = vadd.f32 %v5904_v32, %v2563_v30  ;;  %v6672_v25 = vld [vmem:[#allocation63_spill] sm:$0xff]  ;;  %v6673_v19 = vld [vmem:[#allocation48_spill] sm:$0xff] }
 0x4c9   :  { %v2203_v60 = vmul.f32 %v2175_v29, %v3722_v36  ;;  %2984 = vst [vmem:[#allocation5] sm:$0xff] %v2974_v23  ;;  %v5961_v61 = vmul.f32 %v5683_v56, %v5870_v34  ;;  %v5965_v10 = vmul.f32 %v5683_v56, %v5881_v38  ;;  %v2875_v36 = vmax.f32 %v5788_v45, %v2874_v28  ;;  %v6679_v29 = vld [vmem:[#allocation42_spill] sm:$0xff] }
 0x4ca   :  { %v2885_v50 = vmax.f32 %v2884_v18, %v2700_v37  ;;  %v2300_v58 = vmul.f32 %v5823_v4, %v6672_v25  ;;  %v2308_v53 = vmul.f32 %v5823_v4, %v6673_v19  ;;  %v2911_v1 = vmax.f32 %v2910_v26, %v2702_v9  ;;  %v6680_v19 = vld [vmem:[#allocation49_spill] sm:$0xff] }
 0x4cb   :  { %v5968_v8 = vadd.f32 1e-05, %v2203_v60  ;;  %v5976_v34 = vmul.f32 %v5683_v56, %v5887_v41  ;;  %v2316_v38 = vmul.f32 %v5823_v4, %v6674_v51  ;;  %v2324_v45 = vmul.f32 %v5823_v4, %v6675_v57  ;;  %v6683_v51 = vld [vmem:[#allocation61_spill] sm:$0xff] }
 0x4cc   :  { %v2886_v43 = vmax.f32 %v2885_v50, %v2708_v11  ;;  %v2332_v30 = vmul.f32 %v5823_v4, %v6676_v46  ;;  %v2340_v55 = vmul.f32 %v5823_v4, %v6677_v62  ;;  %v2710_v52 = vadd.f32 %v5840_v42, %v2565_v39 }
 0x4cd   :  { %3421 = vrsqrt.f32 %v5968_v8  ;;  %v5990_v41 = vmul.f32 %v5683_v56, %v5891_v48  ;;  %v2876_v24 = vrot.slane %v2875_v36, 2  ;;  %v2348_v28 = vmul.f32 %v5823_v4, %v6678_v22 }
 0x4ce   :  { %v2887_v5 = vrot.slane %v2886_v43, 4  ;;  %v2356_v20 = vmul.f32 %v5823_v4, %v6679_v29  ;;  %v2445_v26 = vmul.f32 %v5837_v54, %v2300_v58  ;;  %v2453_v37 = vmul.f32 %v5837_v54, %v2308_v53  ;;  %v6686_v29 = vld [vmem:[#allocation71_spill] sm:$0xff] }
 0x4cf   :  { %v2912_v18 = vmax.f32 %v2911_v1, %v2710_v52  ;;  %v6000_v14 = vmul.f32 %v5683_v56, %v5911_v35  ;;  %v6003_v48 = vmul.f32 %v5683_v56, %v2337_v49  ;;  %v6006_v47 = vmul.f32 %v5683_v56, %v2345_v17  ;;  %v6681_v1 = vld [vmem:[#allocation76_spill] sm:$0xff] }
 0x4d0   :  { %v2888_v63 = vmax.f32 %v2886_v43, %v2887_v5  ;;  %v6009_v60 = vmul.f32 %v5683_v56, %v2353_v31  ;;  %v2461_v4 = vmul.f32 %v5837_v54, %v2316_v38  ;;  %v2469_v23 = vmul.f32 %v5837_v54, %v2324_v45  ;;  %v6682_v43 = vld [vmem:[#allocation81_spill] sm:$0xff]  ;;  %v6684_v45 = vld [vmem:[#allocation84_spill] sm:$0xff] }
 0x4d1   :  { %v2477_v39 = vmul.f32 %v5837_v54, %v2332_v30  ;;  %v2485_v9 = vmul.f32 %v5837_v54, %v2340_v55  ;;  %v2877_v35 = vmax.f32 %v2875_v36, %v2876_v24  ;;  %v2493_v50 = vmul.f32 %v5837_v54, %v2348_v28  ;;  %v6685_v30 = vld [vmem:[#allocation66_spill] sm:$0xff] }
 0x4d2   :  { %v6017_v49 = vmul.f32 %v5837_v54, %v2356_v20  ;;  %v2889_v17 = vrot.slane %v2888_v63, 2  ;;  %v6020_v25 = vadd.f32 %v5840_v42, %v2445_v26  ;;  %v6023_v56 = vadd.f32 %v5840_v42, %v2453_v37  ;;  %v6687_v26 = vld [vmem:[#allocation12_spill] sm:$0xff] }
 0x4d3   :  { %v3422_v11 = vpop.eup %3421  ;;  %v2913_v31 = vrot.slane %v2912_v18, 4  ;;  %v2298_v53 = vmul.f32 %v5863_v33, %v6680_v19  ;;  %v2306_v36 = vmul.f32 %v5863_v33, %v6681_v1  ;;  %v2314_v54 = vmul.f32 %v5863_v33, %v6682_v43 }
 0x4d4   :  { %v2274_v58 = vmul.f32 %v3422_v11, %v5968_v8  ;;  %v2322_v38 = vmul.f32 %v5863_v33, %v6683_v51  ;;  %v6035_v57 = vadd.f32 %v5840_v42, %v2461_v4  ;;  %v2330_v46 = vmul.f32 %v5863_v33, %v6684_v45 }
 0x4d5   :  { %v2338_v62 = vmul.f32 %v5863_v33, %v6685_v30  ;;  %v2878_v52 = vrot.slane %v2877_v35, 1  ;;  %v6042_v5 = vadd.f32 %v5840_v42, %v2469_v23  ;;  %v6045_v24 = vadd.f32 %v5840_v42, %v2477_v39  ;;  %v6688_v30 = vld [vmem:[#allocation85_spill] sm:$0xff] }
 0x4d6   :  { %v2275_v55 = vmul.f32 %v3422_v11, %v2274_v58  ;;  %v2890_v22 = vmax.f32 %v2888_v63, %v2889_v17  ;;  %v6047_v28 = vmax.f32 %v2912_v18, %v2913_v31  ;;  %v2346_v20 = vmul.f32 %v5863_v33, %v6686_v29 }
 0x4d7   :  { %v2354_v37 = vmul.f32 %v5863_v33, %v6687_v26  ;;  %v2443_v19 = vmul.f32 %v5877_v12, %v2298_v53  ;;  %v2451_v58 = vmul.f32 %v5877_v12, %v2306_v36  ;;  %v2459_v23 = vmul.f32 %v5877_v12, %v2314_v54 }
 0x4d8   :  { %v2276_v4 = vmul.f32 0.5, %v2275_v55  ;;  %v2467_v1 = vmul.f32 %v5877_v12, %v2322_v38  ;;  %v2475_v39 = vmul.f32 %v5877_v12, %v2330_v46  ;;  %v2483_v18 = vmul.f32 %v5877_v12, %v2338_v62  ;;  %v6689_v55 = vld [vmem:[#allocation47_spill] sm:$0xff] }
 0x4d9   :  { %vm2280_vm4 = vweird.f32 %v3422_v11  ;;  %v6059_v17 = vmax.f32 %v2877_v35, %v2878_v52  ;;  %v6062_v31 = vadd.f32 %v5840_v42, %v2485_v9  ;;  %v6065_v33 = vadd.f32 %v5840_v42, %v2493_v50 }
 0x4da   :  { %v2277_v63 = vsub.f32 1.5, %v2276_v4  ;;  %v2891_v53 = vrot.slane %v2890_v22, 1  ;;  %v2491_v36 = vmul.f32 %v5877_v12, %v2346_v20  ;;  %v2499_v43 = vmul.f32 %v5877_v12, %v2354_v37 }
 0x4db   :  { %vm2279_vm5 = vweird.f32 %v5968_v8  ;;  %v2915_v51 = vrot.slane %v6047_v28, 2  ;;  %v6072_v38 = vadd.f32 %v5904_v32, %v2443_v19  ;;  %v6075_v35 = vadd.f32 %v5904_v32, %v2451_v58  ;;  %v6690_v58 = vld [vmem:[#allocation79_spill] sm:$0xff] }
 0x4dc   :  { %v2278_v54 = vmul.f32 %v3422_v11, %v2277_v63  ;;  %v6078_v9 = vadd.f32 %v5904_v32, %v2459_v23  ;;  %vm2281_vm6 = vmor %vm2279_vm5, %vm2280_vm4  ;;  %v6081_v50 = vadd.f32 %v5904_v32, %v2467_v1  ;;  %v6084_v12 = vadd.f32 %v5904_v32, %v2475_v39 }
 0x4dd   :  { %v6087_v8 = vadd.f32 %v5904_v32, %v2483_v18  ;;  %v2892_v46 = vmax.f32 %v2890_v22, %v2891_v53  ;;  %v6092_v29 = vperm.slane %v6632_v44, 6  ;;  %v6095_v20 = vadd.f32 %v5904_v32, %v2491_v36  ;;  %v6692_v18 = vld [vmem:[#allocation18_spill] sm:$0xff] }
 0x4de   :  { %v2282_v45 = vsel %vm2281_vm6, %v3422_v11, %v2278_v54  ;;  %v6098_v26 = vadd.f32 %v5904_v32, %v2499_v43  ;;  %v2587_v37 = vadd.f32 %v5707_v3, %v5961_v61  ;;  %v2595_v11 = vadd.f32 %v5707_v3, %v5965_v10 }
 0x4df   :  { %v2299_v62 = vmul.f32 %v2282_v45, %v6688_v30  ;;  %v2307_v52 = vmul.f32 %v2282_v45, %v6689_v55  ;;  %v2363_v22 = vmul.f32 %v2282_v45, %v5728_v2  ;;  %v2371_v4 = vmul.f32 %v2282_v45, %v5759_v59 }
 0x4e0   :  { %v2603_v44 = vadd.f32 %v5707_v3, %v5976_v34  ;;  %v6110_v19 = vadd.f32 %v5707_v3, %v5990_v41  ;;  %v2315_v32 = vmul.f32 %v2282_v45, %v6690_v58  ;;  %v2379_v23 = vmul.f32 %v2282_v45, %v5773_v40  ;;  %v6691_v41 = vld [vmem:[#allocation16_spill] sm:$0xff]  ;;  %v6693_v40 = vld [vmem:[#allocation43_spill] sm:$0xff] }
 0x4e1   :  { %v6115_v61 = vperm.slane %v6637_v16, 6  ;;  %v2619_v10 = vadd.f32 %v5707_v3, %v6000_v14  ;;  %v2944_v2 = vrot.slane %v2892_v46, 6  ;;  %v2444_v59 = vmul.f32 %v6092_v29, %v2299_v62 }
 0x4e2   :  { %v2452_v1 = vmul.f32 %v6092_v29, %v2307_v52  ;;  %v6123_v34 = vadd.f32 %v5707_v3, %v6003_v48  ;;  %v2323_v39 = vmul.f32 %v2282_v45, %v6691_v41  ;;  %v2331_v63 = vmul.f32 %v2282_v45, %v6692_v18 }
 0x4e3   :  { %v2339_v53 = vmul.f32 %v2282_v45, %v6693_v40  ;;  %v2387_v16 = vmul.f32 %v2282_v45, %v5793_v6  ;;  %v2347_v36 = vmul.f32 %v2282_v45, %v5702_v13  ;;  %v2355_v14 = vmul.f32 %v2282_v45, %v5711_v21 }
 0x4e4   :  { %v2508_v43 = vmul.f32 %v6092_v29, %v2363_v22  ;;  %v2516_v54 = vmul.f32 %v6092_v29, %v2371_v4  ;;  %v2395_v46 = vmul.f32 %v2282_v45, %v5806_v0  ;;  %v2403_v48 = vmul.f32 %v2282_v45, %v5817_v27 }
 0x4e5   :  { %v2460_v30 = vmul.f32 %v6092_v29, %v2315_v32  ;;  %v2524_v62 = vmul.f32 %v6092_v29, %v2379_v23  ;;  %v2411_v55 = vmul.f32 %v2282_v45, %v5827_v15  ;;  %v2419_v6 = vmul.f32 %v2282_v45, %v5844_v7 }
 0x4e6   :  { %v2589_v13 = vadd.f32 %v6115_v61, %v2444_v59  ;;  %v2597_v21 = vadd.f32 %v6115_v61, %v2452_v1  ;;  %v2468_v52 = vmul.f32 %v6092_v29, %v2323_v39  ;;  %v2476_v22 = vmul.f32 %v6092_v29, %v2331_v63 }
 0x4e7   :  { %v2484_v0 = vmul.f32 %v6092_v29, %v2339_v53  ;;  %v2532_v27 = vmul.f32 %v6092_v29, %v2387_v16  ;;  %v2492_v4 = vmul.f32 %v6092_v29, %v2347_v36  ;;  %v2500_v58 = vmul.f32 %v6092_v29, %v2355_v14 }
 0x4e8   :  { %v2653_v15 = vadd.f32 %v6115_v61, %v2508_v43  ;;  %v2661_v7 = vadd.f32 %v6115_v61, %v2516_v54  ;;  %v2540_v45 = vmul.f32 %v6092_v29, %v2395_v46  ;;  %v2548_v32 = vmul.f32 %v6092_v29, %v2403_v48 }
 0x4e9   :  { %v2605_v23 = vadd.f32 %v6115_v61, %v2460_v30  ;;  %v2669_v59 = vadd.f32 %v6115_v61, %v2524_v62  ;;  %v2763_v41 = vmax.f32 %v2587_v37, %v2595_v11  ;;  %v2776_v39 = vmax.f32 %v6072_v38, %v6075_v35 }
 0x4ea   :  { %v2893_v1 = vmax.f32 %v2653_v15, %v2661_v7  ;;  %v2789_v18 = vmax.f32 %v2589_v13, %v2597_v21  ;;  %v2613_v63 = vadd.f32 %v6115_v61, %v2468_v52  ;;  %v2677_v40 = vadd.f32 %v6115_v61, %v2532_v27 }
 0x4eb   :  { %v2802_v53 = vmax.f32 %v6020_v25, %v6023_v56  ;;  %v6161_v16 = vsel %vm2947_vm10, %v6059_v17, %v2944_v2  ;;  %v2764_v14 = vmax.f32 %v2763_v41, %v2603_v44  ;;  %v2777_v43 = vmax.f32 %v2776_v39, %v6078_v9 }
 0x4ec   :  { %v2894_v36 = vmax.f32 %v2893_v1, %v2669_v59  ;;  %v2790_v37 = vmax.f32 %v2789_v18, %v2605_v23  ;;  %v2556_v11 = vmul.f32 %v6092_v29, %v2411_v55  ;;  %v2621_v38 = vadd.f32 %v6115_v61, %v2476_v22 }
 0x4ed   :  { %v2685_v35 = vadd.f32 %v6115_v61, %v2540_v45  ;;  %v2803_v54 = vmax.f32 %v2802_v53, %v6035_v57  ;;  %v2765_v25 = vmax.f32 %v2764_v14, %v6110_v19  ;;  %v2778_v56 = vmax.f32 %v2777_v43, %v6081_v50 }
 0x4ee   :  { %v2895_v46 = vmax.f32 %v2894_v36, %v2677_v40  ;;  %v2791_v17 = vmax.f32 %v2790_v37, %v2613_v63  ;;  %v2564_v2 = vmul.f32 %v6092_v29, %v2419_v6  ;;  %v2629_v44 = vadd.f32 %v6115_v61, %v2484_v0 }
 0x4ef   :  { %v2693_v9 = vadd.f32 %v6115_v61, %v2548_v32  ;;  %v2804_v48 = vmax.f32 %v2803_v54, %v6042_v5  ;;  %v2766_v62 = vmax.f32 %v2765_v25, %v2619_v10  ;;  %v2779_v55 = vmax.f32 %v2778_v56, %v6084_v12 }
 0x4f0   :  { %v2896_v30 = vmax.f32 %v2895_v46, %v2685_v35  ;;  %v2792_v13 = vmax.f32 %v2791_v17, %v2621_v38  ;;  %v2637_v57 = vadd.f32 %v6115_v61, %v2492_v4  ;;  %v2701_v19 = vadd.f32 %v6115_v61, %v2556_v11 }
 0x4f1   :  { %v2635_v50 = vadd.f32 %v5707_v3, %v6006_v47  ;;  %v2805_v29 = vmax.f32 %v2804_v48, %v6045_v24  ;;  %v2767_v21 = vmax.f32 %v2766_v62, %v6123_v34  ;;  %v2780_v52 = vmax.f32 %v2779_v55, %v6087_v8 }
 0x4f2   :  { %v2897_v6 = vmax.f32 %v2896_v30, %v2693_v9  ;;  %v2793_v5 = vmax.f32 %v2792_v13, %v2629_v44  ;;  %v2645_v10 = vadd.f32 %v6115_v61, %v2500_v58  ;;  %v2709_v12 = vadd.f32 %v6115_v61, %v2564_v2 }
 0x4f3   :  { %v2643_v22 = vadd.f32 %v5707_v3, %v6009_v60  ;;  %v2806_v0 = vmax.f32 %v2805_v29, %v6062_v31  ;;  %v2768_v4 = vmax.f32 %v2767_v21, %v2635_v50  ;;  %v2781_v47 = vmax.f32 %v2780_v52, %v6095_v20 }
 0x4f4   :  { %v2898_v27 = vmax.f32 %v2897_v6, %v2701_v19  ;;  %v2794_v24 = vmax.f32 %v2793_v5, %v2637_v57  ;;  %v2646_v34 = vadd.f32 %v5840_v42, %v6017_v49  ;;  %v2916_v3 = vmax.f32 %v6047_v28, %v2915_v51 }
 0x4f5   :  { %v2807_v8 = vmax.f32 %v2806_v0, %v6065_v33  ;;  %v2769_v7 = vmax.f32 %v2768_v4, %v2643_v22  ;;  %v2782_v58 = vmax.f32 %v2781_v47, %v6098_v26 }
 0x4f6   :  { %v2899_v15 = vmax.f32 %v2898_v27, %v2709_v12  ;;  %v2795_v61 = vmax.f32 %v2794_v24, %v2645_v10  ;;  %v2917_v33 = vrot.slane %v2916_v3, 1 }
 0x4f7   :  { %v2808_v60 = vmax.f32 %v2807_v8, %v2646_v34  ;;  %v2770_v45 = vrot.slane %v2769_v7, 4  ;;  %v2783_v32 = vrot.slane %v2782_v58, 4 }
 0x4f8   :  { %v2900_v31 = vrot.slane %v2899_v15, 4  ;;  %v2796_v20 = vrot.slane %v2795_v61, 4  ;;  %v2918_v14 = vmax.f32 %v2916_v3, %v2917_v33 }
 0x4f9   :  { %v2809_v23 = vrot.slane %v2808_v60, 4  ;;  %v2771_v1 = vmax.f32 %v2769_v7, %v2770_v45  ;;  %v2784_v42 = vmax.f32 %v2782_v58, %v2783_v32 }
 0x4fa   :  { %v2901_v59 = vmax.f32 %v2899_v15, %v2900_v31  ;;  %v2797_v49 = vmax.f32 %v2795_v61, %v2796_v20  ;;  %v2946_v17 = vrot.slane %v2918_v14, 2 }
 0x4fb   :  { %v2810_v41 = vmax.f32 %v2808_v60, %v2809_v23  ;;  %v2772_v18 = vrot.slane %v2771_v1, 2  ;;  %v2785_v26 = vrot.slane %v2784_v42, 2 }
 0x4fc   :  { %v2902_v39 = vrot.slane %v2901_v59, 2  ;;  %v2798_v63 = vrot.slane %v2797_v49, 2 }
 0x4fd   :  { %v2811_v40 = vrot.slane %v2810_v41, 2  ;;  %v2773_v36 = vmax.f32 %v2771_v1, %v2772_v18  ;;  %v2786_v28 = vmax.f32 %v2784_v42, %v2785_v26 }
 0x4fe   :  { %v2903_v53 = vmax.f32 %v2901_v59, %v2902_v39  ;;  %v2799_v51 = vmax.f32 %v2797_v49, %v2798_v63 }
 0x4ff   :  { %v2812_v43 = vmax.f32 %v2810_v41, %v2811_v40  ;;  %v2774_v11 = vrot.slane %v2773_v36, 1  ;;  %v2787_v38 = vrot.slane %v2786_v28, 1 }
 0x500   :  { %v2904_v37 = vrot.slane %v2903_v53, 1  ;;  %v2800_v35 = vrot.slane %v2799_v51, 1 }
 0x501   :  { %v2813_v54 = vrot.slane %v2812_v43, 1  ;;  %v2788_v25 = vmax.f32 %v2786_v28, %v2787_v38  ;;  %v2775_v9 = vmax.f32 %v2773_v36, %v2774_v11 }
 0x502   :  { %v2905_v46 = vmax.f32 %v2903_v53, %v2904_v37  ;;  %v2801_v56 = vmax.f32 %v2799_v51, %v2800_v35 }
 0x503   :  { %v2814_v2 = vmax.f32 %v2812_v43, %v2813_v54  ;;  %v2938_v48 = vrot.slane %v2788_v25, 6 }
 0x504   :  { %v2945_v44 = vrot.slane %v2905_v46, 4  ;;  %v2939_v30 = vrot.slane %v2801_v56, 4 }
 0x505   :  { %v2940_v62 = vrot.slane %v2814_v2, 2  ;;  %v2953_v55 = vsel %vm2947_vm10, %v2775_v9, %v2938_v48 }
 0x506   :  { %v2960_v13 = vsel %vm2949_vm11, %v2945_v44, %v2946_v17 }
 0x507   :  { %v2954_v57 = vsel %vm2949_vm11, %v2939_v30, %v2940_v62  ;;  %v2961_v19 = vsel %vm2951_vm12, %v6161_v16, %v2960_v13 }
 0x508   :  { %v2955_v50 = vsel %vm2951_vm12, %v2953_v55, %v2954_v57  ;;  %v2977_v29 = vrot.slane %v2961_v19, 7 }
 0x50a   :  { %v2978_v6 = vsel %vm2967_vm0, %v2977_v29, %v2955_v50 }
 0x50b   :  { %v2979_v21 = vsel %vm2969_vm1, %v2977_v29, %v2978_v6 }
 0x50c   :  { %v2980_v52 = vsel %vm2971_vm2, %v2977_v29, %v2979_v21 }
 0x50d   :  { %v2981_v5 = vsel %vm2973_vm3, %v2977_v29, %v2980_v52 }
 0x50e   :  { %2985 = vst [vmem:[#allocation5 + $0x8] sm:$0xff] %v2981_v5 }
 0x50f   :  { %2996 = dma.vmem_to_hbm [thread:$0]  %s2992_s27, 256, %s2994_s29, [#allocation4]  }
 0x510   :  { %3473 = dma.done.wait [#allocation4], 256  }
 0x511   :  { %3474 = vsyncadd [#allocation4], 4294967040 }
 0x512   :  { %3001 = vsyncpa [#allocation3], 1 }
 0x513   :  { %3002 = vsyncpa [#allocation4], 1 }

</bundles_post_ra>
